<compile_context>
chip_gen: v5e
topology: v5e:2x2
jax: 0.10.0
libtpu: 0.0.40
codegen_flags: <defaults>
</compile_context>

<pallas_src>
import jax
import jax.numpy as jnp
import numpy as np
from jax.experimental import pallas as pl
from jax.experimental.pallas import tpu as pltpu

# -----------------------------------------------------------------------------
# Model hyper-parameters (small, consistent with the module's forward)
# -----------------------------------------------------------------------------
BATCH = 2
SEQ = 8
INPUT_DIM = 4
HIDDEN = 32            # hidden_dim (scaled down from 128)
NUM_LAYERS = 2
BIDIRECTIONAL = True
LSTM_OUT_DIM = HIDDEN * (2 if BIDIRECTIONAL else 1)   # 64
ATTN_HIDDEN = 64
PROJ1_DIM = 128
PROJ2_DIM = 32
FC1_DIM = 64
OUTPUT_DIM = 1
BN_EPS = 1e-5

# -----------------------------------------------------------------------------
# Static row offsets inside the two packed weight slabs
# -----------------------------------------------------------------------------
# Slab "w256": 256-lane slab holding the LSTM gate weights/biases.
W256_B1 = 0                                   # (1, 256)
W256_B2 = 1                                   # (1, 256)
W256_WIH1 = 2                                 # (2*INPUT_DIM, 256)
W256_WHH1 = W256_WIH1 + 2 * INPUT_DIM         # (2*HIDDEN, 256)
W256_WIH2 = W256_WHH1 + 2 * HIDDEN            # (4*HIDDEN, 256)
W256_WHH2 = W256_WIH2 + 4 * HIDDEN            # (2*HIDDEN, 256)
W256_ROWS = W256_WHH2 + 2 * HIDDEN            # 266

# Slab "w128": 128-lane slab holding attention/head matrices + all bias rows.
W128_VROW_P1B = 0     # p1b (bn1-folded)                      cols 0:128
W128_VROW_ATTN = 1    # [ab1 | aw2 row]                       cols 0:64 | 64:128
W128_VROW_FC = 2      # [f1b (bn3-folded) | p2b (bn2-folded)] cols 0:64 | 64:96
W128_VROW_OUT = 3     # [fc2 weight row | fc2 bias]           cols 0:64 | 64:65
W128_P1W = 4                                  # (64, 128)
W128_F1WA = W128_P1W + LSTM_OUT_DIM           # (128, 64) in cols 0:64
W128_AW1 = W128_F1WA + PROJ1_DIM              # (64, 64)  in cols 0:64
W128_F1WB = W128_AW1 + LSTM_OUT_DIM           # (32, 64)  in cols 0:64
W128_P2W = W128_F1WB + PROJ2_DIM              # (4, 32)   in cols 0:32
W128_ROWS = W128_P2W + INPUT_DIM              # 296


# -----------------------------------------------------------------------------
# Single fused Pallas kernel
# -----------------------------------------------------------------------------
def _fused_forward_kernel(x_ref, w256_ref, w128_ref, out_ref,
                          xg_sc, lo1_sc, lo2_sc):
    B, S, In = BATCH, SEQ, INPUT_DIM
    H = HIDDEN
    D2 = 2 * H          # per-time-step bidirectional state width (64)
    G = 8 * H           # stacked gate width (256)
    f32 = jnp.float32

    # tanh-only gate trick: i/f/o gate columns were pre-scaled by 0.5 in
    # prepare_params, so sigmoid(x) == 0.5 * tanh(x/2) + 0.5 needs only a VPU
    # affine fixup on the non-g lanes (g lanes keep the plain tanh).
    lane = jax.lax.broadcasted_iota(jnp.int32, (1, G), 1)
    g_mask = (lane >= 4 * H) & (lane < 6 * H)

    def matmul(a, b):
        return jnp.dot(a, b, preferred_element_type=f32)

    # -------- recurrence weights: static slices of one packed slab ----------
    wih1 = w256_ref[W256_WIH1:W256_WIH1 + 2 * In, :]       # (8,   256)
    whh1 = w256_ref[W256_WHH1:W256_WHH1 + D2, :]           # (64,  256)
    wih2 = w256_ref[W256_WIH2:W256_WIH2 + 2 * D2, :]       # (128, 256)
    whh2 = w256_ref[W256_WHH2:W256_WHH2 + D2, :]           # (64,  256)
    b1 = w256_ref[W256_B1:W256_B1 + 1, :]                  # (1, 256)
    b2 = w256_ref[W256_B2:W256_B2 + 1, :]                  # (1, 256)

    def run_layer(whh, store_h):
        """Serial bidirectional recurrence over S steps.  Gate inputs for
        processing step s live at rows [s*B, (s+1)*B) of xg_sc; the fwd/bwd
        time selection is baked into the packed input layout, so there are no
        per-step selects or reversals.  Only (h, c) stay live across steps --
        every hidden state goes straight to VMEM scratch."""
        h = jnp.zeros((B, D2), f32)
        c = jnp.zeros((B, D2), f32)
        for s in range(S):                    # fully unrolled (static indices)
            gates = xg_sc[s * B:(s + 1) * B, :] + matmul(h, whh)
            t = jnp.tanh(gates)               # ONE EUP push over all 256 lanes
            act = jnp.where(g_mask, t, 0.5 * t + 0.5)
            i_g = act[:, 0 * D2:1 * D2]
            f_g = act[:, 1 * D2:2 * D2]
            g_g = act[:, 2 * D2:3 * D2]
            o_g = act[:, 3 * D2:4 * D2]
            c = f_g * c + i_g * g_g
            h = o_g * jnp.tanh(c)
            store_h(s, h)

    # ---------------- layer 1 ----------------
    # x_ref rows are time-major; cols 0:In = x(t), cols In:2In = x(S-1-t),
    # and wih1 is block-diagonal over that packing, so one matmul produces the
    # correct fwd (time s) and bwd (time S-1-s) gate inputs for every step.
    xg_sc[...] = matmul(x_ref[...], wih1) + b1

    def store_layer1(s, h):
        r = S - 1 - s
        # lo1_sc cols 0:2H  : layer-1 output, time-major [h_fwd(t) | h_bwd(t)]
        # lo1_sc cols 2H:4H : same, time-reversed (feeds layer-2 backward gates)
        lo1_sc[s * B:(s + 1) * B, 0:H] = h[:, :H]
        lo1_sc[r * B:(r + 1) * B, H:2 * H] = h[:, H:]
        lo1_sc[r * B:(r + 1) * B, 2 * H:3 * H] = h[:, :H]
        lo1_sc[s * B:(s + 1) * B, 3 * H:4 * H] = h[:, H:]

    run_layer(whh1, store_layer1)

    # ---------------- layer 2 ----------------
    xg_sc[...] = matmul(lo1_sc[...], wih2) + b2

    def store_layer2(s, h):
        r = S - 1 - s
        lo2_sc[s * B:(s + 1) * B, 0:H] = h[:, :H]
        lo2_sc[r * B:(r + 1) * B, H:2 * H] = h[:, H:]

    run_layer(whh2, store_layer2)

    # ---------------- attention (softmax over time, per batch row) ----------
    lo = lo2_sc[...]                                        # (S*B, 2H) time-major
    aw1 = w128_ref[W128_AW1:W128_AW1 + D2, 0:ATTN_HIDDEN]   # (64, 64)
    ab1 = w128_ref[W128_VROW_ATTN:W128_VROW_ATTN + 1, 0:ATTN_HIDDEN]
    aw2 = w128_ref[W128_VROW_ATTN:W128_VROW_ATTN + 1,
                   ATTN_HIDDEN:2 * ATTN_HIDDEN]             # (1, 64) row
    ah = jnp.tanh(matmul(lo, aw1) + ab1)                    # (S*B, 64)
    # N=1 score projection on the VPU (row-broadcast mult + lane reduce)
    # instead of a 1-lane MXU matmul; the attention bias ab2 is dropped since
    # adding a constant before softmax does not change the weights.
    scores = jnp.sum(ah * aw2, axis=-1, keepdims=True)      # (S*B, 1)

    mx = scores[0:B]
    for t in range(1, S):
        mx = jnp.maximum(mx, scores[t * B:(t + 1) * B])
    den = jnp.zeros((B, 1), f32)
    ctx = jnp.zeros((B, D2), f32)
    for t in range(S):
        e_t = jnp.exp(scores[t * B:(t + 1) * B] - mx)       # (B, 1)
        den = den + e_t
        ctx = ctx + e_t * lo[t * B:(t + 1) * B, :]
    context = ctx / den                                     # (B, 2H)

    # -------- MLP head (BatchNorm folded into weights; dropout = identity) ---
    x_last = x_ref[(S - 1) * B:S * B, 0:In]                 # == x[:, -1, :]
    p1w = w128_ref[W128_P1W:W128_P1W + D2, :]               # (64, 128)
    p1b = w128_ref[W128_VROW_P1B:W128_VROW_P1B + 1, :]      # (1, 128)
    p2w = w128_ref[W128_P2W:W128_P2W + In, 0:PROJ2_DIM]     # (4, 32)
    p2b = w128_ref[W128_VROW_FC:W128_VROW_FC + 1,
                   FC1_DIM:FC1_DIM + PROJ2_DIM]             # (1, 32)
    f1wa = w128_ref[W128_F1WA:W128_F1WA + PROJ1_DIM, 0:FC1_DIM]  # (128, 64)
    f1wb = w128_ref[W128_F1WB:W128_F1WB + PROJ2_DIM, 0:FC1_DIM]  # (32, 64)
    f1b = w128_ref[W128_VROW_FC:W128_VROW_FC + 1, 0:FC1_DIM]     # (1, 64)
    f2w = w128_ref[W128_VROW_OUT:W128_VROW_OUT + 1, 0:FC1_DIM]   # (1, 64) row
    f2b = w128_ref[W128_VROW_OUT:W128_VROW_OUT + 1,
                   FC1_DIM:FC1_DIM + OUTPUT_DIM]                 # (1, 1)

    lf = jnp.maximum(matmul(context, p1w) + p1b, 0.0)       # proj1 + bn1 + relu
    sf = jnp.maximum(matmul(x_last, p2w) + p2b, 0.0)        # proj2 + bn2 + relu
    hid = jnp.maximum(matmul(lf, f1wa) + matmul(sf, f1wb) + f1b, 0.0)  # fc1+bn3
    out_ref[...] = jnp.sum(hid * f2w, axis=-1, keepdims=True) + f2b    # fc2


def improved_lstm_forward(prep, x):
    """x: (B, S, INPUT_DIM) float32 -> (B, OUTPUT_DIM) float32."""
    B, S, In = x.shape
    # Build the packed time-major input OUTSIDE the kernel (cheap XLA ops):
    # rows ordered t-major, lanes = [x(t) | x(S-1-t)].
    x_tm = jnp.transpose(x, (1, 0, 2))                       # (S, B, In)
    x_packed = jnp.concatenate([x_tm, jnp.flip(x_tm, axis=0)],
                               axis=-1).reshape(S * B, 2 * In)
    vmem = pl.BlockSpec(memory_space=pltpu.MemorySpace.VMEM)
    return pl.pallas_call(
        _fused_forward_kernel,
        out_shape=jax.ShapeDtypeStruct((B, OUTPUT_DIM), jnp.float32),
        in_specs=[vmem, vmem, vmem],
        out_specs=vmem,
        scratch_shapes=[
            pltpu.VMEM((S * B, 8 * HIDDEN), jnp.float32),    # per-layer gate inputs
            pltpu.VMEM((S * B, 4 * HIDDEN), jnp.float32),    # layer-1 out [tm | rev]
            pltpu.VMEM((S * B, 2 * HIDDEN), jnp.float32),    # layer-2 out (time-major)
        ],
    )(x_packed, prep["w256"], prep["w128"])


# -----------------------------------------------------------------------------
# One-time parameter preparation (weight transposes, direction stacking,
# sigmoid pre-scale, BN folding, slab packing) — done OUTSIDE the hot path.
# -----------------------------------------------------------------------------
def prepare_params(p):
    H = HIDDEN
    f32 = jnp.float32

    def stack_dirs(w_f_t, w_b_t):
        """(Din, 4H) fwd/bwd (in,out) -> block-diagonal (2*Din, 8H) with
        gate-interleaved columns [i_f,i_b,f_f,f_b,g_f,g_b,o_f,o_b]."""
        din = w_f_t.shape[0]
        z = jnp.zeros((din, H), f32)
        top = jnp.concatenate([blk for g in range(4)
                               for blk in (w_f_t[:, g * H:(g + 1) * H], z)],
                              axis=1)
        bot = jnp.concatenate([blk for g in range(4)
                               for blk in (z, w_b_t[:, g * H:(g + 1) * H])],
                              axis=1)
        return jnp.concatenate([top, bot], axis=0)

    def interleave_vec(v_f, v_b):
        return jnp.concatenate(
            [jnp.concatenate([v_f[:, g * H:(g + 1) * H],
                              v_b[:, g * H:(g + 1) * H]], axis=1)
             for g in range(4)], axis=1)

    # Pre-scale for the single-tanh gate activation:
    # sigmoid(x) = 0.5*tanh(x/2) + 0.5, so halve every i/f/o column.
    lane = np.arange(8 * H)
    sig_scale = jnp.asarray(
        np.where((lane >= 4 * H) & (lane < 6 * H), 1.0, 0.5), dtype=f32)

    (l1f, l1b), (l2f, l2b) = p["lstm"]
    wih1 = stack_dirs(l1f["w_ih"].T, l1b["w_ih"].T) * sig_scale     # (8,   256)
    whh1 = stack_dirs(l1f["w_hh"].T, l1b["w_hh"].T) * sig_scale     # (64,  256)
    wih2 = stack_dirs(l2f["w_ih"].T, l2b["w_ih"].T) * sig_scale     # (128, 256)
    whh2 = stack_dirs(l2f["w_hh"].T, l2b["w_hh"].T) * sig_scale     # (64,  256)
    b1 = interleave_vec(l1f["b"], l1b["b"]) * sig_scale             # (1, 256)
    b2 = interleave_vec(l2f["b"], l2b["b"]) * sig_scale

    w256 = jnp.concatenate([b1, b2, wih1, whh1, wih2, whh2], axis=0)
    assert w256.shape == (W256_ROWS, 8 * H)

    # Eval-mode BatchNorm folded into the preceding Linear layers.
    def bn_fold(w_t, b, bn):
        gamma, beta, mean, var = bn[0], bn[1], bn[2], bn[3]
        scale = gamma * jax.lax.rsqrt(var + BN_EPS)
        return w_t * scale, b * scale + (beta - mean * scale)

    p1w, p1b = bn_fold(p["proj1_w"].T, p["proj1_b"], p["bn1"])   # (64,128) (1,128)
    p2w, p2b = bn_fold(p["proj2_w"].T, p["proj2_b"], p["bn2"])   # (4,32)   (1,32)
    f1w, f1b = bn_fold(p["fc1_w"].T, p["fc1_b"], p["bn3"])       # (160,64) (1,64)
    f1wa, f1wb = f1w[:PROJ1_DIM, :], f1w[PROJ1_DIM:, :]

    def pad128(m):
        return jnp.pad(m, ((0, 0), (0, 128 - m.shape[1])))

    vrow_p1b = p1b                                                        # (1,128)
    vrow_attn = jnp.concatenate([p["attn_b1"], p["attn_w2"]], axis=1)     # (1,128)
    vrow_fc = pad128(jnp.concatenate([f1b, p2b], axis=1))                 # (1,128)
    vrow_out = pad128(jnp.concatenate([p["fc2_w"], p["fc2_b"]], axis=1))  # (1,128)

    w128 = jnp.concatenate([
        vrow_p1b, vrow_attn, vrow_fc, vrow_out,
        p1w,                          # (64, 128)
        pad128(f1wa),                 # (128, 64) -> (128, 128)
        pad128(p["attn_w1"].T),       # (64, 64)
        pad128(f1wb),                 # (32, 64)
        pad128(p2w),                  # (4, 32)
    ], axis=0)
    assert w128.shape == (W128_ROWS, 128)
    return {"w256": w256, "w128": w128}


# -----------------------------------------------------------------------------
# Deterministic parameter initialization (torch-style uniform fan-in init)
# -----------------------------------------------------------------------------
def _uniform(key, shape, bound):
    return jax.random.uniform(key, shape, jnp.float32, -bound, bound)


def init_params(key):
    keys = iter(jax.random.split(key, 64))
    params = {}

    lstm_params = []
    bound_h = 1.0 / np.sqrt(HIDDEN)
    for layer in range(NUM_LAYERS):
        in_dim = INPUT_DIM if layer == 0 else LSTM_OUT_DIM
        dirs = []
        for _ in range(2 if BIDIRECTIONAL else 1):
            w_ih = _uniform(next(keys), (4 * HIDDEN, in_dim), bound_h)
            w_hh = _uniform(next(keys), (4 * HIDDEN, HIDDEN), bound_h)
            b_ih = _uniform(next(keys), (4 * HIDDEN,), bound_h)
            b_hh = _uniform(next(keys), (4 * HIDDEN,), bound_h)
            dirs.append({"w_ih": w_ih, "w_hh": w_hh,
                         "b": (b_ih + b_hh).reshape(1, 4 * HIDDEN)})
        lstm_params.append(dirs)
    params["lstm"] = lstm_params

    def linear(out_f, in_f):
        bound = 1.0 / np.sqrt(in_f)
        w = _uniform(next(keys), (out_f, in_f), bound)
        b = _uniform(next(keys), (1, out_f), bound)
        return w, b

    params["attn_w1"], params["attn_b1"] = linear(ATTN_HIDDEN, LSTM_OUT_DIM)
    params["attn_w2"], params["attn_b2"] = linear(1, ATTN_HIDDEN)
    params["proj1_w"], params["proj1_b"] = linear(PROJ1_DIM, LSTM_OUT_DIM)
    params["proj2_w"], params["proj2_b"] = linear(PROJ2_DIM, INPUT_DIM)
    params["fc1_w"], params["fc1_b"] = linear(FC1_DIM, PROJ1_DIM + PROJ2_DIM)
    params["fc2_w"], params["fc2_b"] = linear(OUTPUT_DIM, FC1_DIM)

    # BatchNorm (eval) params stacked as rows [gamma, beta, running_mean, running_var]
    def bn(n):
        gamma = 1.0 + 0.1 * jax.random.normal(next(keys), (n,), jnp.float32)
        beta = 0.1 * jax.random.normal(next(keys), (n,), jnp.float32)
        mean = 0.1 * jax.random.normal(next(keys), (n,), jnp.float32)
        var = jax.random.uniform(next(keys), (n,), jnp.float32, 0.5, 1.5)
        return jnp.stack([gamma, beta, mean, var], axis=0)

    params["bn1"] = bn(PROJ1_DIM)
    params["bn2"] = bn(PROJ2_DIM)
    params["bn3"] = bn(FC1_DIM)
    return params


# -----------------------------------------------------------------------------
# Pure-JAX reference (faithful to the PyTorch module, for correctness check)
# -----------------------------------------------------------------------------
def _lstm_dir_ref(x_tm, w_ih, w_hh, b, reverse):
    S, B, _ = x_tm.shape
    H = w_hh.shape[1]
    h = jnp.zeros((B, H), jnp.float32)
    c = jnp.zeros((B, H), jnp.float32)
    order = range(S - 1, -1, -1) if reverse else range(S)
    outs = [None] * S
    for t in order:
        gates = x_tm[t] @ w_ih.T + h @ w_hh.T + b
        i_g, f_g, g_g, o_g = jnp.split(gates, 4, axis=-1)
        i_g = jax.nn.sigmoid(i_g)
        f_g = jax.nn.sigmoid(f_g)
        g_g = jnp.tanh(g_g)
        o_g = jax.nn.sigmoid(o_g)
        c = f_g * c + i_g * g_g
        h = o_g * jnp.tanh(c)
        outs[t] = h
    return jnp.stack(outs, axis=0)


def forward_ref(params, x):
    x_last = x[:, -1, :]
    layer_in = jnp.transpose(x, (1, 0, 2))
    for layer in range(NUM_LAYERS):
        outs = []
        for d, reverse in enumerate((False, True) if BIDIRECTIONAL else (False,)):
            lp = params["lstm"][layer][d]
            outs.append(_lstm_dir_ref(layer_in, lp["w_ih"], lp["w_hh"],
                                      lp["b"], reverse))
        layer_in = jnp.concatenate(outs, axis=-1)
    lo = jnp.transpose(layer_in, (1, 0, 2))

    h = jnp.tanh(lo @ params["attn_w1"].T + params["attn_b1"])
    scores = h @ params["attn_w2"].T + params["attn_b2"]        # (B,S,1)
    attn = jax.nn.softmax(scores, axis=1)
    context = jnp.sum(attn * lo, axis=1)

    def bn_eval(v, bnp):
        gamma, beta, mean, var = bnp[0], bnp[1], bnp[2], bnp[3]
        return (v - mean) * jax.lax.rsqrt(var + BN_EPS) * gamma + beta

    lf = jnp.maximum(bn_eval(context @ params["proj1_w"].T + params["proj1_b"],
                             params["bn1"]), 0.0)
    sf = jnp.maximum(bn_eval(x_last @ params["proj2_w"].T + params["proj2_b"],
                             params["bn2"]), 0.0)
    combined = jnp.concatenate([lf, sf], axis=1)
    out = jnp.maximum(bn_eval(combined @ params["fc1_w"].T + params["fc1_b"],
                              params["bn3"]), 0.0)
    return out @ params["fc2_w"].T + params["fc2_b"]


# -----------------------------------------------------------------------------
# Main
# -----------------------------------------------------------------------------
if __name__ == "__main__":
    key = jax.random.PRNGKey(0)
    k_params, k_x = jax.random.split(key)
    raw_params = init_params(k_params)
    prep = prepare_params(raw_params)        # one-time weight prep (not in hot path)
    x = jax.random.normal(k_x, (BATCH, SEQ, INPUT_DIM), jnp.float32)

    fwd = jax.jit(improved_lstm_forward)
    out = jax.block_until_ready(fwd(prep, x))

    ref = jax.block_until_ready(forward_ref(raw_params, x))
    assert out.shape == (BATCH, OUTPUT_DIM), out.shape
    np.testing.assert_allclose(np.asarray(out), np.asarray(ref),
                               rtol=5e-3, atol=5e-3)
    print("KERNEL_OK")
</pallas_src>

<mosaic_0001>
module attributes {stable_mosaic.version = 11 : i64} {
  func.func @_fused_forward_kernel(%arg0: memref<16x8xf32, #tpu.memory_space<vmem>>, %arg1: memref<266x256xf32, #tpu.memory_space<vmem>>, %arg2: memref<296x128xf32, #tpu.memory_space<vmem>>, %arg3: memref<2x1xf32, #tpu.memory_space<vmem>>, %arg4: memref<16x256xf32, #tpu.memory_space<vmem>>, %arg5: memref<16x128xf32, #tpu.memory_space<vmem>>, %arg6: memref<16x64xf32, #tpu.memory_space<vmem>>) attributes {dimension_semantics = [], scalar_prefetch = 0 : i64, scratch_operands = 3 : i64, tpu.core_type = #tpu.core_type<tc>} {
    %0 = tpu.iota {dimensions = array<i32: 1>} : vector<1x256xi32>
    %c128_i32 = arith.constant 128 : i32
    %1 = vector.broadcast %c128_i32 : i32 to vector<1x256xi32>
    %2 = arith.cmpi sge, %0, %1 : vector<1x256xi32>
    %c192_i32 = arith.constant 192 : i32
    %3 = vector.broadcast %c192_i32 : i32 to vector<1x256xi32>
    %4 = arith.cmpi slt, %0, %3 : vector<1x256xi32>
    %5 = arith.andi %2, %4 : vector<1x256xi1>
    %c2 = arith.constant 2 : index
    %c0 = arith.constant 0 : index
    %6 = vector.load %arg1[%c2, %c0] : memref<266x256xf32, #tpu.memory_space<vmem>>, vector<8x256xf32>
    %c10 = arith.constant 10 : index
    %c0_0 = arith.constant 0 : index
    %7 = vector.load %arg1[%c10, %c0_0] : memref<266x256xf32, #tpu.memory_space<vmem>>, vector<64x256xf32>
    %c74 = arith.constant 74 : index
    %c0_1 = arith.constant 0 : index
    %8 = vector.load %arg1[%c74, %c0_1] : memref<266x256xf32, #tpu.memory_space<vmem>>, vector<128x256xf32>
    %c202 = arith.constant 202 : index
    %c0_2 = arith.constant 0 : index
    %9 = vector.load %arg1[%c202, %c0_2] : memref<266x256xf32, #tpu.memory_space<vmem>>, vector<64x256xf32>
    %c0_3 = arith.constant 0 : index
    %c0_4 = arith.constant 0 : index
    %10 = vector.load %arg1[%c0_3, %c0_4] : memref<266x256xf32, #tpu.memory_space<vmem>>, vector<1x256xf32>
    %c1 = arith.constant 1 : index
    %c0_5 = arith.constant 0 : index
    %11 = vector.load %arg1[%c1, %c0_5] : memref<266x256xf32, #tpu.memory_space<vmem>>, vector<1x256xf32>
    %c0_6 = arith.constant 0 : index
    %c0_7 = arith.constant 0 : index
    %12 = vector.load %arg0[%c0_6, %c0_7] : memref<16x8xf32, #tpu.memory_space<vmem>>, vector<16x8xf32>
    %cst = arith.constant dense<0.000000e+00> : vector<16x256xf32>
    %13 = tpu.matmul %12, %6, %cst {dimension_numbers = #tpu.dot_dimension_numbers<[1], [0], [0], [1], [0, 0, 1, 1], [], []>} : vector<16x8xf32>, vector<8x256xf32>, vector<16x256xf32> -> vector<16x256xf32>
    %14 = vector.broadcast %10 : vector<1x256xf32> to vector<16x256xf32>
    %15 = arith.addf %13, %14 : vector<16x256xf32>
    %c0_8 = arith.constant 0 : index
    %c0_9 = arith.constant 0 : index
    %16 = vector.load %arg4[%c0_8, %c0_9] : memref<16x256xf32, #tpu.memory_space<vmem>>, vector<16x256xf32>
    tpu.vector_store %arg4[%c0_8, %c0_9], %15 {strides = array<i32>} : memref<16x256xf32, #tpu.memory_space<vmem>>, vector<16x256xf32>,
    %cst_10 = arith.constant 0.000000e+00 : f32
    %17 = vector.broadcast %cst_10 : f32 to vector<2x64xf32>
    %cst_11 = arith.constant 0.000000e+00 : f32
    %18 = vector.broadcast %cst_11 : f32 to vector<2x64xf32>
    %c0_12 = arith.constant 0 : index
    %c0_13 = arith.constant 0 : index
    %19 = vector.load %arg4[%c0_12, %c0_13] : memref<16x256xf32, #tpu.memory_space<vmem>>, vector<2x256xf32>
    %cst_14 = arith.constant dense<0.000000e+00> : vector<2x256xf32>
    %20 = tpu.matmul %17, %7, %cst_14 {dimension_numbers = #tpu.dot_dimension_numbers<[1], [0], [0], [1], [0, 0, 1, 1], [], []>} : vector<2x64xf32>, vector<64x256xf32>, vector<2x256xf32> -> vector<2x256xf32>
    %21 = arith.addf %19, %20 : vector<2x256xf32>
    %22 = math.tanh %21 : vector<2x256xf32>
    %cst_15 = arith.constant 5.000000e-01 : f32
    %23 = vector.broadcast %cst_15 : f32 to vector<2x256xf32>
    %24 = arith.mulf %23, %22 : vector<2x256xf32>
    %cst_16 = arith.constant 5.000000e-01 : f32
    %25 = vector.broadcast %cst_16 : f32 to vector<2x256xf32>
    %26 = arith.addf %24, %25 : vector<2x256xf32>
    %27 = vector.shape_cast %5 : vector<1x256xi1> to vector<1x256xi1>
    %28 = vector.broadcast %27 : vector<1x256xi1> to vector<2x256xi1>
    %29 = arith.select %28, %22, %26 : vector<2x256xi1>, vector<2x256xf32>
    %30 = vector.extract_strided_slice %29 {offsets = [0, 0], sizes = [2, 64], strides = [1, 1]} : vector<2x256xf32> to vector<2x64xf32>
    %31 = vector.extract_strided_slice %29 {offsets = [0, 64], sizes = [2, 64], strides = [1, 1]} : vector<2x256xf32> to vector<2x64xf32>
    %32 = vector.extract_strided_slice %29 {offsets = [0, 128], sizes = [2, 64], strides = [1, 1]} : vector<2x256xf32> to vector<2x64xf32>
    %33 = vector.extract_strided_slice %29 {offsets = [0, 192], sizes = [2, 64], strides = [1, 1]} : vector<2x256xf32> to vector<2x64xf32>
    %34 = arith.mulf %31, %18 : vector<2x64xf32>
    %35 = arith.mulf %30, %32 : vector<2x64xf32>
    %36 = arith.addf %34, %35 : vector<2x64xf32>
    %37 = math.tanh %36 : vector<2x64xf32>
    %38 = arith.mulf %33, %37 : vector<2x64xf32>
    %39 = vector.extract_strided_slice %38 {offsets = [0, 0], sizes = [2, 32], strides = [1, 1]} : vector<2x64xf32> to vector<2x32xf32>
    %c0_17 = arith.constant 0 : index
    %c0_18 = arith.constant 0 : index
    %40 = vector.load %arg5[%c0_17, %c0_18] : memref<16x128xf32, #tpu.memory_space<vmem>>, vector<2x32xf32>
    tpu.vector_store %arg5[%c0_17, %c0_18], %39 {strides = array<i32>} : memref<16x128xf32, #tpu.memory_space<vmem>>, vector<2x32xf32>,
    %41 = vector.extract_strided_slice %38 {offsets = [0, 32], sizes = [2, 32], strides = [1, 1]} : vector<2x64xf32> to vector<2x32xf32>
    %c14 = arith.constant 14 : index
    %c32 = arith.constant 32 : index
    %42 = vector.load %arg5[%c14, %c32] : memref<16x128xf32, #tpu.memory_space<vmem>>, vector<2x32xf32>
    tpu.vector_store %arg5[%c14, %c32], %41 {strides = array<i32>} : memref<16x128xf32, #tpu.memory_space<vmem>>, vector<2x32xf32>,
    %43 = vector.extract_strided_slice %38 {offsets = [0, 0], sizes = [2, 32], strides = [1, 1]} : vector<2x64xf32> to vector<2x32xf32>
    %c14_19 = arith.constant 14 : index
    %c64 = arith.constant 64 : index
    %44 = vector.load %arg5[%c14_19, %c64] : memref<16x128xf32, #tpu.memory_space<vmem>>, vector<2x32xf32>
    tpu.vector_store %arg5[%c14_19, %c64], %43 {strides = array<i32>} : memref<16x128xf32, #tpu.memory_space<vmem>>, vector<2x32xf32>,
    %45 = vector.extract_strided_slice %38 {offsets = [0, 32], sizes = [2, 32], strides = [1, 1]} : vector<2x64xf32> to vector<2x32xf32>
    %c0_20 = arith.constant 0 : index
    %c96 = arith.constant 96 : index
    %46 = vector.load %arg5[%c0_20, %c96] : memref<16x128xf32, #tpu.memory_space<vmem>>, vector<2x32xf32>
    tpu.vector_store %arg5[%c0_20, %c96], %45 {strides = array<i32>} : memref<16x128xf32, #tpu.memory_space<vmem>>, vector<2x32xf32>,
    %c2_21 = arith.constant 2 : index
    %c0_22 = arith.constant 0 : index
    %47 = vector.load %arg4[%c2_21, %c0_22] : memref<16x256xf32, #tpu.memory_space<vmem>>, vector<2x256xf32>
    %cst_23 = arith.constant dense<0.000000e+00> : vector<2x256xf32>
    %48 = tpu.matmul %38, %7, %cst_23 {dimension_numbers = #tpu.dot_dimension_numbers<[1], [0], [0], [1], [0, 0, 1, 1], [], []>} : vector<2x64xf32>, vector<64x256xf32>, vector<2x256xf32> -> vector<2x256xf32>
    %49 = arith.addf %47, %48 : vector<2x256xf32>
    %50 = math.tanh %49 : vector<2x256xf32>
    %cst_24 = arith.constant 5.000000e-01 : f32
    %51 = vector.broadcast %cst_24 : f32 to vector<2x256xf32>
    %52 = arith.mulf %51, %50 : vector<2x256xf32>
    %cst_25 = arith.constant 5.000000e-01 : f32
    %53 = vector.broadcast %cst_25 : f32 to vector<2x256xf32>
    %54 = arith.addf %52, %53 : vector<2x256xf32>
    %55 = vector.shape_cast %5 : vector<1x256xi1> to vector<1x256xi1>
    %56 = vector.broadcast %55 : vector<1x256xi1> to vector<2x256xi1>
    %57 = arith.select %56, %50, %54 : vector<2x256xi1>, vector<2x256xf32>
    %58 = vector.extract_strided_slice %57 {offsets = [0, 0], sizes = [2, 64], strides = [1, 1]} : vector<2x256xf32> to vector<2x64xf32>
    %59 = vector.extract_strided_slice %57 {offsets = [0, 64], sizes = [2, 64], strides = [1, 1]} : vector<2x256xf32> to vector<2x64xf32>
    %60 = vector.extract_strided_slice %57 {offsets = [0, 128], sizes = [2, 64], strides = [1, 1]} : vector<2x256xf32> to vector<2x64xf32>
    %61 = vector.extract_strided_slice %57 {offsets = [0, 192], sizes = [2, 64], strides = [1, 1]} : vector<2x256xf32> to vector<2x64xf32>
    %62 = arith.mulf %59, %36 : vector<2x64xf32>
    %63 = arith.mulf %58, %60 : vector<2x64xf32>
    %64 = arith.addf %62, %63 : vector<2x64xf32>
    %65 = math.tanh %64 : vector<2x64xf32>
    %66 = arith.mulf %61, %65 : vector<2x64xf32>
    %67 = vector.extract_strided_slice %66 {offsets = [0, 0], sizes = [2, 32], strides = [1, 1]} : vector<2x64xf32> to vector<2x32xf32>
    %c2_26 = arith.constant 2 : index
    %c0_27 = arith.constant 0 : index
    %68 = vector.load %arg5[%c2_26, %c0_27] : memref<16x128xf32, #tpu.memory_space<vmem>>, vector<2x32xf32>
    tpu.vector_store %arg5[%c2_26, %c0_27], %67 {strides = array<i32>} : memref<16x128xf32, #tpu.memory_space<vmem>>, vector<2x32xf32>,
    %69 = vector.extract_strided_slice %66 {offsets = [0, 32], sizes = [2, 32], strides = [1, 1]} : vector<2x64xf32> to vector<2x32xf32>
    %c12 = arith.constant 12 : index
    %c32_28 = arith.constant 32 : index
    %70 = vector.load %arg5[%c12, %c32_28] : memref<16x128xf32, #tpu.memory_space<vmem>>, vector<2x32xf32>
    tpu.vector_store %arg5[%c12, %c32_28], %69 {strides = array<i32>} : memref<16x128xf32, #tpu.memory_space<vmem>>, vector<2x32xf32>,
    %71 = vector.extract_strided_slice %66 {offsets = [0, 0], sizes = [2, 32], strides = [1, 1]} : vector<2x64xf32> to vector<2x32xf32>
    %c12_29 = arith.constant 12 : index
    %c64_30 = arith.constant 64 : index
    %72 = vector.load %arg5[%c12_29, %c64_30] : memref<16x128xf32, #tpu.memory_space<vmem>>, vector<2x32xf32>
    tpu.vector_store %arg5[%c12_29, %c64_30], %71 {strides = array<i32>} : memref<16x128xf32, #tpu.memory_space<vmem>>, vector<2x32xf32>,
    %73 = vector.extract_strided_slice %66 {offsets = [0, 32], sizes = [2, 32], strides = [1, 1]} : vector<2x64xf32> to vector<2x32xf32>
    %c2_31 = arith.constant 2 : index
    %c96_32 = arith.constant 96 : index
    %74 = vector.load %arg5[%c2_31, %c96_32] : memref<16x128xf32, #tpu.memory_space<vmem>>, vector<2x32xf32>
    tpu.vector_store %arg5[%c2_31, %c96_32], %73 {strides = array<i32>} : memref<16x128xf32, #tpu.memory_space<vmem>>, vector<2x32xf32>,
    %c4 = arith.constant 4 : index
    %c0_33 = arith.constant 0 : index
    %75 = vector.load %arg4[%c4, %c0_33] : memref<16x256xf32, #tpu.memory_space<vmem>>, vector<2x256xf32>
    %cst_34 = arith.constant dense<0.000000e+00> : vector<2x256xf32>
    %76 = tpu.matmul %66, %7, %cst_34 {dimension_numbers = #tpu.dot_dimension_numbers<[1], [0], [0], [1], [0, 0, 1, 1], [], []>} : vector<2x64xf32>, vector<64x256xf32>, vector<2x256xf32> -> vector<2x256xf32>
    %77 = arith.addf %75, %76 : vector<2x256xf32>
    %78 = math.tanh %77 : vector<2x256xf32>
    %cst_35 = arith.constant 5.000000e-01 : f32
    %79 = vector.broadcast %cst_35 : f32 to vector<2x256xf32>
    %80 = arith.mulf %79, %78 : vector<2x256xf32>
    %cst_36 = arith.constant 5.000000e-01 : f32
    %81 = vector.broadcast %cst_36 : f32 to vector<2x256xf32>
    %82 = arith.addf %80, %81 : vector<2x256xf32>
    %83 = vector.shape_cast %5 : vector<1x256xi1> to vector<1x256xi1>
    %84 = vector.broadcast %83 : vector<1x256xi1> to vector<2x256xi1>
    %85 = arith.select %84, %78, %82 : vector<2x256xi1>, vector<2x256xf32>
    %86 = vector.extract_strided_slice %85 {offsets = [0, 0], sizes = [2, 64], strides = [1, 1]} : vector<2x256xf32> to vector<2x64xf32>
    %87 = vector.extract_strided_slice %85 {offsets = [0, 64], sizes = [2, 64], strides = [1, 1]} : vector<2x256xf32> to vector<2x64xf32>
    %88 = vector.extract_strided_slice %85 {offsets = [0, 128], sizes = [2, 64], strides = [1, 1]} : vector<2x256xf32> to vector<2x64xf32>
    %89 = vector.extract_strided_slice %85 {offsets = [0, 192], sizes = [2, 64], strides = [1, 1]} : vector<2x256xf32> to vector<2x64xf32>
    %90 = arith.mulf %87, %64 : vector<2x64xf32>
    %91 = arith.mulf %86, %88 : vector<2x64xf32>
    %92 = arith.addf %90, %91 : vector<2x64xf32>
    %93 = math.tanh %92 : vector<2x64xf32>
    %94 = arith.mulf %89, %93 : vector<2x64xf32>
    %95 = vector.extract_strided_slice %94 {offsets = [0, 0], sizes = [2, 32], strides = [1, 1]} : vector<2x64xf32> to vector<2x32xf32>
    %c4_37 = arith.constant 4 : index
    %c0_38 = arith.constant 0 : index
    %96 = vector.load %arg5[%c4_37, %c0_38] : memref<16x128xf32, #tpu.memory_space<vmem>>, vector<2x32xf32>
    tpu.vector_store %arg5[%c4_37, %c0_38], %95 {strides = array<i32>} : memref<16x128xf32, #tpu.memory_space<vmem>>, vector<2x32xf32>,
    %97 = vector.extract_strided_slice %94 {offsets = [0, 32], sizes = [2, 32], strides = [1, 1]} : vector<2x64xf32> to vector<2x32xf32>
    %c10_39 = arith.constant 10 : index
    %c32_40 = arith.constant 32 : index
    %98 = vector.load %arg5[%c10_39, %c32_40] : memref<16x128xf32, #tpu.memory_space<vmem>>, vector<2x32xf32>
    tpu.vector_store %arg5[%c10_39, %c32_40], %97 {strides = array<i32>} : memref<16x128xf32, #tpu.memory_space<vmem>>, vector<2x32xf32>,
    %99 = vector.extract_strided_slice %94 {offsets = [0, 0], sizes = [2, 32], strides = [1, 1]} : vector<2x64xf32> to vector<2x32xf32>
    %c10_41 = arith.constant 10 : index
    %c64_42 = arith.constant 64 : index
    %100 = vector.load %arg5[%c10_41, %c64_42] : memref<16x128xf32, #tpu.memory_space<vmem>>, vector<2x32xf32>
    tpu.vector_store %arg5[%c10_41, %c64_42], %99 {strides = array<i32>} : memref<16x128xf32, #tpu.memory_space<vmem>>, vector<2x32xf32>,
    %101 = vector.extract_strided_slice %94 {offsets = [0, 32], sizes = [2, 32], strides = [1, 1]} : vector<2x64xf32> to vector<2x32xf32>
    %c4_43 = arith.constant 4 : index
    %c96_44 = arith.constant 96 : index
    %102 = vector.load %arg5[%c4_43, %c96_44] : memref<16x128xf32, #tpu.memory_space<vmem>>, vector<2x32xf32>
    tpu.vector_store %arg5[%c4_43, %c96_44], %101 {strides = array<i32>} : memref<16x128xf32, #tpu.memory_space<vmem>>, vector<2x32xf32>,
    %c6 = arith.constant 6 : index
    %c0_45 = arith.constant 0 : index
    %103 = vector.load %arg4[%c6, %c0_45] : memref<16x256xf32, #tpu.memory_space<vmem>>, vector<2x256xf32>
    %cst_46 = arith.constant dense<0.000000e+00> : vector<2x256xf32>
    %104 = tpu.matmul %94, %7, %cst_46 {dimension_numbers = #tpu.dot_dimension_numbers<[1], [0], [0], [1], [0, 0, 1, 1], [], []>} : vector<2x64xf32>, vector<64x256xf32>, vector<2x256xf32> -> vector<2x256xf32>
    %105 = arith.addf %103, %104 : vector<2x256xf32>
    %106 = math.tanh %105 : vector<2x256xf32>
    %cst_47 = arith.constant 5.000000e-01 : f32
    %107 = vector.broadcast %cst_47 : f32 to vector<2x256xf32>
    %108 = arith.mulf %107, %106 : vector<2x256xf32>
    %cst_48 = arith.constant 5.000000e-01 : f32
    %109 = vector.broadcast %cst_48 : f32 to vector<2x256xf32>
    %110 = arith.addf %108, %109 : vector<2x256xf32>
    %111 = vector.shape_cast %5 : vector<1x256xi1> to vector<1x256xi1>
    %112 = vector.broadcast %111 : vector<1x256xi1> to vector<2x256xi1>
    %113 = arith.select %112, %106, %110 : vector<2x256xi1>, vector<2x256xf32>
    %114 = vector.extract_strided_slice %113 {offsets = [0, 0], sizes = [2, 64], strides = [1, 1]} : vector<2x256xf32> to vector<2x64xf32>
    %115 = vector.extract_strided_slice %113 {offsets = [0, 64], sizes = [2, 64], strides = [1, 1]} : vector<2x256xf32> to vector<2x64xf32>
    %116 = vector.extract_strided_slice %113 {offsets = [0, 128], sizes = [2, 64], strides = [1, 1]} : vector<2x256xf32> to vector<2x64xf32>
    %117 = vector.extract_strided_slice %113 {offsets = [0, 192], sizes = [2, 64], strides = [1, 1]} : vector<2x256xf32> to vector<2x64xf32>
    %118 = arith.mulf %115, %92 : vector<2x64xf32>
    %119 = arith.mulf %114, %116 : vector<2x64xf32>
    %120 = arith.addf %118, %119 : vector<2x64xf32>
    %121 = math.tanh %120 : vector<2x64xf32>
    %122 = arith.mulf %117, %121 : vector<2x64xf32>
    %123 = vector.extract_strided_slice %122 {offsets = [0, 0], sizes = [2, 32], strides = [1, 1]} : vector<2x64xf32> to vector<2x32xf32>
    %c6_49 = arith.constant 6 : index
    %c0_50 = arith.constant 0 : index
    %124 = vector.load %arg5[%c6_49, %c0_50] : memref<16x128xf32, #tpu.memory_space<vmem>>, vector<2x32xf32>
    tpu.vector_store %arg5[%c6_49, %c0_50], %123 {strides = array<i32>} : memref<16x128xf32, #tpu.memory_space<vmem>>, vector<2x32xf32>,
    %125 = vector.extract_strided_slice %122 {offsets = [0, 32], sizes = [2, 32], strides = [1, 1]} : vector<2x64xf32> to vector<2x32xf32>
    %c8 = arith.constant 8 : index
    %c32_51 = arith.constant 32 : index
    %126 = vector.load %arg5[%c8, %c32_51] : memref<16x128xf32, #tpu.memory_space<vmem>>, vector<2x32xf32>
    tpu.vector_store %arg5[%c8, %c32_51], %125 {strides = array<i32>} : memref<16x128xf32, #tpu.memory_space<vmem>>, vector<2x32xf32>,
    %127 = vector.extract_strided_slice %122 {offsets = [0, 0], sizes = [2, 32], strides = [1, 1]} : vector<2x64xf32> to vector<2x32xf32>
    %c8_52 = arith.constant 8 : index
    %c64_53 = arith.constant 64 : index
    %128 = vector.load %arg5[%c8_52, %c64_53] : memref<16x128xf32, #tpu.memory_space<vmem>>, vector<2x32xf32>
    tpu.vector_store %arg5[%c8_52, %c64_53], %127 {strides = array<i32>} : memref<16x128xf32, #tpu.memory_space<vmem>>, vector<2x32xf32>,
    %129 = vector.extract_strided_slice %122 {offsets = [0, 32], sizes = [2, 32], strides = [1, 1]} : vector<2x64xf32> to vector<2x32xf32>
    %c6_54 = arith.constant 6 : index
    %c96_55 = arith.constant 96 : index
    %130 = vector.load %arg5[%c6_54, %c96_55] : memref<16x128xf32, #tpu.memory_space<vmem>>, vector<2x32xf32>
    tpu.vector_store %arg5[%c6_54, %c96_55], %129 {strides = array<i32>} : memref<16x128xf32, #tpu.memory_space<vmem>>, vector<2x32xf32>,
    %c8_56 = arith.constant 8 : index
    %c0_57 = arith.constant 0 : index
    %131 = vector.load %arg4[%c8_56, %c0_57] : memref<16x256xf32, #tpu.memory_space<vmem>>, vector<2x256xf32>
    %cst_58 = arith.constant dense<0.000000e+00> : vector<2x256xf32>
    %132 = tpu.matmul %122, %7, %cst_58 {dimension_numbers = #tpu.dot_dimension_numbers<[1], [0], [0], [1], [0, 0, 1, 1], [], []>} : vector<2x64xf32>, vector<64x256xf32>, vector<2x256xf32> -> vector<2x256xf32>
    %133 = arith.addf %131, %132 : vector<2x256xf32>
    %134 = math.tanh %133 : vector<2x256xf32>
    %cst_59 = arith.constant 5.000000e-01 : f32
    %135 = vector.broadcast %cst_59 : f32 to vector<2x256xf32>
    %136 = arith.mulf %135, %134 : vector<2x256xf32>
    %cst_60 = arith.constant 5.000000e-01 : f32
    %137 = vector.broadcast %cst_60 : f32 to vector<2x256xf32>
    %138 = arith.addf %136, %137 : vector<2x256xf32>
    %139 = vector.shape_cast %5 : vector<1x256xi1> to vector<1x256xi1>
    %140 = vector.broadcast %139 : vector<1x256xi1> to vector<2x256xi1>
    %141 = arith.select %140, %134, %138 : vector<2x256xi1>, vector<2x256xf32>
    %142 = vector.extract_strided_slice %141 {offsets = [0, 0], sizes = [2, 64], strides = [1, 1]} : vector<2x256xf32> to vector<2x64xf32>
    %143 = vector.extract_strided_slice %141 {offsets = [0, 64], sizes = [2, 64], strides = [1, 1]} : vector<2x256xf32> to vector<2x64xf32>
    %144 = vector.extract_strided_slice %141 {offsets = [0, 128], sizes = [2, 64], strides = [1, 1]} : vector<2x256xf32> to vector<2x64xf32>
    %145 = vector.extract_strided_slice %141 {offsets = [0, 192], sizes = [2, 64], strides = [1, 1]} : vector<2x256xf32> to vector<2x64xf32>
    %146 = arith.mulf %143, %120 : vector<2x64xf32>
    %147 = arith.mulf %142, %144 : vector<2x64xf32>
    %148 = arith.addf %146, %147 : vector<2x64xf32>
    %149 = math.tanh %148 : vector<2x64xf32>
    %150 = arith.mulf %145, %149 : vector<2x64xf32>
    %151 = vector.extract_strided_slice %150 {offsets = [0, 0], sizes = [2, 32], strides = [1, 1]} : vector<2x64xf32> to vector<2x32xf32>
    %c8_61 = arith.constant 8 : index
    %c0_62 = arith.constant 0 : index
    %152 = vector.load %arg5[%c8_61, %c0_62] : memref<16x128xf32, #tpu.memory_space<vmem>>, vector<2x32xf32>
    tpu.vector_store %arg5[%c8_61, %c0_62], %151 {strides = array<i32>} : memref<16x128xf32, #tpu.memory_space<vmem>>, vector<2x32xf32>,
    %153 = vector.extract_strided_slice %150 {offsets = [0, 32], sizes = [2, 32], strides = [1, 1]} : vector<2x64xf32> to vector<2x32xf32>
    %c6_63 = arith.constant 6 : index
    %c32_64 = arith.constant 32 : index
    %154 = vector.load %arg5[%c6_63, %c32_64] : memref<16x128xf32, #tpu.memory_space<vmem>>, vector<2x32xf32>
    tpu.vector_store %arg5[%c6_63, %c32_64], %153 {strides = array<i32>} : memref<16x128xf32, #tpu.memory_space<vmem>>, vector<2x32xf32>,
    %155 = vector.extract_strided_slice %150 {offsets = [0, 0], sizes = [2, 32], strides = [1, 1]} : vector<2x64xf32> to vector<2x32xf32>
    %c6_65 = arith.constant 6 : index
    %c64_66 = arith.constant 64 : index
    %156 = vector.load %arg5[%c6_65, %c64_66] : memref<16x128xf32, #tpu.memory_space<vmem>>, vector<2x32xf32>
    tpu.vector_store %arg5[%c6_65, %c64_66], %155 {strides = array<i32>} : memref<16x128xf32, #tpu.memory_space<vmem>>, vector<2x32xf32>,
    %157 = vector.extract_strided_slice %150 {offsets = [0, 32], sizes = [2, 32], strides = [1, 1]} : vector<2x64xf32> to vector<2x32xf32>
    %c8_67 = arith.constant 8 : index
    %c96_68 = arith.constant 96 : index
    %158 = vector.load %arg5[%c8_67, %c96_68] : memref<16x128xf32, #tpu.memory_space<vmem>>, vector<2x32xf32>
    tpu.vector_store %arg5[%c8_67, %c96_68], %157 {strides = array<i32>} : memref<16x128xf32, #tpu.memory_space<vmem>>, vector<2x32xf32>,
    %c10_69 = arith.constant 10 : index
    %c0_70 = arith.constant 0 : index
    %159 = vector.load %arg4[%c10_69, %c0_70] : memref<16x256xf32, #tpu.memory_space<vmem>>, vector<2x256xf32>
    %cst_71 = arith.constant dense<0.000000e+00> : vector<2x256xf32>
    %160 = tpu.matmul %150, %7, %cst_71 {dimension_numbers = #tpu.dot_dimension_numbers<[1], [0], [0], [1], [0, 0, 1, 1], [], []>} : vector<2x64xf32>, vector<64x256xf32>, vector<2x256xf32> -> vector<2x256xf32>
    %161 = arith.addf %159, %160 : vector<2x256xf32>
    %162 = math.tanh %161 : vector<2x256xf32>
    %cst_72 = arith.constant 5.000000e-01 : f32
    %163 = vector.broadcast %cst_72 : f32 to vector<2x256xf32>
    %164 = arith.mulf %163, %162 : vector<2x256xf32>
    %cst_73 = arith.constant 5.000000e-01 : f32
    %165 = vector.broadcast %cst_73 : f32 to vector<2x256xf32>
    %166 = arith.addf %164, %165 : vector<2x256xf32>
    %167 = vector.shape_cast %5 : vector<1x256xi1> to vector<1x256xi1>
    %168 = vector.broadcast %167 : vector<1x256xi1> to vector<2x256xi1>
    %169 = arith.select %168, %162, %166 : vector<2x256xi1>, vector<2x256xf32>
    %170 = vector.extract_strided_slice %169 {offsets = [0, 0], sizes = [2, 64], strides = [1, 1]} : vector<2x256xf32> to vector<2x64xf32>
    %171 = vector.extract_strided_slice %169 {offsets = [0, 64], sizes = [2, 64], strides = [1, 1]} : vector<2x256xf32> to vector<2x64xf32>
    %172 = vector.extract_strided_slice %169 {offsets = [0, 128], sizes = [2, 64], strides = [1, 1]} : vector<2x256xf32> to vector<2x64xf32>
    %173 = vector.extract_strided_slice %169 {offsets = [0, 192], sizes = [2, 64], strides = [1, 1]} : vector<2x256xf32> to vector<2x64xf32>
    %174 = arith.mulf %171, %148 : vector<2x64xf32>
    %175 = arith.mulf %170, %172 : vector<2x64xf32>
    %176 = arith.addf %174, %175 : vector<2x64xf32>
    %177 = math.tanh %176 : vector<2x64xf32>
    %178 = arith.mulf %173, %177 : vector<2x64xf32>
    %179 = vector.extract_strided_slice %178 {offsets = [0, 0], sizes = [2, 32], strides = [1, 1]} : vector<2x64xf32> to vector<2x32xf32>
    %c10_74 = arith.constant 10 : index
    %c0_75 = arith.constant 0 : index
    %180 = vector.load %arg5[%c10_74, %c0_75] : memref<16x128xf32, #tpu.memory_space<vmem>>, vector<2x32xf32>
    tpu.vector_store %arg5[%c10_74, %c0_75], %179 {strides = array<i32>} : memref<16x128xf32, #tpu.memory_space<vmem>>, vector<2x32xf32>,
    %181 = vector.extract_strided_slice %178 {offsets = [0, 32], sizes = [2, 32], strides = [1, 1]} : vector<2x64xf32> to vector<2x32xf32>
    %c4_76 = arith.constant 4 : index
    %c32_77 = arith.constant 32 : index
    %182 = vector.load %arg5[%c4_76, %c32_77] : memref<16x128xf32, #tpu.memory_space<vmem>>, vector<2x32xf32>
    tpu.vector_store %arg5[%c4_76, %c32_77], %181 {strides = array<i32>} : memref<16x128xf32, #tpu.memory_space<vmem>>, vector<2x32xf32>,
    %183 = vector.extract_strided_slice %178 {offsets = [0, 0], sizes = [2, 32], strides = [1, 1]} : vector<2x64xf32> to vector<2x32xf32>
    %c4_78 = arith.constant 4 : index
    %c64_79 = arith.constant 64 : index
    %184 = vector.load %arg5[%c4_78, %c64_79] : memref<16x128xf32, #tpu.memory_space<vmem>>, vector<2x32xf32>
    tpu.vector_store %arg5[%c4_78, %c64_79], %183 {strides = array<i32>} : memref<16x128xf32, #tpu.memory_space<vmem>>, vector<2x32xf32>,
    %185 = vector.extract_strided_slice %178 {offsets = [0, 32], sizes = [2, 32], strides = [1, 1]} : vector<2x64xf32> to vector<2x32xf32>
    %c10_80 = arith.constant 10 : index
    %c96_81 = arith.constant 96 : index
    %186 = vector.load %arg5[%c10_80, %c96_81] : memref<16x128xf32, #tpu.memory_space<vmem>>, vector<2x32xf32>
    tpu.vector_store %arg5[%c10_80, %c96_81], %185 {strides = array<i32>} : memref<16x128xf32, #tpu.memory_space<vmem>>, vector<2x32xf32>,
    %c12_82 = arith.constant 12 : index
    %c0_83 = arith.constant 0 : index
    %187 = vector.load %arg4[%c12_82, %c0_83] : memref<16x256xf32, #tpu.memory_space<vmem>>, vector<2x256xf32>
    %cst_84 = arith.constant dense<0.000000e+00> : vector<2x256xf32>
    %188 = tpu.matmul %178, %7, %cst_84 {dimension_numbers = #tpu.dot_dimension_numbers<[1], [0], [0], [1], [0, 0, 1, 1], [], []>} : vector<2x64xf32>, vector<64x256xf32>, vector<2x256xf32> -> vector<2x256xf32>
    %189 = arith.addf %187, %188 : vector<2x256xf32>
    %190 = math.tanh %189 : vector<2x256xf32>
    %cst_85 = arith.constant 5.000000e-01 : f32
    %191 = vector.broadcast %cst_85 : f32 to vector<2x256xf32>
    %192 = arith.mulf %191, %190 : vector<2x256xf32>
    %cst_86 = arith.constant 5.000000e-01 : f32
    %193 = vector.broadcast %cst_86 : f32 to vector<2x256xf32>
    %194 = arith.addf %192, %193 : vector<2x256xf32>
    %195 = vector.shape_cast %5 : vector<1x256xi1> to vector<1x256xi1>
    %196 = vector.broadcast %195 : vector<1x256xi1> to vector<2x256xi1>
    %197 = arith.select %196, %190, %194 : vector<2x256xi1>, vector<2x256xf32>
    %198 = vector.extract_strided_slice %197 {offsets = [0, 0], sizes = [2, 64], strides = [1, 1]} : vector<2x256xf32> to vector<2x64xf32>
    %199 = vector.extract_strided_slice %197 {offsets = [0, 64], sizes = [2, 64], strides = [1, 1]} : vector<2x256xf32> to vector<2x64xf32>
    %200 = vector.extract_strided_slice %197 {offsets = [0, 128], sizes = [2, 64], strides = [1, 1]} : vector<2x256xf32> to vector<2x64xf32>
    %201 = vector.extract_strided_slice %197 {offsets = [0, 192], sizes = [2, 64], strides = [1, 1]} : vector<2x256xf32> to vector<2x64xf32>
    %202 = arith.mulf %199, %176 : vector<2x64xf32>
    %203 = arith.mulf %198, %200 : vector<2x64xf32>
    %204 = arith.addf %202, %203 : vector<2x64xf32>
    %205 = math.tanh %204 : vector<2x64xf32>
    %206 = arith.mulf %201, %205 : vector<2x64xf32>
    %207 = vector.extract_strided_slice %206 {offsets = [0, 0], sizes = [2, 32], strides = [1, 1]} : vector<2x64xf32> to vector<2x32xf32>
    %c12_87 = arith.constant 12 : index
    %c0_88 = arith.constant 0 : index
    %208 = vector.load %arg5[%c12_87, %c0_88] : memref<16x128xf32, #tpu.memory_space<vmem>>, vector<2x32xf32>
    tpu.vector_store %arg5[%c12_87, %c0_88], %207 {strides = array<i32>} : memref<16x128xf32, #tpu.memory_space<vmem>>, vector<2x32xf32>,
    %209 = vector.extract_strided_slice %206 {offsets = [0, 32], sizes = [2, 32], strides = [1, 1]} : vector<2x64xf32> to vector<2x32xf32>
    %c2_89 = arith.constant 2 : index
    %c32_90 = arith.constant 32 : index
    %210 = vector.load %arg5[%c2_89, %c32_90] : memref<16x128xf32, #tpu.memory_space<vmem>>, vector<2x32xf32>
    tpu.vector_store %arg5[%c2_89, %c32_90], %209 {strides = array<i32>} : memref<16x128xf32, #tpu.memory_space<vmem>>, vector<2x32xf32>,
    %211 = vector.extract_strided_slice %206 {offsets = [0, 0], sizes = [2, 32], strides = [1, 1]} : vector<2x64xf32> to vector<2x32xf32>
    %c2_91 = arith.constant 2 : index
    %c64_92 = arith.constant 64 : index
    %212 = vector.load %arg5[%c2_91, %c64_92] : memref<16x128xf32, #tpu.memory_space<vmem>>, vector<2x32xf32>
    tpu.vector_store %arg5[%c2_91, %c64_92], %211 {strides = array<i32>} : memref<16x128xf32, #tpu.memory_space<vmem>>, vector<2x32xf32>,
    %213 = vector.extract_strided_slice %206 {offsets = [0, 32], sizes = [2, 32], strides = [1, 1]} : vector<2x64xf32> to vector<2x32xf32>
    %c12_93 = arith.constant 12 : index
    %c96_94 = arith.constant 96 : index
    %214 = vector.load %arg5[%c12_93, %c96_94] : memref<16x128xf32, #tpu.memory_space<vmem>>, vector<2x32xf32>
    tpu.vector_store %arg5[%c12_93, %c96_94], %213 {strides = array<i32>} : memref<16x128xf32, #tpu.memory_space<vmem>>, vector<2x32xf32>,
    %c14_95 = arith.constant 14 : index
    %c0_96 = arith.constant 0 : index
    %215 = vector.load %arg4[%c14_95, %c0_96] : memref<16x256xf32, #tpu.memory_space<vmem>>, vector<2x256xf32>
    %cst_97 = arith.constant dense<0.000000e+00> : vector<2x256xf32>
    %216 = tpu.matmul %206, %7, %cst_97 {dimension_numbers = #tpu.dot_dimension_numbers<[1], [0], [0], [1], [0, 0, 1, 1], [], []>} : vector<2x64xf32>, vector<64x256xf32>, vector<2x256xf32> -> vector<2x256xf32>
    %217 = arith.addf %215, %216 : vector<2x256xf32>
    %218 = math.tanh %217 : vector<2x256xf32>
    %cst_98 = arith.constant 5.000000e-01 : f32
    %219 = vector.broadcast %cst_98 : f32 to vector<2x256xf32>
    %220 = arith.mulf %219, %218 : vector<2x256xf32>
    %cst_99 = arith.constant 5.000000e-01 : f32
    %221 = vector.broadcast %cst_99 : f32 to vector<2x256xf32>
    %222 = arith.addf %220, %221 : vector<2x256xf32>
    %223 = vector.shape_cast %5 : vector<1x256xi1> to vector<1x256xi1>
    %224 = vector.broadcast %223 : vector<1x256xi1> to vector<2x256xi1>
    %225 = arith.select %224, %218, %222 : vector<2x256xi1>, vector<2x256xf32>
    %226 = vector.extract_strided_slice %225 {offsets = [0, 0], sizes = [2, 64], strides = [1, 1]} : vector<2x256xf32> to vector<2x64xf32>
    %227 = vector.extract_strided_slice %225 {offsets = [0, 64], sizes = [2, 64], strides = [1, 1]} : vector<2x256xf32> to vector<2x64xf32>
    %228 = vector.extract_strided_slice %225 {offsets = [0, 128], sizes = [2, 64], strides = [1, 1]} : vector<2x256xf32> to vector<2x64xf32>
    %229 = vector.extract_strided_slice %225 {offsets = [0, 192], sizes = [2, 64], strides = [1, 1]} : vector<2x256xf32> to vector<2x64xf32>
    %230 = arith.mulf %227, %204 : vector<2x64xf32>
    %231 = arith.mulf %226, %228 : vector<2x64xf32>
    %232 = arith.addf %230, %231 : vector<2x64xf32>
    %233 = math.tanh %232 : vector<2x64xf32>
    %234 = arith.mulf %229, %233 : vector<2x64xf32>
    %235 = vector.extract_strided_slice %234 {offsets = [0, 0], sizes = [2, 32], strides = [1, 1]} : vector<2x64xf32> to vector<2x32xf32>
    %c14_100 = arith.constant 14 : index
    %c0_101 = arith.constant 0 : index
    %236 = vector.load %arg5[%c14_100, %c0_101] : memref<16x128xf32, #tpu.memory_space<vmem>>, vector<2x32xf32>
    tpu.vector_store %arg5[%c14_100, %c0_101], %235 {strides = array<i32>} : memref<16x128xf32, #tpu.memory_space<vmem>>, vector<2x32xf32>,
    %237 = vector.extract_strided_slice %234 {offsets = [0, 32], sizes = [2, 32], strides = [1, 1]} : vector<2x64xf32> to vector<2x32xf32>
    %c0_102 = arith.constant 0 : index
    %c32_103 = arith.constant 32 : index
    %238 = vector.load %arg5[%c0_102, %c32_103] : memref<16x128xf32, #tpu.memory_space<vmem>>, vector<2x32xf32>
    tpu.vector_store %arg5[%c0_102, %c32_103], %237 {strides = array<i32>} : memref<16x128xf32, #tpu.memory_space<vmem>>, vector<2x32xf32>,
    %239 = vector.extract_strided_slice %234 {offsets = [0, 0], sizes = [2, 32], strides = [1, 1]} : vector<2x64xf32> to vector<2x32xf32>
    %c0_104 = arith.constant 0 : index
    %c64_105 = arith.constant 64 : index
    %240 = vector.load %arg5[%c0_104, %c64_105] : memref<16x128xf32, #tpu.memory_space<vmem>>, vector<2x32xf32>
    tpu.vector_store %arg5[%c0_104, %c64_105], %239 {strides = array<i32>} : memref<16x128xf32, #tpu.memory_space<vmem>>, vector<2x32xf32>,
    %241 = vector.extract_strided_slice %234 {offsets = [0, 32], sizes = [2, 32], strides = [1, 1]} : vector<2x64xf32> to vector<2x32xf32>
    %c14_106 = arith.constant 14 : index
    %c96_107 = arith.constant 96 : index
    %242 = vector.load %arg5[%c14_106, %c96_107] : memref<16x128xf32, #tpu.memory_space<vmem>>, vector<2x32xf32>
    tpu.vector_store %arg5[%c14_106, %c96_107], %241 {strides = array<i32>} : memref<16x128xf32, #tpu.memory_space<vmem>>, vector<2x32xf32>,
    %c0_108 = arith.constant 0 : index
    %c0_109 = arith.constant 0 : index
    %243 = vector.load %arg5[%c0_108, %c0_109] : memref<16x128xf32, #tpu.memory_space<vmem>>, vector<16x128xf32>
    %cst_110 = arith.constant dense<0.000000e+00> : vector<16x256xf32>
    %244 = tpu.matmul %243, %8, %cst_110 {dimension_numbers = #tpu.dot_dimension_numbers<[1], [0], [0], [1], [0, 0, 1, 1], [], []>} : vector<16x128xf32>, vector<128x256xf32>, vector<16x256xf32> -> vector<16x256xf32>
    %245 = vector.broadcast %11 : vector<1x256xf32> to vector<16x256xf32>
    %246 = arith.addf %244, %245 : vector<16x256xf32>
    %c0_111 = arith.constant 0 : index
    %c0_112 = arith.constant 0 : index
    %247 = vector.load %arg4[%c0_111, %c0_112] : memref<16x256xf32, #tpu.memory_space<vmem>>, vector<16x256xf32>
    tpu.vector_store %arg4[%c0_111, %c0_112], %246 {strides = array<i32>} : memref<16x256xf32, #tpu.memory_space<vmem>>, vector<16x256xf32>,
    %cst_113 = arith.constant 0.000000e+00 : f32
    %248 = vector.broadcast %cst_113 : f32 to vector<2x64xf32>
    %cst_114 = arith.constant 0.000000e+00 : f32
    %249 = vector.broadcast %cst_114 : f32 to vector<2x64xf32>
    %c0_115 = arith.constant 0 : index
    %c0_116 = arith.constant 0 : index
    %250 = vector.load %arg4[%c0_115, %c0_116] : memref<16x256xf32, #tpu.memory_space<vmem>>, vector<2x256xf32>
    %cst_117 = arith.constant dense<0.000000e+00> : vector<2x256xf32>
    %251 = tpu.matmul %248, %9, %cst_117 {dimension_numbers = #tpu.dot_dimension_numbers<[1], [0], [0], [1], [0, 0, 1, 1], [], []>} : vector<2x64xf32>, vector<64x256xf32>, vector<2x256xf32> -> vector<2x256xf32>
    %252 = arith.addf %250, %251 : vector<2x256xf32>
    %253 = math.tanh %252 : vector<2x256xf32>
    %cst_118 = arith.constant 5.000000e-01 : f32
    %254 = vector.broadcast %cst_118 : f32 to vector<2x256xf32>
    %255 = arith.mulf %254, %253 : vector<2x256xf32>
    %cst_119 = arith.constant 5.000000e-01 : f32
    %256 = vector.broadcast %cst_119 : f32 to vector<2x256xf32>
    %257 = arith.addf %255, %256 : vector<2x256xf32>
    %258 = vector.shape_cast %5 : vector<1x256xi1> to vector<1x256xi1>
    %259 = vector.broadcast %258 : vector<1x256xi1> to vector<2x256xi1>
    %260 = arith.select %259, %253, %257 : vector<2x256xi1>, vector<2x256xf32>
    %261 = vector.extract_strided_slice %260 {offsets = [0, 0], sizes = [2, 64], strides = [1, 1]} : vector<2x256xf32> to vector<2x64xf32>
    %262 = vector.extract_strided_slice %260 {offsets = [0, 64], sizes = [2, 64], strides = [1, 1]} : vector<2x256xf32> to vector<2x64xf32>
    %263 = vector.extract_strided_slice %260 {offsets = [0, 128], sizes = [2, 64], strides = [1, 1]} : vector<2x256xf32> to vector<2x64xf32>
    %264 = vector.extract_strided_slice %260 {offsets = [0, 192], sizes = [2, 64], strides = [1, 1]} : vector<2x256xf32> to vector<2x64xf32>
    %265 = arith.mulf %262, %249 : vector<2x64xf32>
    %266 = arith.mulf %261, %263 : vector<2x64xf32>
    %267 = arith.addf %265, %266 : vector<2x64xf32>
    %268 = math.tanh %267 : vector<2x64xf32>
    %269 = arith.mulf %264, %268 : vector<2x64xf32>
    %270 = vector.extract_strided_slice %269 {offsets = [0, 0], sizes = [2, 32], strides = [1, 1]} : vector<2x64xf32> to vector<2x32xf32>
    %c0_120 = arith.constant 0 : index
    %c0_121 = arith.constant 0 : index
    %271 = vector.load %arg6[%c0_120, %c0_121] : memref<16x64xf32, #tpu.memory_space<vmem>>, vector<2x32xf32>
    tpu.vector_store %arg6[%c0_120, %c0_121], %270 {strides = array<i32>} : memref<16x64xf32, #tpu.memory_space<vmem>>, vector<2x32xf32>,
    %272 = vector.extract_strided_slice %269 {offsets = [0, 32], sizes = [2, 32], strides = [1, 1]} : vector<2x64xf32> to vector<2x32xf32>
    %c14_122 = arith.constant 14 : index
    %c32_123 = arith.constant 32 : index
    %273 = vector.load %arg6[%c14_122, %c32_123] : memref<16x64xf32, #tpu.memory_space<vmem>>, vector<2x32xf32>
    tpu.vector_store %arg6[%c14_122, %c32_123], %272 {strides = array<i32>} : memref<16x64xf32, #tpu.memory_space<vmem>>, vector<2x32xf32>,
    %c2_124 = arith.constant 2 : index
    %c0_125 = arith.constant 0 : index
    %274 = vector.load %arg4[%c2_124, %c0_125] : memref<16x256xf32, #tpu.memory_space<vmem>>, vector<2x256xf32>
    %cst_126 = arith.constant dense<0.000000e+00> : vector<2x256xf32>
    %275 = tpu.matmul %269, %9, %cst_126 {dimension_numbers = #tpu.dot_dimension_numbers<[1], [0], [0], [1], [0, 0, 1, 1], [], []>} : vector<2x64xf32>, vector<64x256xf32>, vector<2x256xf32> -> vector<2x256xf32>
    %276 = arith.addf %274, %275 : vector<2x256xf32>
    %277 = math.tanh %276 : vector<2x256xf32>
    %cst_127 = arith.constant 5.000000e-01 : f32
    %278 = vector.broadcast %cst_127 : f32 to vector<2x256xf32>
    %279 = arith.mulf %278, %277 : vector<2x256xf32>
    %cst_128 = arith.constant 5.000000e-01 : f32
    %280 = vector.broadcast %cst_128 : f32 to vector<2x256xf32>
    %281 = arith.addf %279, %280 : vector<2x256xf32>
    %282 = vector.shape_cast %5 : vector<1x256xi1> to vector<1x256xi1>
    %283 = vector.broadcast %282 : vector<1x256xi1> to vector<2x256xi1>
    %284 = arith.select %283, %277, %281 : vector<2x256xi1>, vector<2x256xf32>
    %285 = vector.extract_strided_slice %284 {offsets = [0, 0], sizes = [2, 64], strides = [1, 1]} : vector<2x256xf32> to vector<2x64xf32>
    %286 = vector.extract_strided_slice %284 {offsets = [0, 64], sizes = [2, 64], strides = [1, 1]} : vector<2x256xf32> to vector<2x64xf32>
    %287 = vector.extract_strided_slice %284 {offsets = [0, 128], sizes = [2, 64], strides = [1, 1]} : vector<2x256xf32> to vector<2x64xf32>
    %288 = vector.extract_strided_slice %284 {offsets = [0, 192], sizes = [2, 64], strides = [1, 1]} : vector<2x256xf32> to vector<2x64xf32>
    %289 = arith.mulf %286, %267 : vector<2x64xf32>
    %290 = arith.mulf %285, %287 : vector<2x64xf32>
    %291 = arith.addf %289, %290 : vector<2x64xf32>
    %292 = math.tanh %291 : vector<2x64xf32>
    %293 = arith.mulf %288, %292 : vector<2x64xf32>
    %294 = vector.extract_strided_slice %293 {offsets = [0, 0], sizes = [2, 32], strides = [1, 1]} : vector<2x64xf32> to vector<2x32xf32>
    %c2_129 = arith.constant 2 : index
    %c0_130 = arith.constant 0 : index
    %295 = vector.load %arg6[%c2_129, %c0_130] : memref<16x64xf32, #tpu.memory_space<vmem>>, vector<2x32xf32>
    tpu.vector_store %arg6[%c2_129, %c0_130], %294 {strides = array<i32>} : memref<16x64xf32, #tpu.memory_space<vmem>>, vector<2x32xf32>,
    %296 = vector.extract_strided_slice %293 {offsets = [0, 32], sizes = [2, 32], strides = [1, 1]} : vector<2x64xf32> to vector<2x32xf32>
    %c12_131 = arith.constant 12 : index
    %c32_132 = arith.constant 32 : index
    %297 = vector.load %arg6[%c12_131, %c32_132] : memref<16x64xf32, #tpu.memory_space<vmem>>, vector<2x32xf32>
    tpu.vector_store %arg6[%c12_131, %c32_132], %296 {strides = array<i32>} : memref<16x64xf32, #tpu.memory_space<vmem>>, vector<2x32xf32>,
    %c4_133 = arith.constant 4 : index
    %c0_134 = arith.constant 0 : index
    %298 = vector.load %arg4[%c4_133, %c0_134] : memref<16x256xf32, #tpu.memory_space<vmem>>, vector<2x256xf32>
    %cst_135 = arith.constant dense<0.000000e+00> : vector<2x256xf32>
    %299 = tpu.matmul %293, %9, %cst_135 {dimension_numbers = #tpu.dot_dimension_numbers<[1], [0], [0], [1], [0, 0, 1, 1], [], []>} : vector<2x64xf32>, vector<64x256xf32>, vector<2x256xf32> -> vector<2x256xf32>
    %300 = arith.addf %298, %299 : vector<2x256xf32>
    %301 = math.tanh %300 : vector<2x256xf32>
    %cst_136 = arith.constant 5.000000e-01 : f32
    %302 = vector.broadcast %cst_136 : f32 to vector<2x256xf32>
    %303 = arith.mulf %302, %301 : vector<2x256xf32>
    %cst_137 = arith.constant 5.000000e-01 : f32
    %304 = vector.broadcast %cst_137 : f32 to vector<2x256xf32>
    %305 = arith.addf %303, %304 : vector<2x256xf32>
    %306 = vector.shape_cast %5 : vector<1x256xi1> to vector<1x256xi1>
    %307 = vector.broadcast %306 : vector<1x256xi1> to vector<2x256xi1>
    %308 = arith.select %307, %301, %305 : vector<2x256xi1>, vector<2x256xf32>
    %309 = vector.extract_strided_slice %308 {offsets = [0, 0], sizes = [2, 64], strides = [1, 1]} : vector<2x256xf32> to vector<2x64xf32>
    %310 = vector.extract_strided_slice %308 {offsets = [0, 64], sizes = [2, 64], strides = [1, 1]} : vector<2x256xf32> to vector<2x64xf32>
    %311 = vector.extract_strided_slice %308 {offsets = [0, 128], sizes = [2, 64], strides = [1, 1]} : vector<2x256xf32> to vector<2x64xf32>
    %312 = vector.extract_strided_slice %308 {offsets = [0, 192], sizes = [2, 64], strides = [1, 1]} : vector<2x256xf32> to vector<2x64xf32>
    %313 = arith.mulf %310, %291 : vector<2x64xf32>
    %314 = arith.mulf %309, %311 : vector<2x64xf32>
    %315 = arith.addf %313, %314 : vector<2x64xf32>
    %316 = math.tanh %315 : vector<2x64xf32>
    %317 = arith.mulf %312, %316 : vector<2x64xf32>
    %318 = vector.extract_strided_slice %317 {offsets = [0, 0], sizes = [2, 32], strides = [1, 1]} : vector<2x64xf32> to vector<2x32xf32>
    %c4_138 = arith.constant 4 : index
    %c0_139 = arith.constant 0 : index
    %319 = vector.load %arg6[%c4_138, %c0_139] : memref<16x64xf32, #tpu.memory_space<vmem>>, vector<2x32xf32>
    tpu.vector_store %arg6[%c4_138, %c0_139], %318 {strides = array<i32>} : memref<16x64xf32, #tpu.memory_space<vmem>>, vector<2x32xf32>,
    %320 = vector.extract_strided_slice %317 {offsets = [0, 32], sizes = [2, 32], strides = [1, 1]} : vector<2x64xf32> to vector<2x32xf32>
    %c10_140 = arith.constant 10 : index
    %c32_141 = arith.constant 32 : index
    %321 = vector.load %arg6[%c10_140, %c32_141] : memref<16x64xf32, #tpu.memory_space<vmem>>, vector<2x32xf32>
    tpu.vector_store %arg6[%c10_140, %c32_141], %320 {strides = array<i32>} : memref<16x64xf32, #tpu.memory_space<vmem>>, vector<2x32xf32>,
    %c6_142 = arith.constant 6 : index
    %c0_143 = arith.constant 0 : index
    %322 = vector.load %arg4[%c6_142, %c0_143] : memref<16x256xf32, #tpu.memory_space<vmem>>, vector<2x256xf32>
    %cst_144 = arith.constant dense<0.000000e+00> : vector<2x256xf32>
    %323 = tpu.matmul %317, %9, %cst_144 {dimension_numbers = #tpu.dot_dimension_numbers<[1], [0], [0], [1], [0, 0, 1, 1], [], []>} : vector<2x64xf32>, vector<64x256xf32>, vector<2x256xf32> -> vector<2x256xf32>
    %324 = arith.addf %322, %323 : vector<2x256xf32>
    %325 = math.tanh %324 : vector<2x256xf32>
    %cst_145 = arith.constant 5.000000e-01 : f32
    %326 = vector.broadcast %cst_145 : f32 to vector<2x256xf32>
    %327 = arith.mulf %326, %325 : vector<2x256xf32>
    %cst_146 = arith.constant 5.000000e-01 : f32
    %328 = vector.broadcast %cst_146 : f32 to vector<2x256xf32>
    %329 = arith.addf %327, %328 : vector<2x256xf32>
    %330 = vector.shape_cast %5 : vector<1x256xi1> to vector<1x256xi1>
    %331 = vector.broadcast %330 : vector<1x256xi1> to vector<2x256xi1>
    %332 = arith.select %331, %325, %329 : vector<2x256xi1>, vector<2x256xf32>
    %333 = vector.extract_strided_slice %332 {offsets = [0, 0], sizes = [2, 64], strides = [1, 1]} : vector<2x256xf32> to vector<2x64xf32>
    %334 = vector.extract_strided_slice %332 {offsets = [0, 64], sizes = [2, 64], strides = [1, 1]} : vector<2x256xf32> to vector<2x64xf32>
    %335 = vector.extract_strided_slice %332 {offsets = [0, 128], sizes = [2, 64], strides = [1, 1]} : vector<2x256xf32> to vector<2x64xf32>
    %336 = vector.extract_strided_slice %332 {offsets = [0, 192], sizes = [2, 64], strides = [1, 1]} : vector<2x256xf32> to vector<2x64xf32>
    %337 = arith.mulf %334, %315 : vector<2x64xf32>
    %338 = arith.mulf %333, %335 : vector<2x64xf32>
    %339 = arith.addf %337, %338 : vector<2x64xf32>
    %340 = math.tanh %339 : vector<2x64xf32>
    %341 = arith.mulf %336, %340 : vector<2x64xf32>
    %342 = vector.extract_strided_slice %341 {offsets = [0, 0], sizes = [2, 32], strides = [1, 1]} : vector<2x64xf32> to vector<2x32xf32>
    %c6_147 = arith.constant 6 : index
    %c0_148 = arith.constant 0 : index
    %343 = vector.load %arg6[%c6_147, %c0_148] : memref<16x64xf32, #tpu.memory_space<vmem>>, vector<2x32xf32>
    tpu.vector_store %arg6[%c6_147, %c0_148], %342 {strides = array<i32>} : memref<16x64xf32, #tpu.memory_space<vmem>>, vector<2x32xf32>,
    %344 = vector.extract_strided_slice %341 {offsets = [0, 32], sizes = [2, 32], strides = [1, 1]} : vector<2x64xf32> to vector<2x32xf32>
    %c8_149 = arith.constant 8 : index
    %c32_150 = arith.constant 32 : index
    %345 = vector.load %arg6[%c8_149, %c32_150] : memref<16x64xf32, #tpu.memory_space<vmem>>, vector<2x32xf32>
    tpu.vector_store %arg6[%c8_149, %c32_150], %344 {strides = array<i32>} : memref<16x64xf32, #tpu.memory_space<vmem>>, vector<2x32xf32>,
    %c8_151 = arith.constant 8 : index
    %c0_152 = arith.constant 0 : index
    %346 = vector.load %arg4[%c8_151, %c0_152] : memref<16x256xf32, #tpu.memory_space<vmem>>, vector<2x256xf32>
    %cst_153 = arith.constant dense<0.000000e+00> : vector<2x256xf32>
    %347 = tpu.matmul %341, %9, %cst_153 {dimension_numbers = #tpu.dot_dimension_numbers<[1], [0], [0], [1], [0, 0, 1, 1], [], []>} : vector<2x64xf32>, vector<64x256xf32>, vector<2x256xf32> -> vector<2x256xf32>
    %348 = arith.addf %346, %347 : vector<2x256xf32>
    %349 = math.tanh %348 : vector<2x256xf32>
    %cst_154 = arith.constant 5.000000e-01 : f32
    %350 = vector.broadcast %cst_154 : f32 to vector<2x256xf32>
    %351 = arith.mulf %350, %349 : vector<2x256xf32>
    %cst_155 = arith.constant 5.000000e-01 : f32
    %352 = vector.broadcast %cst_155 : f32 to vector<2x256xf32>
    %353 = arith.addf %351, %352 : vector<2x256xf32>
    %354 = vector.shape_cast %5 : vector<1x256xi1> to vector<1x256xi1>
    %355 = vector.broadcast %354 : vector<1x256xi1> to vector<2x256xi1>
    %356 = arith.select %355, %349, %353 : vector<2x256xi1>, vector<2x256xf32>
    %357 = vector.extract_strided_slice %356 {offsets = [0, 0], sizes = [2, 64], strides = [1, 1]} : vector<2x256xf32> to vector<2x64xf32>
    %358 = vector.extract_strided_slice %356 {offsets = [0, 64], sizes = [2, 64], strides = [1, 1]} : vector<2x256xf32> to vector<2x64xf32>
    %359 = vector.extract_strided_slice %356 {offsets = [0, 128], sizes = [2, 64], strides = [1, 1]} : vector<2x256xf32> to vector<2x64xf32>
    %360 = vector.extract_strided_slice %356 {offsets = [0, 192], sizes = [2, 64], strides = [1, 1]} : vector<2x256xf32> to vector<2x64xf32>
    %361 = arith.mulf %358, %339 : vector<2x64xf32>
    %362 = arith.mulf %357, %359 : vector<2x64xf32>
    %363 = arith.addf %361, %362 : vector<2x64xf32>
    %364 = math.tanh %363 : vector<2x64xf32>
    %365 = arith.mulf %360, %364 : vector<2x64xf32>
    %366 = vector.extract_strided_slice %365 {offsets = [0, 0], sizes = [2, 32], strides = [1, 1]} : vector<2x64xf32> to vector<2x32xf32>
    %c8_156 = arith.constant 8 : index
    %c0_157 = arith.constant 0 : index
    %367 = vector.load %arg6[%c8_156, %c0_157] : memref<16x64xf32, #tpu.memory_space<vmem>>, vector<2x32xf32>
    tpu.vector_store %arg6[%c8_156, %c0_157], %366 {strides = array<i32>} : memref<16x64xf32, #tpu.memory_space<vmem>>, vector<2x32xf32>,
    %368 = vector.extract_strided_slice %365 {offsets = [0, 32], sizes = [2, 32], strides = [1, 1]} : vector<2x64xf32> to vector<2x32xf32>
    %c6_158 = arith.constant 6 : index
    %c32_159 = arith.constant 32 : index
    %369 = vector.load %arg6[%c6_158, %c32_159] : memref<16x64xf32, #tpu.memory_space<vmem>>, vector<2x32xf32>
    tpu.vector_store %arg6[%c6_158, %c32_159], %368 {strides = array<i32>} : memref<16x64xf32, #tpu.memory_space<vmem>>, vector<2x32xf32>,
    %c10_160 = arith.constant 10 : index
    %c0_161 = arith.constant 0 : index
    %370 = vector.load %arg4[%c10_160, %c0_161] : memref<16x256xf32, #tpu.memory_space<vmem>>, vector<2x256xf32>
    %cst_162 = arith.constant dense<0.000000e+00> : vector<2x256xf32>
    %371 = tpu.matmul %365, %9, %cst_162 {dimension_numbers = #tpu.dot_dimension_numbers<[1], [0], [0], [1], [0, 0, 1, 1], [], []>} : vector<2x64xf32>, vector<64x256xf32>, vector<2x256xf32> -> vector<2x256xf32>
    %372 = arith.addf %370, %371 : vector<2x256xf32>
    %373 = math.tanh %372 : vector<2x256xf32>
    %cst_163 = arith.constant 5.000000e-01 : f32
    %374 = vector.broadcast %cst_163 : f32 to vector<2x256xf32>
    %375 = arith.mulf %374, %373 : vector<2x256xf32>
    %cst_164 = arith.constant 5.000000e-01 : f32
    %376 = vector.broadcast %cst_164 : f32 to vector<2x256xf32>
    %377 = arith.addf %375, %376 : vector<2x256xf32>
    %378 = vector.shape_cast %5 : vector<1x256xi1> to vector<1x256xi1>
    %379 = vector.broadcast %378 : vector<1x256xi1> to vector<2x256xi1>
    %380 = arith.select %379, %373, %377 : vector<2x256xi1>, vector<2x256xf32>
    %381 = vector.extract_strided_slice %380 {offsets = [0, 0], sizes = [2, 64], strides = [1, 1]} : vector<2x256xf32> to vector<2x64xf32>
    %382 = vector.extract_strided_slice %380 {offsets = [0, 64], sizes = [2, 64], strides = [1, 1]} : vector<2x256xf32> to vector<2x64xf32>
    %383 = vector.extract_strided_slice %380 {offsets = [0, 128], sizes = [2, 64], strides = [1, 1]} : vector<2x256xf32> to vector<2x64xf32>
    %384 = vector.extract_strided_slice %380 {offsets = [0, 192], sizes = [2, 64], strides = [1, 1]} : vector<2x256xf32> to vector<2x64xf32>
    %385 = arith.mulf %382, %363 : vector<2x64xf32>
    %386 = arith.mulf %381, %383 : vector<2x64xf32>
    %387 = arith.addf %385, %386 : vector<2x64xf32>
    %388 = math.tanh %387 : vector<2x64xf32>
    %389 = arith.mulf %384, %388 : vector<2x64xf32>
    %390 = vector.extract_strided_slice %389 {offsets = [0, 0], sizes = [2, 32], strides = [1, 1]} : vector<2x64xf32> to vector<2x32xf32>
    %c10_165 = arith.constant 10 : index
    %c0_166 = arith.constant 0 : index
    %391 = vector.load %arg6[%c10_165, %c0_166] : memref<16x64xf32, #tpu.memory_space<vmem>>, vector<2x32xf32>
    tpu.vector_store %arg6[%c10_165, %c0_166], %390 {strides = array<i32>} : memref<16x64xf32, #tpu.memory_space<vmem>>, vector<2x32xf32>,
    %392 = vector.extract_strided_slice %389 {offsets = [0, 32], sizes = [2, 32], strides = [1, 1]} : vector<2x64xf32> to vector<2x32xf32>
    %c4_167 = arith.constant 4 : index
    %c32_168 = arith.constant 32 : index
    %393 = vector.load %arg6[%c4_167, %c32_168] : memref<16x64xf32, #tpu.memory_space<vmem>>, vector<2x32xf32>
    tpu.vector_store %arg6[%c4_167, %c32_168], %392 {strides = array<i32>} : memref<16x64xf32, #tpu.memory_space<vmem>>, vector<2x32xf32>,
    %c12_169 = arith.constant 12 : index
    %c0_170 = arith.constant 0 : index
    %394 = vector.load %arg4[%c12_169, %c0_170] : memref<16x256xf32, #tpu.memory_space<vmem>>, vector<2x256xf32>
    %cst_171 = arith.constant dense<0.000000e+00> : vector<2x256xf32>
    %395 = tpu.matmul %389, %9, %cst_171 {dimension_numbers = #tpu.dot_dimension_numbers<[1], [0], [0], [1], [0, 0, 1, 1], [], []>} : vector<2x64xf32>, vector<64x256xf32>, vector<2x256xf32> -> vector<2x256xf32>
    %396 = arith.addf %394, %395 : vector<2x256xf32>
    %397 = math.tanh %396 : vector<2x256xf32>
    %cst_172 = arith.constant 5.000000e-01 : f32
    %398 = vector.broadcast %cst_172 : f32 to vector<2x256xf32>
    %399 = arith.mulf %398, %397 : vector<2x256xf32>
    %cst_173 = arith.constant 5.000000e-01 : f32
    %400 = vector.broadcast %cst_173 : f32 to vector<2x256xf32>
    %401 = arith.addf %399, %400 : vector<2x256xf32>
    %402 = vector.shape_cast %5 : vector<1x256xi1> to vector<1x256xi1>
    %403 = vector.broadcast %402 : vector<1x256xi1> to vector<2x256xi1>
    %404 = arith.select %403, %397, %401 : vector<2x256xi1>, vector<2x256xf32>
    %405 = vector.extract_strided_slice %404 {offsets = [0, 0], sizes = [2, 64], strides = [1, 1]} : vector<2x256xf32> to vector<2x64xf32>
    %406 = vector.extract_strided_slice %404 {offsets = [0, 64], sizes = [2, 64], strides = [1, 1]} : vector<2x256xf32> to vector<2x64xf32>
    %407 = vector.extract_strided_slice %404 {offsets = [0, 128], sizes = [2, 64], strides = [1, 1]} : vector<2x256xf32> to vector<2x64xf32>
    %408 = vector.extract_strided_slice %404 {offsets = [0, 192], sizes = [2, 64], strides = [1, 1]} : vector<2x256xf32> to vector<2x64xf32>
    %409 = arith.mulf %406, %387 : vector<2x64xf32>
    %410 = arith.mulf %405, %407 : vector<2x64xf32>
    %411 = arith.addf %409, %410 : vector<2x64xf32>
    %412 = math.tanh %411 : vector<2x64xf32>
    %413 = arith.mulf %408, %412 : vector<2x64xf32>
    %414 = vector.extract_strided_slice %413 {offsets = [0, 0], sizes = [2, 32], strides = [1, 1]} : vector<2x64xf32> to vector<2x32xf32>
    %c12_174 = arith.constant 12 : index
    %c0_175 = arith.constant 0 : index
    %415 = vector.load %arg6[%c12_174, %c0_175] : memref<16x64xf32, #tpu.memory_space<vmem>>, vector<2x32xf32>
    tpu.vector_store %arg6[%c12_174, %c0_175], %414 {strides = array<i32>} : memref<16x64xf32, #tpu.memory_space<vmem>>, vector<2x32xf32>,
    %416 = vector.extract_strided_slice %413 {offsets = [0, 32], sizes = [2, 32], strides = [1, 1]} : vector<2x64xf32> to vector<2x32xf32>
    %c2_176 = arith.constant 2 : index
    %c32_177 = arith.constant 32 : index
    %417 = vector.load %arg6[%c2_176, %c32_177] : memref<16x64xf32, #tpu.memory_space<vmem>>, vector<2x32xf32>
    tpu.vector_store %arg6[%c2_176, %c32_177], %416 {strides = array<i32>} : memref<16x64xf32, #tpu.memory_space<vmem>>, vector<2x32xf32>,
    %c14_178 = arith.constant 14 : index
    %c0_179 = arith.constant 0 : index
    %418 = vector.load %arg4[%c14_178, %c0_179] : memref<16x256xf32, #tpu.memory_space<vmem>>, vector<2x256xf32>
    %cst_180 = arith.constant dense<0.000000e+00> : vector<2x256xf32>
    %419 = tpu.matmul %413, %9, %cst_180 {dimension_numbers = #tpu.dot_dimension_numbers<[1], [0], [0], [1], [0, 0, 1, 1], [], []>} : vector<2x64xf32>, vector<64x256xf32>, vector<2x256xf32> -> vector<2x256xf32>
    %420 = arith.addf %418, %419 : vector<2x256xf32>
    %421 = math.tanh %420 : vector<2x256xf32>
    %cst_181 = arith.constant 5.000000e-01 : f32
    %422 = vector.broadcast %cst_181 : f32 to vector<2x256xf32>
    %423 = arith.mulf %422, %421 : vector<2x256xf32>
    %cst_182 = arith.constant 5.000000e-01 : f32
    %424 = vector.broadcast %cst_182 : f32 to vector<2x256xf32>
    %425 = arith.addf %423, %424 : vector<2x256xf32>
    %426 = vector.shape_cast %5 : vector<1x256xi1> to vector<1x256xi1>
    %427 = vector.broadcast %426 : vector<1x256xi1> to vector<2x256xi1>
    %428 = arith.select %427, %421, %425 : vector<2x256xi1>, vector<2x256xf32>
    %429 = vector.extract_strided_slice %428 {offsets = [0, 0], sizes = [2, 64], strides = [1, 1]} : vector<2x256xf32> to vector<2x64xf32>
    %430 = vector.extract_strided_slice %428 {offsets = [0, 64], sizes = [2, 64], strides = [1, 1]} : vector<2x256xf32> to vector<2x64xf32>
    %431 = vector.extract_strided_slice %428 {offsets = [0, 128], sizes = [2, 64], strides = [1, 1]} : vector<2x256xf32> to vector<2x64xf32>
    %432 = vector.extract_strided_slice %428 {offsets = [0, 192], sizes = [2, 64], strides = [1, 1]} : vector<2x256xf32> to vector<2x64xf32>
    %433 = arith.mulf %430, %411 : vector<2x64xf32>
    %434 = arith.mulf %429, %431 : vector<2x64xf32>
    %435 = arith.addf %433, %434 : vector<2x64xf32>
    %436 = math.tanh %435 : vector<2x64xf32>
    %437 = arith.mulf %432, %436 : vector<2x64xf32>
    %438 = vector.extract_strided_slice %437 {offsets = [0, 0], sizes = [2, 32], strides = [1, 1]} : vector<2x64xf32> to vector<2x32xf32>
    %c14_183 = arith.constant 14 : index
    %c0_184 = arith.constant 0 : index
    %439 = vector.load %arg6[%c14_183, %c0_184] : memref<16x64xf32, #tpu.memory_space<vmem>>, vector<2x32xf32>
    tpu.vector_store %arg6[%c14_183, %c0_184], %438 {strides = array<i32>} : memref<16x64xf32, #tpu.memory_space<vmem>>, vector<2x32xf32>,
    %440 = vector.extract_strided_slice %437 {offsets = [0, 32], sizes = [2, 32], strides = [1, 1]} : vector<2x64xf32> to vector<2x32xf32>
    %c0_185 = arith.constant 0 : index
    %c32_186 = arith.constant 32 : index
    %441 = vector.load %arg6[%c0_185, %c32_186] : memref<16x64xf32, #tpu.memory_space<vmem>>, vector<2x32xf32>
    tpu.vector_store %arg6[%c0_185, %c32_186], %440 {strides = array<i32>} : memref<16x64xf32, #tpu.memory_space<vmem>>, vector<2x32xf32>,
    %c0_187 = arith.constant 0 : index
    %c0_188 = arith.constant 0 : index
    %442 = vector.load %arg6[%c0_187, %c0_188] : memref<16x64xf32, #tpu.memory_space<vmem>>, vector<16x64xf32>
    %c196 = arith.constant 196 : index
    %c0_189 = arith.constant 0 : index
    %443 = vector.load %arg2[%c196, %c0_189] : memref<296x128xf32, #tpu.memory_space<vmem>>, vector<64x64xf32>
    %c1_190 = arith.constant 1 : index
    %c0_191 = arith.constant 0 : index
    %444 = vector.load %arg2[%c1_190, %c0_191] : memref<296x128xf32, #tpu.memory_space<vmem>>, vector<1x64xf32>
    %c1_192 = arith.constant 1 : index
    %c64_193 = arith.constant 64 : index
    %445 = vector.load %arg2[%c1_192, %c64_193] : memref<296x128xf32, #tpu.memory_space<vmem>>, vector<1x64xf32>
    %cst_194 = arith.constant dense<0.000000e+00> : vector<16x64xf32>
    %446 = tpu.matmul %442, %443, %cst_194 {dimension_numbers = #tpu.dot_dimension_numbers<[1], [0], [0], [1], [0, 0, 1, 1], [], []>} : vector<16x64xf32>, vector<64x64xf32>, vector<16x64xf32> -> vector<16x64xf32>
    %447 = vector.broadcast %444 : vector<1x64xf32> to vector<16x64xf32>
    %448 = arith.addf %446, %447 : vector<16x64xf32>
    %449 = math.tanh %448 : vector<16x64xf32>
    %450 = vector.broadcast %445 : vector<1x64xf32> to vector<16x64xf32>
    %451 = arith.mulf %449, %450 : vector<16x64xf32>
    %cst_195 = arith.constant dense<0.000000e+00> : vector<16xf32>
    %452 = vector.multi_reduction <add>, %451, %cst_195 [1] : vector<16x64xf32> to vector<16xf32>
    %453 = vector.shape_cast %452 : vector<16xf32> to vector<16x1xf32>
    %454 = vector.extract_strided_slice %453 {offsets = [0, 0], sizes = [2, 1], strides = [1, 1]} : vector<16x1xf32> to vector<2x1xf32>
    %455 = vector.extract_strided_slice %453 {offsets = [2, 0], sizes = [2, 1], strides = [1, 1]} : vector<16x1xf32> to vector<2x1xf32>
    %456 = arith.maximumf %454, %455 : vector<2x1xf32>
    %457 = vector.extract_strided_slice %453 {offsets = [4, 0], sizes = [2, 1], strides = [1, 1]} : vector<16x1xf32> to vector<2x1xf32>
    %458 = arith.maximumf %456, %457 : vector<2x1xf32>
    %459 = vector.extract_strided_slice %453 {offsets = [6, 0], sizes = [2, 1], strides = [1, 1]} : vector<16x1xf32> to vector<2x1xf32>
    %460 = arith.maximumf %458, %459 : vector<2x1xf32>
    %461 = vector.extract_strided_slice %453 {offsets = [8, 0], sizes = [2, 1], strides = [1, 1]} : vector<16x1xf32> to vector<2x1xf32>
    %462 = arith.maximumf %460, %461 : vector<2x1xf32>
    %463 = vector.extract_strided_slice %453 {offsets = [10, 0], sizes = [2, 1], strides = [1, 1]} : vector<16x1xf32> to vector<2x1xf32>
    %464 = arith.maximumf %462, %463 : vector<2x1xf32>
    %465 = vector.extract_strided_slice %453 {offsets = [12, 0], sizes = [2, 1], strides = [1, 1]} : vector<16x1xf32> to vector<2x1xf32>
    %466 = arith.maximumf %464, %465 : vector<2x1xf32>
    %467 = vector.extract_strided_slice %453 {offsets = [14, 0], sizes = [2, 1], strides = [1, 1]} : vector<16x1xf32> to vector<2x1xf32>
    %468 = arith.maximumf %466, %467 : vector<2x1xf32>
    %cst_196 = arith.constant 0.000000e+00 : f32
    %469 = vector.broadcast %cst_196 : f32 to vector<2x1xf32>
    %cst_197 = arith.constant 0.000000e+00 : f32
    %470 = vector.broadcast %cst_197 : f32 to vector<2x64xf32>
    %471 = vector.extract_strided_slice %453 {offsets = [0, 0], sizes = [2, 1], strides = [1, 1]} : vector<16x1xf32> to vector<2x1xf32>
    %472 = arith.subf %471, %468 : vector<2x1xf32>
    %473 = math.exp %472 : vector<2x1xf32>
    %474 = arith.addf %469, %473 : vector<2x1xf32>
    %475 = vector.extract_strided_slice %442 {offsets = [0, 0], sizes = [2, 64], strides = [1, 1]} : vector<16x64xf32> to vector<2x64xf32>
    %476 = vector.broadcast %473 : vector<2x1xf32> to vector<2x64xf32>
    %477 = arith.mulf %476, %475 : vector<2x64xf32>
    %478 = arith.addf %470, %477 : vector<2x64xf32>
    %479 = vector.extract_strided_slice %453 {offsets = [2, 0], sizes = [2, 1], strides = [1, 1]} : vector<16x1xf32> to vector<2x1xf32>
    %480 = arith.subf %479, %468 : vector<2x1xf32>
    %481 = math.exp %480 : vector<2x1xf32>
    %482 = arith.addf %474, %481 : vector<2x1xf32>
    %483 = vector.extract_strided_slice %442 {offsets = [2, 0], sizes = [2, 64], strides = [1, 1]} : vector<16x64xf32> to vector<2x64xf32>
    %484 = vector.broadcast %481 : vector<2x1xf32> to vector<2x64xf32>
    %485 = arith.mulf %484, %483 : vector<2x64xf32>
    %486 = arith.addf %478, %485 : vector<2x64xf32>
    %487 = vector.extract_strided_slice %453 {offsets = [4, 0], sizes = [2, 1], strides = [1, 1]} : vector<16x1xf32> to vector<2x1xf32>
    %488 = arith.subf %487, %468 : vector<2x1xf32>
    %489 = math.exp %488 : vector<2x1xf32>
    %490 = arith.addf %482, %489 : vector<2x1xf32>
    %491 = vector.extract_strided_slice %442 {offsets = [4, 0], sizes = [2, 64], strides = [1, 1]} : vector<16x64xf32> to vector<2x64xf32>
    %492 = vector.broadcast %489 : vector<2x1xf32> to vector<2x64xf32>
    %493 = arith.mulf %492, %491 : vector<2x64xf32>
    %494 = arith.addf %486, %493 : vector<2x64xf32>
    %495 = vector.extract_strided_slice %453 {offsets = [6, 0], sizes = [2, 1], strides = [1, 1]} : vector<16x1xf32> to vector<2x1xf32>
    %496 = arith.subf %495, %468 : vector<2x1xf32>
    %497 = math.exp %496 : vector<2x1xf32>
    %498 = arith.addf %490, %497 : vector<2x1xf32>
    %499 = vector.extract_strided_slice %442 {offsets = [6, 0], sizes = [2, 64], strides = [1, 1]} : vector<16x64xf32> to vector<2x64xf32>
    %500 = vector.broadcast %497 : vector<2x1xf32> to vector<2x64xf32>
    %501 = arith.mulf %500, %499 : vector<2x64xf32>
    %502 = arith.addf %494, %501 : vector<2x64xf32>
    %503 = vector.extract_strided_slice %453 {offsets = [8, 0], sizes = [2, 1], strides = [1, 1]} : vector<16x1xf32> to vector<2x1xf32>
    %504 = arith.subf %503, %468 : vector<2x1xf32>
    %505 = math.exp %504 : vector<2x1xf32>
    %506 = arith.addf %498, %505 : vector<2x1xf32>
    %507 = vector.extract_strided_slice %442 {offsets = [8, 0], sizes = [2, 64], strides = [1, 1]} : vector<16x64xf32> to vector<2x64xf32>
    %508 = vector.broadcast %505 : vector<2x1xf32> to vector<2x64xf32>
    %509 = arith.mulf %508, %507 : vector<2x64xf32>
    %510 = arith.addf %502, %509 : vector<2x64xf32>
    %511 = vector.extract_strided_slice %453 {offsets = [10, 0], sizes = [2, 1], strides = [1, 1]} : vector<16x1xf32> to vector<2x1xf32>
    %512 = arith.subf %511, %468 : vector<2x1xf32>
    %513 = math.exp %512 : vector<2x1xf32>
    %514 = arith.addf %506, %513 : vector<2x1xf32>
    %515 = vector.extract_strided_slice %442 {offsets = [10, 0], sizes = [2, 64], strides = [1, 1]} : vector<16x64xf32> to vector<2x64xf32>
    %516 = vector.broadcast %513 : vector<2x1xf32> to vector<2x64xf32>
    %517 = arith.mulf %516, %515 : vector<2x64xf32>
    %518 = arith.addf %510, %517 : vector<2x64xf32>
    %519 = vector.extract_strided_slice %453 {offsets = [12, 0], sizes = [2, 1], strides = [1, 1]} : vector<16x1xf32> to vector<2x1xf32>
    %520 = arith.subf %519, %468 : vector<2x1xf32>
    %521 = math.exp %520 : vector<2x1xf32>
    %522 = arith.addf %514, %521 : vector<2x1xf32>
    %523 = vector.extract_strided_slice %442 {offsets = [12, 0], sizes = [2, 64], strides = [1, 1]} : vector<16x64xf32> to vector<2x64xf32>
    %524 = vector.broadcast %521 : vector<2x1xf32> to vector<2x64xf32>
    %525 = arith.mulf %524, %523 : vector<2x64xf32>
    %526 = arith.addf %518, %525 : vector<2x64xf32>
    %527 = vector.extract_strided_slice %453 {offsets = [14, 0], sizes = [2, 1], strides = [1, 1]} : vector<16x1xf32> to vector<2x1xf32>
    %528 = arith.subf %527, %468 : vector<2x1xf32>
    %529 = math.exp %528 : vector<2x1xf32>
    %530 = arith.addf %522, %529 : vector<2x1xf32>
    %531 = vector.extract_strided_slice %442 {offsets = [14, 0], sizes = [2, 64], strides = [1, 1]} : vector<16x64xf32> to vector<2x64xf32>
    %532 = vector.broadcast %529 : vector<2x1xf32> to vector<2x64xf32>
    %533 = arith.mulf %532, %531 : vector<2x64xf32>
    %534 = arith.addf %526, %533 : vector<2x64xf32>
    %535 = vector.broadcast %530 : vector<2x1xf32> to vector<2x64xf32>
    %536 = arith.divf %534, %535 : vector<2x64xf32>
    %c14_198 = arith.constant 14 : index
    %c0_199 = arith.constant 0 : index
    %537 = vector.load %arg0[%c14_198, %c0_199] : memref<16x8xf32, #tpu.memory_space<vmem>>, vector<2x4xf32>
    %c4_200 = arith.constant 4 : index
    %c0_201 = arith.constant 0 : index
    %538 = vector.load %arg2[%c4_200, %c0_201] : memref<296x128xf32, #tpu.memory_space<vmem>>, vector<64x128xf32>
    %c0_202 = arith.constant 0 : index
    %c0_203 = arith.constant 0 : index
    %539 = vector.load %arg2[%c0_202, %c0_203] : memref<296x128xf32, #tpu.memory_space<vmem>>, vector<1x128xf32>
    %c292 = arith.constant 292 : index
    %c0_204 = arith.constant 0 : index
    %540 = vector.load %arg2[%c292, %c0_204] : memref<296x128xf32, #tpu.memory_space<vmem>>, vector<4x32xf32>
    %c2_205 = arith.constant 2 : index
    %c64_206 = arith.constant 64 : index
    %541 = vector.load %arg2[%c2_205, %c64_206] : memref<296x128xf32, #tpu.memory_space<vmem>>, vector<1x32xf32>
    %c68 = arith.constant 68 : index
    %c0_207 = arith.constant 0 : index
    %542 = vector.load %arg2[%c68, %c0_207] : memref<296x128xf32, #tpu.memory_space<vmem>>, vector<128x64xf32>
    %c260 = arith.constant 260 : index
    %c0_208 = arith.constant 0 : index
    %543 = vector.load %arg2[%c260, %c0_208] : memref<296x128xf32, #tpu.memory_space<vmem>>, vector<32x64xf32>
    %c2_209 = arith.constant 2 : index
    %c0_210 = arith.constant 0 : index
    %544 = vector.load %arg2[%c2_209, %c0_210] : memref<296x128xf32, #tpu.memory_space<vmem>>, vector<1x64xf32>
    %c3 = arith.constant 3 : index
    %c0_211 = arith.constant 0 : index
    %545 = vector.load %arg2[%c3, %c0_211] : memref<296x128xf32, #tpu.memory_space<vmem>>, vector<1x64xf32>
    %c3_212 = arith.constant 3 : index
    %c64_213 = arith.constant 64 : index
    %546 = vector.load %arg2[%c3_212, %c64_213] : memref<296x128xf32, #tpu.memory_space<vmem>>, vector<1x1xf32>
    %cst_214 = arith.constant dense<0.000000e+00> : vector<2x128xf32>
    %547 = tpu.matmul %536, %538, %cst_214 {dimension_numbers = #tpu.dot_dimension_numbers<[1], [0], [0], [1], [0, 0, 1, 1], [], []>} : vector<2x64xf32>, vector<64x128xf32>, vector<2x128xf32> -> vector<2x128xf32>
    %548 = vector.broadcast %539 : vector<1x128xf32> to vector<2x128xf32>
    %549 = arith.addf %547, %548 : vector<2x128xf32>
    %cst_215 = arith.constant 0.000000e+00 : f32
    %550 = vector.broadcast %cst_215 : f32 to vector<2x128xf32>
    %551 = arith.maximumf %549, %550 : vector<2x128xf32>
    %cst_216 = arith.constant dense<0.000000e+00> : vector<2x32xf32>
    %552 = tpu.matmul %537, %540, %cst_216 {dimension_numbers = #tpu.dot_dimension_numbers<[1], [0], [0], [1], [0, 0, 1, 1], [], []>} : vector<2x4xf32>, vector<4x32xf32>, vector<2x32xf32> -> vector<2x32xf32>
    %553 = vector.broadcast %541 : vector<1x32xf32> to vector<2x32xf32>
    %554 = arith.addf %552, %553 : vector<2x32xf32>
    %cst_217 = arith.constant 0.000000e+00 : f32
    %555 = vector.broadcast %cst_217 : f32 to vector<2x32xf32>
    %556 = arith.maximumf %554, %555 : vector<2x32xf32>
    %cst_218 = arith.constant dense<0.000000e+00> : vector<2x64xf32>
    %557 = tpu.matmul %551, %542, %cst_218 {dimension_numbers = #tpu.dot_dimension_numbers<[1], [0], [0], [1], [0, 0, 1, 1], [], []>} : vector<2x128xf32>, vector<128x64xf32>, vector<2x64xf32> -> vector<2x64xf32>
    %cst_219 = arith.constant dense<0.000000e+00> : vector<2x64xf32>
    %558 = tpu.matmul %556, %543, %cst_219 {dimension_numbers = #tpu.dot_dimension_numbers<[1], [0], [0], [1], [0, 0, 1, 1], [], []>} : vector<2x32xf32>, vector<32x64xf32>, vector<2x64xf32> -> vector<2x64xf32>
    %559 = arith.addf %557, %558 : vector<2x64xf32>
    %560 = vector.broadcast %544 : vector<1x64xf32> to vector<2x64xf32>
    %561 = arith.addf %559, %560 : vector<2x64xf32>
    %cst_220 = arith.constant 0.000000e+00 : f32
    %562 = vector.broadcast %cst_220 : f32 to vector<2x64xf32>
    %563 = arith.maximumf %561, %562 : vector<2x64xf32>
    %564 = vector.broadcast %545 : vector<1x64xf32> to vector<2x64xf32>
    %565 = arith.mulf %563, %564 : vector<2x64xf32>
    %cst_221 = arith.constant dense<0.000000e+00> : vector<2xf32>
    %566 = vector.multi_reduction <add>, %565, %cst_221 [1] : vector<2x64xf32> to vector<2xf32>
    %567 = vector.shape_cast %566 : vector<2xf32> to vector<2x1xf32>
    %568 = vector.broadcast %546 : vector<1x1xf32> to vector<2x1xf32>
    %569 = arith.addf %567, %568 : vector<2x1xf32>
    %c0_222 = arith.constant 0 : index
    %c0_223 = arith.constant 0 : index
    %570 = vector.load %arg3[%c0_222, %c0_223] : memref<2x1xf32, #tpu.memory_space<vmem>>, vector<2x1xf32>
    tpu.vector_store %arg3[%c0_222, %c0_223], %569 {strides = array<i32>} : memref<2x1xf32, #tpu.memory_space<vmem>>, vector<2x1xf32>,
    return
  }
}

</mosaic_0001>

<bundles_post_ra>
// kernel: improved_lstm_forward.1
= control target key start
LH: loop header
LB: loop body
LE: loop exit
PB: predicated region body
PF: predicated region fallthrough
CT: control target
= control target key end

     0   :  { %8 = vsyncpa [#allocation6], 0  ;;  %s3105_s0 = inlined_call_operand.vmem [shape: f32[16,8], index: 0, kind: input, shape index: {}]   ;;  %s3106_s1 = inlined_call_operand.hbm [shape: f32[266,256], index: 1, kind: input, shape index: {}]   ;;  %s3107_s2 = inlined_call_operand.hbm [shape: f32[296,128], index: 2, kind: input, shape index: {}]   ;;  %s3108_s3 = inlined_call_operand.vmem [shape: f32[2,1], index: 3, kind: output, shape index: {}]  }
   0x1   :  { %s16_s14 = sshll.u32 %s3106_s1, 4  ;;  %s17_s14 = int_to_ptr.hbm [resolvable:$true] %s16_s14 }
   0x2   :  { %9 = vsyncpa [#allocation8], 0  ;;  %s2420_s15 = smov [#allocation5]   ;;  %s29_s19 = sshll.u32 %s3107_s2, 4  ;;  %s30_s19 = int_to_ptr.hbm [resolvable:$true] %s29_s19 }
   0x3   :  { %s18_s16 = sshll.u32 %s2420_s15, 4  ;;  %s2421_s20 = smov 256   ;;  %s19_s16 = int_to_ptr.vmem [resolvable:$true] %s18_s16 }
   0x4   :  { %s2422_s21 = smov 16   ;;  %s2423_s22 = smov [#allocation7]  }
   0x5   :  { %24 = dma.hbm_to_vmem [thread:$0]  %s17_s14, 8704, %s19_s16, [#allocation6], %s2421_s20, %s2421_s20, %s2422_s21  }
   0x6   :  { %s31_s23 = sshll.u32 %s2423_s22, 4  ;;  %s2424_s24 = smov 128   ;;  %s32_s23 = int_to_ptr.vmem [resolvable:$true] %s31_s23 }
   0x7   :  { %s2425_s25 = smov 8  }
   0x8   :  { %37 = dma.hbm_to_vmem [thread:$0]  %s30_s19, 4736, %s32_s23, [#allocation8], %s2424_s24, %s2424_s24, %s2425_s25  }
   0x9   :  { %2416 = dma.done.wait [#allocation6], 8704  }
   0xa   :  { %2417 = vsyncadd [#allocation6], 4294958592 }
   0xb   :  { %2418 = dma.done.wait [#allocation8], 4736  }
   0xc   :  { %2419 = vsyncadd [#allocation8], 4294962560  ;;  %v55_v0 = vld [vmem:[#allocation5] sm:$0xfc]  ;;  %v57_v1 = vld [vmem:[#allocation5 + $0x10] sm:$0x3] }
   0xd   :  { %vm143_vm0 = vcmask 1045504   ;;  %v73_v2 = vld [vmem:[#allocation5 + $0x80] sm:$0xff]  ;;  %v144_v3 = vrot.slane %v55_v0, 2  ;;  %v145_v4 = vrot.slane %v57_v1, 2  ;;  %v75_v5 = vld [vmem:[#allocation5 + $0x90] sm:$0x3] }
   0xe   :  { %v255_v6 = vrot.slane %v73_v2, 2  ;;  %v2458_v7 = vld [vmem:[%s3105_s0] sm:$0xff]  ;;  %v259_v8 = vrot.slane %v75_v5, 2  ;;  %vm152_vm1 = vcmask 64512   ;;  %v74_v9 = vld [vmem:[#allocation5 + $0x88] sm:$0xff]  ;;  %v71_v11 = vld [vmem:[#allocation5 + $0x70] sm:$0xff] }
   0xf   :  { %v76_v10 = vld [vmem:[#allocation5 + $0x98] sm:$0x3]  ;;  %v146_v12 = vsel %vm143_vm0, %v144_v3, %v145_v4  ;;  %v257_v13 = vrot.slane %v74_v9, 2  ;;  %v251_v15 = vrot.slane %v71_v11, 2  ;;  %v69_v17 = vld [vmem:[#allocation5 + $0x60] sm:$0xff]  ;;  %v70_v18 = vld [vmem:[#allocation5 + $0x68] sm:$0xff] }
  0x10   :  { %v261_v14 = vrot.slane %v76_v10, 2  ;;  %v72_v16 = vld [vmem:[#allocation5 + $0x78] sm:$0xff]  ;;  %174 = vmatpush.msra.mxu3 %v146_v12  ;;  %v2462_v19 = vsel %vm143_vm0, %v255_v6, %v259_v8  ;;  %v247_v21 = vrot.slane %v69_v17, 2  ;;  %v249_v22 = vrot.slane %v70_v18, 2  ;;  %v67_v23 = vld [vmem:[#allocation5 + $0x50] sm:$0xff]  ;;  %v65_v25 = vld [vmem:[#allocation5 + $0x40] sm:$0xff] }
  0x11   :  { %v253_v20 = vrot.slane %v72_v16, 2  ;;  %v68_v24 = vld [vmem:[#allocation5 + $0x58] sm:$0xff]  ;;  %291 = vmatpush.msra.mxu2 %v2462_v19  ;;  %2196 = vmatmul.msk.f32.vlgmr.msra.gmra.mxu3 %vm152_vm1, %v2458_v7  ;;  %v2471_v27 = vsel %vm143_vm0, %v251_v15, %v255_v6  ;;  %v243_v28 = vrot.slane %v67_v23, 2  ;;  %v66_v30 = vld [vmem:[#allocation5 + $0x48] sm:$0xff]  ;;  %v63_v31 = vld [vmem:[#allocation5 + $0x30] sm:$0xff]  ;;  %v239_v34 = vrot.slane %v65_v25, 2 }
  0x12   :  { %v2468_v26 = vsel %vm143_vm0, %v257_v13, %v261_v14  ;;  %v245_v29 = vrot.slane %v68_v24, 2  ;;  %v2478_v33 = vsel %vm143_vm0, %v247_v21, %v251_v15  ;;  %v64_v35 = vld [vmem:[#allocation5 + $0x38] sm:$0xff]  ;;  %v56_v36 = vld [vmem:[#allocation5 + $0x8] sm:$0xfc]  ;;  %544 = vmatpush.msra.mxu0 %v2462_v19  ;;  %v241_v39 = vrot.slane %v66_v30, 2  ;;  %v61_v40 = vld [vmem:[#allocation5 + $0x20] sm:$0xff] }
  0x13   :  { %311 = vmatpush.msrb.mxu3 %v2468_v26  ;;  %v2475_v32 = vsel %vm143_vm0, %v253_v20, %v257_v13  ;;  %v58_v37 = vld [vmem:[#allocation5 + $0x18] sm:$0x3]  ;;  %292 = vmatpush.msra.mxu2 %v2471_v27  ;;  %v2483_v38 = vsel %vm143_vm0, %v249_v22, %v253_v20  ;;  %v2487_v41 = vsel %vm143_vm0, %v243_v28, %v247_v21  ;;  %v235_v42 = vrot.slane %v63_v31, 2  ;;  %v62_v45 = vld [vmem:[#allocation5 + $0x28] sm:$0xff]  ;;  %v59_v48 = vld [vmem:[#allocation5 + $0x10] sm:$0xfc] }
  0x14   :  { %v147_v43 = vrot.slane %v56_v36, 2  ;;  %v148_v44 = vrot.slane %v58_v37, 2  ;;  %545 = vmatpush.msra.mxu0 %v2471_v27  ;;  %v2492_v46 = vsel %vm143_vm0, %v245_v29, %v249_v22  ;;  %v237_v47 = vrot.slane %v64_v35, 2  ;;  %v60_v49 = vld [vmem:[#allocation5 + $0x18] sm:$0xfc]  ;;  %v133_v51 = vld [vmem:[%s3105_s0 + $0x8] sm:$0xff] }
  0x15   :  { %312 = vmatpush.msrb.mxu3 %v2475_v32  ;;  %293 = vmatpush.msra.mxu2 %v2478_v33  ;;  %v2496_v50 = vsel %vm143_vm0, %v239_v34, %v243_v28  ;;  %v230_v53 = vrot.slane %v61_v40, 2  ;;  %v2505_v54 = vsel %vm143_vm0, %v241_v39, %v245_v29  ;;  %v233_v55 = vrot.slane %v62_v45, 2  ;;  %v129_v1 = vld [vmem:[#allocation5] ss:$8 sm:$0x3]  ;;  %s2427_s28 = smov 64  }
  0x16   :  { %v149_v52 = vsel %vm143_vm0, %v147_v43, %v148_v44  ;;  %546 = vmatpush.msra.mxu0 %v2478_v33  ;;  %v2509_v56 = vsel %vm143_vm0, %v235_v42, %v239_v34  ;;  %v229_v57 = vrot.slane %v59_v48, 2  ;;  %v2516_v58 = vsel %vm143_vm0, %v237_v47, %v241_v39 }
  0x17   :  { %313 = vmatpush.msrb.mxu3 %v2483_v38  ;;  %294 = vmatpush.msra.mxu2 %v2487_v41  ;;  %v232_v59 = vrot.slane %v60_v49, 2  ;;  %v2520_v60 = vsel %vm143_vm0, %v230_v53, %v235_v42  ;;  %v2525_v61 = vsel %vm143_vm0, %v233_v55, %v237_v47  ;;  %v2426_v0 = vmov 0.0  }
  0x18   :  { %197 = vmatpush.msra.mxu1 %v149_v52  ;;  %547 = vmatpush.msra.mxu0 %v2487_v41  ;;  %v2530_v62 = vsel %vm143_vm0, %v229_v57, %v230_v53  ;;  %v135_v2 = vperm.slane %v129_v1, 0  ;;  %v136_v3 = vperm.slane %v129_v1, 1  ;;  %v46_v13 = vlaneseq }
  0x19   :  { %314 = vmatpush.msrb.mxu3 %v2492_v46  ;;  %2198 = vmatmul.msk.f32.vlgmr.msra.gmra.mxu1 %vm152_vm1, %v2458_v7  ;;  %v2535_v63 = vsel %vm143_vm0, %v232_v59, %v233_v55  ;;  %vm350_vm3 = vcmask 254976   ;;  %vm279_vm4 = vcmask 523264   ;;  %vm352_vm5 = vcmask 517376  }
  0x1a   :  { %295 = vmatpush.msra.mxu2 %v2496_v50  ;;  %2197 = vmatmul.msk.f32.gmra.mxu3 %vm152_vm1, %v133_v51  ;;  %v47_v17 = vand.u32 127, %v46_v13  ;;  %vm354_vm6 = vcmask 779776   ;;  %vm356_vm7 = vcmask 1042176   ;;  %vm434_vm8 = vcmask 257026  }
  0x1b   :  { %315 = vmatpush.msrb.mxu3 %v2505_v54  ;;  %370 = vmatpush.msrb.mxu1 %v2462_v19  ;;  %vm436_vm9 = vcmask 519426   ;;  %vm438_vm10 = vcmask 781826   ;;  %vm440_vm11 = vcmask 1044226   ;;  %vm521_vm12 = vcmask 259076  }
  0x1c   :  { %296 = vmatpush.msra.mxu2 %v2509_v56  ;;  %548 = vmatpush.msra.mxu0 %v2496_v50  ;;  %v2601_v18 = vadd.s32 128, %v47_v17  ;;  %vm523_vm13 = vcmask 521476   ;;  %vm525_vm14 = vcmask 783876   ;;  %vm527_vm15 = vcmask 1046276  }
  0x1d   :  { %316 = vmatpush.msrb.mxu3 %v2516_v58  ;;  %371 = vmatpush.msrb.mxu1 %v2471_v27 }
  0x1e   :  { %297 = vmatpush.msra.mxu2 %v2520_v60  ;;  %549 = vmatpush.msra.mxu0 %v2509_v56  ;;  %vm52_vm2 = vcmp.lt.s32.totalorder %v2601_v18, 192 }
  0x1f   :  { %317 = vmatpush.msrb.mxu3 %v2525_v61  ;;  %372 = vmatpush.msrb.mxu1 %v2478_v33 }
  0x20   :  { %298 = vmatpush.msra.mxu2 %v2530_v62  ;;  %550 = vmatpush.msra.mxu0 %v2520_v60 }
  0x21   :  { %299 = vmatmul.f32.vlgmr.msra.gmra.mxu2 %v2426_v0  ;;  %318 = vmatpush.msrb.mxu3 %v2535_v63 }
  0x22   :  { %319 = vmatmul.f32.vlgmr.msrb.gmra.mxu3 %v2426_v0  ;;  %373 = vmatpush.msrb.mxu1 %v2487_v41 }
  0x23   :  { %2199 = vmatmul.msk.f32.gmra.mxu1 %vm152_vm1, %v133_v51  ;;  %457 = vmatpush.msrb.mxu2 %v2462_v19  ;;  %vm608_vm1 = vcmask 261126  }
  0x24   :  { %374 = vmatpush.msrb.mxu1 %v2496_v50  ;;  %477 = vmatpush.msra.mxu3 %v2468_v26 }
  0x25   :  { %458 = vmatpush.msrb.mxu2 %v2471_v27  ;;  %551 = vmatpush.msra.mxu0 %v2530_v62 }
  0x26   :  { %375 = vmatpush.msrb.mxu1 %v2509_v56  ;;  %478 = vmatpush.msra.mxu3 %v2475_v32 }
  0x27   :  { %459 = vmatpush.msrb.mxu2 %v2478_v33  ;;  %705 = vmatpush.msrb.mxu0 %v2462_v19 }
  0x28   :  { %376 = vmatpush.msrb.mxu1 %v2520_v60  ;;  %479 = vmatpush.msra.mxu3 %v2483_v38 }
  0x29   :  { %460 = vmatpush.msrb.mxu2 %v2487_v41  ;;  %706 = vmatpush.msrb.mxu0 %v2471_v27 }
  0x2a   :  { %377 = vmatpush.msrb.mxu1 %v2530_v62  ;;  %480 = vmatpush.msra.mxu3 %v2492_v46 }
  0x2b   :  { %461 = vmatpush.msrb.mxu2 %v2496_v50  ;;  %707 = vmatpush.msrb.mxu0 %v2478_v33 }
  0x2c   :  { %390 = vmatpush.msra.mxu1 %v2468_v26  ;;  %481 = vmatpush.msra.mxu3 %v2505_v54 }
  0x2d   :  { %462 = vmatpush.msrb.mxu2 %v2509_v56  ;;  %708 = vmatpush.msrb.mxu0 %v2487_v41 }
  0x2e   :  { %391 = vmatpush.msra.mxu1 %v2475_v32  ;;  %482 = vmatpush.msra.mxu3 %v2516_v58 }
  0x2f   :  { %463 = vmatpush.msrb.mxu2 %v2520_v60  ;;  %709 = vmatpush.msrb.mxu0 %v2496_v50 }
  0x30   :  { %392 = vmatpush.msra.mxu1 %v2483_v38  ;;  %483 = vmatpush.msra.mxu3 %v2525_v61 }
  0x31   :  { %464 = vmatpush.msrb.mxu2 %v2530_v62  ;;  %710 = vmatpush.msrb.mxu0 %v2509_v56 }
  0x32   :  { %393 = vmatpush.msra.mxu1 %v2492_v46  ;;  %484 = vmatpush.msra.mxu3 %v2535_v63 }
  0x33   :  { %631 = vmatpush.msra.mxu2 %v2462_v19  ;;  %711 = vmatpush.msrb.mxu0 %v2520_v60 }
  0x34   :  { %394 = vmatpush.msra.mxu1 %v2505_v54  ;;  %651 = vmatpush.msrb.mxu3 %v2468_v26 }
  0x35   :  { %632 = vmatpush.msra.mxu2 %v2471_v27  ;;  %712 = vmatpush.msrb.mxu0 %v2530_v62 }
  0x36   :  { %395 = vmatpush.msra.mxu1 %v2516_v58  ;;  %652 = vmatpush.msrb.mxu3 %v2475_v32 }
  0x37   :  { %633 = vmatpush.msra.mxu2 %v2478_v33 }
  0x38   :  { %396 = vmatpush.msra.mxu1 %v2525_v61  ;;  %653 = vmatpush.msrb.mxu3 %v2483_v38 }
  0x39   :  { %634 = vmatpush.msra.mxu2 %v2487_v41 }
  0x3a   :  { %397 = vmatpush.msra.mxu1 %v2535_v63  ;;  %654 = vmatpush.msrb.mxu3 %v2492_v46 }
  0x3b   :  { %635 = vmatpush.msra.mxu2 %v2496_v50 }
  0x3c   :  { %655 = vmatpush.msrb.mxu3 %v2505_v54 }
  0x3d   :  { %636 = vmatpush.msra.mxu2 %v2509_v56 }
  0x3e   :  { %656 = vmatpush.msrb.mxu3 %v2516_v58 }
  0x3f   :  { %637 = vmatpush.msra.mxu2 %v2520_v60 }
  0x40   :  { %657 = vmatpush.msrb.mxu3 %v2525_v61 }
  0x41   :  { %638 = vmatpush.msra.mxu2 %v2530_v62 }
  0x42   :  { %658 = vmatpush.msrb.mxu3 %v2535_v63 }
  0x94   :  { %v176_v4 = vpop.f32.mrf.mxu3 }
  0x95   :  { %v177_v5 = vadd.f32 %v176_v4, %v135_v2 }
  0x96   :  { %v199_v6 = vpop.f32.mrf.mxu1 }
  0x97   :  { %v200_v7 = vadd.f32 %v199_v6, %v136_v3  ;;  %205 = vst [vmem:[#allocation2 + $0x10] sm:$0xff] %v177_v5 }
  0x99   :  { %206 = vst [vmem:[#allocation2] sm:$0xff] %v200_v7 }
  0x9d   :  { %v179_v8 = vpop.f32.mrf.mxu3 }
  0x9e   :  { %v180_v9 = vadd.f32 %v179_v8, %v135_v2  ;;  %v209_v11 = vld [vmem:[#allocation2 + $0x10] sm:$0x3]  ;;  %v358_v44 = vld [vmem:[#allocation2 + $0x10] sm:$0xc] }
  0xa0   :  { %207 = vst [vmem:[#allocation2 + $0x18] sm:$0xff] %v180_v9  ;;  %v210_v10 = vld [vmem:[#allocation2] sm:$0x3]  ;;  %v202_v37 = vpop.f32.mrf.mxu1  ;;  %v359_v49 = vld [vmem:[#allocation2] sm:$0xc] }
  0xa1   :  { %v203_v39 = vadd.f32 %v202_v37, %v136_v3  ;;  %v443_v17 = vld [vmem:[#allocation2] sm:$0x30] }
  0xa3   :  { %208 = vst [vmem:[#allocation2 + $0x8] sm:$0xff] %v203_v39 }
  0xa4   :  { %v300_v12 = vpop.f32.mrf.mxu2 }
  0xa5   :  { %v323_v14 = vadd.f32 %v300_v12, %v209_v11  ;;  %v320_v15 = vpop.f32.mrf.mxu3 }
  0xa6   :  { %v324_v16 = vadd.f32 %v320_v15, %v210_v10 }
  0xa7   :  { %2250 = vtanh.f32 %v323_v14 }
  0xa8   :  { %2252 = vtanh.f32 %v324_v16  ;;  %v442_v16 = vld [vmem:[#allocation2 + $0x10] sm:$0x30] }
  0xad   :  { %v2251_v20 = vpop.eup %2250 }
  0xae   :  { %v2253_v21 = vpop.eup %2252  ;;  %v327_v22 = vmul.f32 0.5, %v2251_v20 }
  0xaf   :  { %v328_v23 = vmul.f32 0.5, %v2253_v21 }
  0xb0   :  { %v329_v25 = vadd.f32 0.5, %v327_v22 }
  0xb1   :  { %v330_v24 = vadd.f32 0.5, %v328_v23 }
  0xb2   :  { %v337_v30 = vmul.f32 0.0, %v329_v25 }
  0xb3   :  { %v336_v28 = vsel %vm52_vm2, %v2253_v21, %v330_v24 }
  0xb4   :  { %v338_v29 = vmul.f32 %v336_v28, %v329_v25 }
  0xb6   :  { %340 = vrot.lane.b32.xlu0 %v338_v29, %s2427_s28 }
 0x128   :  { %v341_v31 = vpop.permute.xlu0 %340 }
 0x129   :  { %v343_v34 = vadd.f32 %v341_v31, %v337_v30 }
 0x12b   :  { %2254 = vtanh.f32 %v343_v34  ;;  %v419_v55 = vrot.slane %v343_v34, 6 }
 0x131   :  { %v2255_v35 = vpop.eup %2254 }
 0x132   :  { %v345_v36 = vmul.f32 %v2255_v35, %v336_v28 }
 0x134   :  { %347 = vrot.lane.b32.xlu0 %v345_v36, %s2427_s28 }
 0x1a6   :  { %v348_v40 = vpop.permute.xlu0 %347 }
 0x1a7   :  { %351 = vst.msk [vmem:[#allocation3] sm:$0x3] %vm350_vm3, %v348_v40  ;;  %2200 = vmatmul.msk.f32.vlgmr.msrb.gmra.mxu1 %vm279_vm4, %v348_v40 }
 0x1a8   :  { %353 = vst.msk [vmem:[#allocation3 + $0xe] sm:$0x3] %vm352_vm5, %v348_v40  ;;  %564 = vmatpush.msrb.mxu1 %v2468_v26 }
 0x1a9   :  { %355 = vst.msk [vmem:[#allocation3 + $0xe] sm:$0x3] %vm354_vm6, %v345_v36 }
 0x1aa   :  { %565 = vmatpush.msrb.mxu1 %v2475_v32  ;;  %357 = vst.msk [vmem:[#allocation3] sm:$0x3] %vm356_vm7, %v345_v36 }
 0x1ac   :  { %566 = vmatpush.msrb.mxu1 %v2483_v38 }
 0x1ae   :  { %567 = vmatpush.msrb.mxu1 %v2492_v46 }
 0x1af   :  { %2201 = vmatmul.msk.f32.vlgmr.msra.gmra.mxu1 %vm279_vm4, %v348_v40 }
 0x1b0   :  { %568 = vmatpush.msrb.mxu1 %v2505_v54 }
 0x1b2   :  { %569 = vmatpush.msrb.mxu1 %v2516_v58 }
 0x1b4   :  { %570 = vmatpush.msrb.mxu1 %v2525_v61 }
 0x1b6   :  { %571 = vmatpush.msrb.mxu1 %v2535_v63 }
 0x1b8   :  { %725 = vmatpush.msra.mxu1 %v2468_v26 }
 0x1ba   :  { %726 = vmatpush.msra.mxu1 %v2475_v32 }
 0x1bc   :  { %727 = vmatpush.msra.mxu1 %v2483_v38 }
 0x1be   :  { %728 = vmatpush.msra.mxu1 %v2492_v46 }
 0x1c0   :  { %729 = vmatpush.msra.mxu1 %v2505_v54 }
 0x1c2   :  { %730 = vmatpush.msra.mxu1 %v2516_v58 }
 0x1c4   :  { %731 = vmatpush.msra.mxu1 %v2525_v61 }
 0x1c6   :  { %732 = vmatpush.msra.mxu1 %v2535_v63 }
 0x224   :  { %v379_v42 = vpop.f32.mrf.mxu1 }
 0x225   :  { %v404_v43 = vrot.slane %v379_v42, 6 }
 0x227   :  { %v408_v45 = vadd.f32 %v404_v43, %v358_v44 }
 0x229   :  { %2256 = vtanh.f32 %v408_v45 }
 0x22c   :  { %v399_v47 = vpop.f32.mrf.mxu1 }
 0x22d   :  { %v405_v48 = vrot.slane %v399_v47, 6 }
 0x22f   :  { %v2257_v51 = vpop.eup %2256  ;;  %v409_v52 = vadd.f32 %v405_v48, %v359_v49 }
 0x230   :  { %v412_v53 = vmul.f32 0.5, %v2257_v51 }
 0x231   :  { %2258 = vtanh.f32 %v409_v52 }
 0x232   :  { %v414_v57 = vadd.f32 0.5, %v412_v53 }
 0x234   :  { %v421_v59 = vmul.f32 %v419_v55, %v414_v57  ;;  %v616_v55 = vld [vmem:[#allocation2 + $0x18] sm:$0x3] }
 0x237   :  { %v2259_v1 = vpop.eup %2258 }
 0x238   :  { %v413_v2 = vmul.f32 0.5, %v2259_v1 }
 0x23a   :  { %v415_v3 = vadd.f32 0.5, %v413_v2 }
 0x23c   :  { %v417_v4 = vsel %vm52_vm2, %v2259_v1, %v415_v3 }
 0x23d   :  { %v422_v5 = vmul.f32 %v417_v4, %v414_v57 }
 0x23f   :  { %424 = vrot.lane.b32.xlu1 %v422_v5, %s2427_s28 }
 0x2b1   :  { %v425_v6 = vpop.permute.xlu1 %424 }
 0x2b2   :  { %v427_v7 = vadd.f32 %v425_v6, %v421_v59  ;;  %v617_v59 = vld [vmem:[#allocation2 + $0x8] sm:$0x3] }
 0x2b4   :  { %2260 = vtanh.f32 %v427_v7  ;;  %v506_v28 = vrot.slane %v427_v7, 6 }
 0x2ba   :  { %v2261_v8 = vpop.eup %2260 }
 0x2bb   :  { %v2633_v9 = vmul.f32 %v2261_v8, %v417_v4 }
 0x2bd   :  { %v444_v10 = vrot.slane %v2633_v9, 2 }
 0x2bf   :  { %445 = vrot.lane.b32.xlu1 %v444_v10, %s2427_s28 }
 0x331   :  { %v446_v11 = vpop.permute.xlu1 %445 }
 0x332   :  { %2202 = vmatmul.msk.f32.vlgmr.msrb.gmra.mxu2 %vm279_vm4, %v446_v11  ;;  %2203 = vmatmul.msk.f32.vlgmr.msra.gmra.mxu3 %vm279_vm4, %v446_v11 }
 0x333   :  { %788 = vmatpush.msrb.mxu2 %v2462_v19  ;;  %808 = vmatpush.msra.mxu3 %v2468_v26 }
 0x335   :  { %789 = vmatpush.msrb.mxu2 %v2471_v27  ;;  %809 = vmatpush.msra.mxu3 %v2475_v32 }
 0x337   :  { %790 = vmatpush.msrb.mxu2 %v2478_v33  ;;  %810 = vmatpush.msra.mxu3 %v2483_v38 }
 0x339   :  { %791 = vmatpush.msrb.mxu2 %v2487_v41  ;;  %811 = vmatpush.msra.mxu3 %v2492_v46 }
 0x33b   :  { %792 = vmatpush.msrb.mxu2 %v2496_v50  ;;  %812 = vmatpush.msra.mxu3 %v2505_v54 }
 0x33d   :  { %793 = vmatpush.msrb.mxu2 %v2509_v56  ;;  %813 = vmatpush.msra.mxu3 %v2516_v58 }
 0x33f   :  { %794 = vmatpush.msrb.mxu2 %v2520_v60  ;;  %814 = vmatpush.msra.mxu3 %v2525_v61 }
 0x341   :  { %795 = vmatpush.msrb.mxu2 %v2530_v62  ;;  %815 = vmatpush.msra.mxu3 %v2535_v63 }
 0x3b5   :  { %v466_v12 = vpop.f32.mrf.mxu2  ;;  %v486_v13 = vpop.f32.mrf.mxu3 }
 0x3b6   :  { %v491_v14 = vrot.slane %v466_v12, 4  ;;  %v492_v15 = vrot.slane %v486_v13, 4 }
 0x3b8   :  { %v495_v20 = vadd.f32 %v491_v14, %v442_v16  ;;  %v496_v21 = vadd.f32 %v492_v15, %v443_v17 }
 0x3ba   :  { %2262 = vtanh.f32 %v495_v20 }
 0x3bb   :  { %2264 = vtanh.f32 %v496_v21 }
 0x3c0   :  { %v2263_v22 = vpop.eup %2262 }
 0x3c1   :  { %v2265_v23 = vpop.eup %2264  ;;  %v499_v24 = vmul.f32 0.5, %v2263_v22 }
 0x3c2   :  { %v500_v25 = vmul.f32 0.5, %v2265_v23 }
 0x3c3   :  { %v501_v29 = vadd.f32 0.5, %v499_v24 }
 0x3c4   :  { %v502_v30 = vadd.f32 0.5, %v500_v25 }
 0x3c5   :  { %v508_v31 = vmul.f32 %v506_v28, %v501_v29  ;;  %v693_v28 = vld [vmem:[#allocation2 + $0x18] sm:$0xc] }
 0x3c6   :  { %v504_v34 = vsel %vm52_vm2, %v2265_v23, %v502_v30 }
 0x3c7   :  { %v509_v35 = vmul.f32 %v504_v34, %v501_v29  ;;  %v694_v29 = vld [vmem:[#allocation2 + $0x8] sm:$0xc] }
 0x3c9   :  { %511 = vrot.lane.b32.xlu2 %v509_v35, %s2427_s28 }
 0x423   :  { %v512_v36 = vpop.permute.xlu2 %511 }
 0x424   :  { %v514_v37 = vadd.f32 %v512_v36, %v508_v31 }
 0x426   :  { %2266 = vtanh.f32 %v514_v37 }
 0x42c   :  { %v2267_v39 = vpop.eup %2266 }
 0x42d   :  { %v2658_v40 = vmul.f32 %v2267_v39, %v504_v34 }
 0x42f   :  { %v531_v42 = vrot.slane %v2658_v40, 4 }
 0x431   :  { %532 = vrot.lane.b32.xlu2 %v531_v42, %s2427_s28 }
 0x48b   :  { %v533_v43 = vpop.permute.xlu2 %532 }
 0x48c   :  { %2204 = vmatmul.msk.f32.vlgmr.msra.gmra.mxu0 %vm279_vm4, %v533_v43  ;;  %2205 = vmatmul.msk.f32.vlgmr.msrb.gmra.mxu1 %vm279_vm4, %v533_v43 }
 0x48d   :  { %871 = vmatpush.msra.mxu0 %v2462_v19  ;;  %891 = vmatpush.msrb.mxu1 %v2468_v26 }
 0x48f   :  { %872 = vmatpush.msra.mxu0 %v2471_v27  ;;  %892 = vmatpush.msrb.mxu1 %v2475_v32 }
 0x491   :  { %873 = vmatpush.msra.mxu0 %v2478_v33  ;;  %893 = vmatpush.msrb.mxu1 %v2483_v38  ;;  %v529_v33 = vld [vmem:[#allocation2 + $0x10] sm:$0xc0]  ;;  %v530_v38 = vld [vmem:[#allocation2] sm:$0xc0] }
 0x493   :  { %874 = vmatpush.msra.mxu0 %v2487_v41  ;;  %894 = vmatpush.msrb.mxu1 %v2492_v46 }
 0x495   :  { %875 = vmatpush.msra.mxu0 %v2496_v50  ;;  %895 = vmatpush.msrb.mxu1 %v2505_v54 }
 0x497   :  { %876 = vmatpush.msra.mxu0 %v2509_v56  ;;  %896 = vmatpush.msrb.mxu1 %v2516_v58 }
 0x499   :  { %877 = vmatpush.msra.mxu0 %v2520_v60  ;;  %897 = vmatpush.msrb.mxu1 %v2525_v61  ;;  %v593_v60 = vrot.slane %v514_v37, 6 }
 0x49b   :  { %878 = vmatpush.msra.mxu0 %v2530_v62  ;;  %898 = vmatpush.msrb.mxu1 %v2535_v63 }
 0x509   :  { %v553_v19 = vpop.f32.mrf.mxu0  ;;  %v573_v26 = vpop.f32.mrf.mxu1 }
 0x50a   :  { %v578_v27 = vrot.slane %v553_v19, 2  ;;  %v579_v32 = vrot.slane %v573_v26, 2 }
 0x50c   :  { %v582_v41 = vadd.f32 %v578_v27, %v529_v33  ;;  %v583_v46 = vadd.f32 %v579_v32, %v530_v38 }
 0x50e   :  { %2268 = vtanh.f32 %v582_v41 }
 0x50f   :  { %2270 = vtanh.f32 %v583_v46 }
 0x514   :  { %v2269_v50 = vpop.eup %2268 }
 0x515   :  { %v2271_v54 = vpop.eup %2270  ;;  %v586_v56 = vmul.f32 0.5, %v2269_v50 }
 0x516   :  { %v587_v58 = vmul.f32 0.5, %v2271_v54 }
 0x517   :  { %v588_v61 = vadd.f32 0.5, %v586_v56 }
 0x518   :  { %v589_v44 = vadd.f32 0.5, %v587_v58 }
 0x519   :  { %v595_v62 = vmul.f32 %v593_v60, %v588_v61 }
 0x51a   :  { %v591_v63 = vsel %vm52_vm2, %v2271_v54, %v589_v44  ;;  %v774_v44 = vld [vmem:[#allocation2 + $0x8] sm:$0x30] }
 0x51b   :  { %v596_v45 = vmul.f32 %v591_v63, %v588_v61  ;;  %v773_v61 = vld [vmem:[#allocation2 + $0x18] sm:$0x30] }
 0x51d   :  { %598 = vrot.lane.b32.xlu0 %v596_v45, %s2427_s28 }
 0x58f   :  { %v599_v47 = vpop.permute.xlu0 %598 }
 0x590   :  { %v601_v48 = vadd.f32 %v599_v47, %v595_v62 }
 0x592   :  { %2272 = vtanh.f32 %v601_v48  ;;  %v674_v8 = vrot.slane %v601_v48, 6 }
 0x598   :  { %v2273_v49 = vpop.eup %2272 }
 0x599   :  { %v2683_v51 = vmul.f32 %v2273_v49, %v591_v63 }
 0x59b   :  { %v618_v52 = vrot.slane %v2683_v51, 6 }
 0x59d   :  { %619 = vrot.lane.b32.xlu1 %v618_v52, %s2427_s28 }
 0x60f   :  { %v620_v53 = vpop.permute.xlu1 %619 }
 0x610   :  { %2206 = vmatmul.msk.f32.vlgmr.msra.gmra.mxu2 %vm279_vm4, %v620_v53  ;;  %2207 = vmatmul.msk.f32.vlgmr.msrb.gmra.mxu3 %vm279_vm4, %v620_v53 }
 0x693   :  { %v640_v57 = vpop.f32.mrf.mxu2  ;;  %v660_v1 = vpop.f32.mrf.mxu3 }
 0x694   :  { %v663_v2 = vadd.f32 %v640_v57, %v616_v55  ;;  %v664_v3 = vadd.f32 %v660_v1, %v617_v59 }
 0x696   :  { %2274 = vtanh.f32 %v663_v2 }
 0x697   :  { %2276 = vtanh.f32 %v664_v3 }
 0x69c   :  { %v2275_v4 = vpop.eup %2274 }
 0x69d   :  { %v2277_v5 = vpop.eup %2276  ;;  %v667_v6 = vmul.f32 0.5, %v2275_v4 }
 0x69e   :  { %v668_v7 = vmul.f32 0.5, %v2277_v5 }
 0x69f   :  { %v669_v10 = vadd.f32 0.5, %v667_v6 }
 0x6a0   :  { %v670_v11 = vadd.f32 0.5, %v668_v7 }
 0x6a1   :  { %v676_v12 = vmul.f32 %v674_v8, %v669_v10 }
 0x6a2   :  { %v672_v13 = vsel %vm52_vm2, %v2277_v5, %v670_v11 }
 0x6a3   :  { %v677_v14 = vmul.f32 %v672_v13, %v669_v10 }
 0x6a5   :  { %679 = vrot.lane.b32.xlu2 %v677_v14, %s2427_s28 }
 0x6ff   :  { %v680_v15 = vpop.permute.xlu2 %679 }
 0x700   :  { %v682_v16 = vadd.f32 %v680_v15, %v676_v12  ;;  %v856_v15 = vld [vmem:[#allocation2 + $0x18] sm:$0xc0] }
 0x702   :  { %2278 = vtanh.f32 %v682_v16  ;;  %v754_v39 = vrot.slane %v682_v16, 6  ;;  %v857_v16 = vld [vmem:[#allocation2 + $0x8] sm:$0xc0] }
 0x708   :  { %v2279_v17 = vpop.eup %2278 }
 0x709   :  { %v2692_v20 = vmul.f32 %v2279_v17, %v672_v13 }
 0x70b   :  { %686 = vrot.lane.b32.xlu0 %v2692_v20, %s2427_s28 }
 0x77d   :  { %v2696_v21 = vpop.permute.xlu0 %686 }
 0x77e   :  { %2208 = vmatmul.msk.f32.vlgmr.msrb.gmra.mxu0 %vm279_vm4, %v2696_v21  ;;  %2209 = vmatmul.msk.f32.vlgmr.msra.gmra.mxu1 %vm279_vm4, %v2696_v21 }
 0x7fb   :  { %v714_v22 = vpop.f32.mrf.mxu0  ;;  %v734_v23 = vpop.f32.mrf.mxu1 }
 0x7fc   :  { %v739_v24 = vrot.slane %v714_v22, 6  ;;  %v740_v25 = vrot.slane %v734_v23, 6 }
 0x7fe   :  { %v743_v30 = vadd.f32 %v739_v24, %v693_v28  ;;  %v744_v31 = vadd.f32 %v740_v25, %v694_v29 }
 0x800   :  { %2280 = vtanh.f32 %v743_v30 }
 0x801   :  { %2282 = vtanh.f32 %v744_v31 }
 0x806   :  { %v2281_v34 = vpop.eup %2280 }
 0x807   :  { %v2283_v35 = vpop.eup %2282  ;;  %v747_v36 = vmul.f32 0.5, %v2281_v34 }
 0x808   :  { %v748_v37 = vmul.f32 0.5, %v2283_v35 }
 0x809   :  { %v749_v42 = vadd.f32 0.5, %v747_v36 }
 0x80a   :  { %v750_v43 = vadd.f32 0.5, %v748_v37  ;;  %v107_v37 = vld [vmem:[#allocation5 + $0x180] sm:$0xff] }
 0x80b   :  { %v756_v19 = vmul.f32 %v754_v39, %v749_v42  ;;  %v109_v39 = vld [vmem:[#allocation5 + $0x190] sm:$0x3] }
 0x80c   :  { %v752_v26 = vsel %vm52_vm2, %v2283_v35, %v750_v43  ;;  %v1038_v43 = vrot.slane %v107_v37, 2 }
 0x80d   :  { %v757_v27 = vmul.f32 %v752_v26, %v749_v42  ;;  %v108_v42 = vld [vmem:[#allocation5 + $0x188] sm:$0xff] }
 0x80f   :  { %759 = vrot.lane.b32.xlu1 %v757_v27, %s2427_s28  ;;  %v1040_v27 = vrot.slane %v108_v42, 2  ;;  %v88_v42 = vld [vmem:[#allocation5 + $0xe8] sm:$0xff] }
 0x881   :  { %v760_v32 = vpop.permute.xlu1 %759 }
 0x882   :  { %v762_v33 = vadd.f32 %v760_v32, %v756_v19  ;;  %v1042_v19 = vrot.slane %v109_v39, 2  ;;  %v105_v32 = vld [vmem:[#allocation5 + $0x170] sm:$0xff] }
 0x884   :  { %2284 = vtanh.f32 %v762_v33  ;;  %v837_v52 = vrot.slane %v762_v33, 6 }
 0x88a   :  { %v2285_v38 = vpop.eup %2284 }
 0x88b   :  { %v2705_v41 = vmul.f32 %v2285_v38, %v752_v26  ;;  %v110_v26 = vld [vmem:[#allocation5 + $0x198] sm:$0x3]  ;;  %v1034_v38 = vrot.slane %v105_v32, 2 }
 0x88c   :  { %v1044_v33 = vrot.slane %v110_v26, 2 }
 0x88d   :  { %v775_v46 = vrot.slane %v2705_v41, 2 }
 0x88f   :  { %776 = vrot.lane.b32.xlu2 %v775_v46, %s2427_s28  ;;  %v103_v46 = vld [vmem:[#allocation5 + $0x160] sm:$0xff] }
 0x8e9   :  { %v777_v50 = vpop.permute.xlu2 %776 }
 0x8ea   :  { %2210 = vmatmul.msk.f32.vlgmr.msrb.gmra.mxu2 %vm279_vm4, %v777_v50  ;;  %2211 = vmatmul.msk.f32.vlgmr.msra.gmra.mxu3 %vm279_vm4, %v777_v50  ;;  %v104_v50 = vld [vmem:[#allocation5 + $0x168] sm:$0xff] }
 0x96d   :  { %v797_v54 = vpop.f32.mrf.mxu2  ;;  %v817_v56 = vpop.f32.mrf.mxu3 }
 0x96e   :  { %v822_v58 = vrot.slane %v797_v54, 4  ;;  %v823_v60 = vrot.slane %v817_v56, 4  ;;  %v1043_v54 = vsel %vm143_vm0, %v1038_v43, %v1042_v19 }
 0x96f   :  { %1078 = vmatpush.msra.mxu2 %v1043_v54 }
 0x970   :  { %v826_v62 = vadd.f32 %v822_v58, %v773_v61  ;;  %v827_v63 = vadd.f32 %v823_v60, %v774_v44  ;;  %v1030_v58 = vrot.slane %v103_v46, 2  ;;  %v1032_v60 = vrot.slane %v104_v50, 2  ;;  %v101_v61 = vld [vmem:[#allocation5 + $0x150] sm:$0xff]  ;;  %v102_v44 = vld [vmem:[#allocation5 + $0x158] sm:$0xff] }
 0x972   :  { %2286 = vtanh.f32 %v826_v62  ;;  %v99_v62 = vld [vmem:[#allocation5 + $0x140] sm:$0xff] }
 0x973   :  { %2288 = vtanh.f32 %v827_v63  ;;  %v1045_v63 = vsel %vm143_vm0, %v1040_v27, %v1044_v33 }
 0x974   :  { %1101 = vmatpush.msrb.mxu3 %v1045_v63  ;;  %v84_v63 = vld [vmem:[#allocation5 + $0xc8] sm:$0xff] }
 0x978   :  { %v2287_v45 = vpop.eup %2286 }
 0x979   :  { %v2289_v47 = vpop.eup %2288  ;;  %v830_v48 = vmul.f32 0.5, %v2287_v45  ;;  %v1039_v45 = vsel %vm143_vm0, %v1034_v38, %v1038_v43 }
 0x97a   :  { %v831_v49 = vmul.f32 0.5, %v2289_v47  ;;  %1079 = vmatpush.msra.mxu2 %v1039_v45 }
 0x97b   :  { %v832_v53 = vadd.f32 0.5, %v830_v48  ;;  %v1028_v48 = vrot.slane %v102_v44, 2 }
 0x97c   :  { %v833_v55 = vadd.f32 0.5, %v831_v49  ;;  %v100_v49 = vld [vmem:[#allocation5 + $0x148] sm:$0xff] }
 0x97d   :  { %v839_v57 = vmul.f32 %v837_v52, %v832_v53  ;;  %v97_v52 = vld [vmem:[#allocation5 + $0x130] sm:$0xff] }
 0x97e   :  { %v835_v59 = vsel %vm52_vm2, %v2289_v47, %v833_v55  ;;  %v1026_v47 = vrot.slane %v101_v61, 2  ;;  %v1035_v55 = vsel %vm143_vm0, %v1030_v58, %v1034_v38  ;;  %v1000_v38 = vrot.slane %v88_v42, 2  ;;  %v86_v61 = vld [vmem:[#allocation5 + $0xd8] sm:$0xff] }
 0x97f   :  { %v840_v1 = vmul.f32 %v835_v59, %v832_v53  ;;  %1080 = vmatpush.msra.mxu2 %v1035_v55 }
 0x981   :  { %842 = vrot.lane.b32.xlu0 %v840_v1, %s2427_s28 }
 0x989   :  { %431 = vrot.lane.b32.xlu0 %v2633_v9, %s2427_s28 }
 0x991   :  { %766 = vrot.lane.b32.xlu0 %v2705_v41, %s2427_s28 }
 0x9f3   :  { %v843_v2 = vpop.permute.xlu0 %842 }
 0x9f4   :  { %v845_v3 = vadd.f32 %v843_v2, %v839_v57  ;;  %v1022_v57 = vrot.slane %v99_v62, 2  ;;  %v1024_v2 = vrot.slane %v100_v49, 2  ;;  %v996_v62 = vrot.slane %v86_v61, 2 }
 0x9f5   :  { %v992_v49 = vrot.slane %v84_v63, 2  ;;  %v114_v63 = vld [vmem:[#allocation5 + $0x1a8] sm:$0xff] }
 0x9f6   :  { %2290 = vtanh.f32 %v845_v3  ;;  %v920_v29 = vrot.slane %v845_v3, 6  ;;  %v95_v3 = vld [vmem:[#allocation5 + $0x120] sm:$0xff] }
 0x9fb   :  { %v432_v4 = vpop.permute.xlu0 %431 }
 0x9fc   :  { %v2291_v5 = vpop.eup %2290  ;;  %435 = vst.msk [vmem:[#allocation3] sm:$0xc] %vm434_vm8, %v432_v4 }
 0x9fd   :  { %v847_v6 = vmul.f32 %v2291_v5, %v835_v59  ;;  %437 = vst.msk [vmem:[#allocation3 + $0xa] sm:$0xc] %vm436_vm9, %v432_v4  ;;  %v98_v59 = vld [vmem:[#allocation5 + $0x138] sm:$0xff]  ;;  %v1031_v4 = vsel %vm143_vm0, %v1026_v47, %v1030_v58  ;;  %v1018_v5 = vrot.slane %v97_v52, 2  ;;  %v81_v52 = vld [vmem:[#allocation5 + $0xb0] sm:$0xff] }
 0x9fe   :  { %439 = vst.msk [vmem:[#allocation3 + $0xa] sm:$0xc] %vm438_vm10, %v2633_v9  ;;  %1081 = vmatpush.msra.mxu2 %v1031_v4  ;;  %v986_v55 = vrot.slane %v81_v52, 2 }
 0x9ff   :  { %441 = vst.msk [vmem:[#allocation3] sm:$0xc] %vm440_vm11, %v2633_v9  ;;  %v858_v7 = vrot.slane %v847_v6, 4 }
 0xa01   :  { %859 = vrot.lane.b32.xlu1 %v858_v7, %s2427_s28  ;;  %v1033_v7 = vsel %vm143_vm0, %v1028_v48, %v1032_v60 }
 0xa03   :  { %v767_v9 = vpop.permute.xlu0 %766 }
 0xa09   :  { %518 = vrot.lane.b32.xlu1 %v2658_v40, %s2427_s28 }
 0xa11   :  { %849 = vrot.lane.b32.xlu1 %v847_v6, %s2427_s28 }
 0xa73   :  { %v860_v8 = vpop.permute.xlu1 %859 }
 0xa74   :  { %2212 = vmatmul.msk.f32.vlgmr.msra.gmra.mxu0 %vm279_vm4, %v860_v8  ;;  %2213 = vmatmul.msk.f32.vlgmr.msrb.gmra.mxu1 %vm279_vm4, %v860_v8  ;;  %v1020_v8 = vrot.slane %v98_v59, 2  ;;  %v80_v59 = vld [vmem:[#allocation5 + $0xa8] sm:$0xff] }
 0xa75   :  { %v984_v4 = vrot.slane %v80_v59, 2 }
 0xa7b   :  { %v519_v10 = vpop.permute.xlu1 %518 }
 0xa7c   :  { %522 = vst.msk [vmem:[#allocation3] sm:$0x30] %vm521_vm12, %v519_v10 }
 0xa7d   :  { %524 = vst.msk [vmem:[#allocation3 + $0x6] sm:$0x30] %vm523_vm13, %v519_v10  ;;  %v93_v10 = vld [vmem:[#allocation5 + $0x110] sm:$0xff] }
 0xa7e   :  { %526 = vst.msk [vmem:[#allocation3 + $0x6] sm:$0x30] %vm525_vm14, %v2658_v40 }
 0xa7f   :  { %528 = vst.msk [vmem:[#allocation3] sm:$0x30] %vm527_vm15, %v2658_v40 }
 0xa80   :  { %769 = vst.msk [vmem:[#allocation3 + $0x8] sm:$0xc] %vm434_vm8, %v767_v9 }
 0xa81   :  { %770 = vst.msk [vmem:[#allocation3 + $0x2] sm:$0xc] %vm436_vm9, %v767_v9  ;;  %v1027_v9 = vsel %vm143_vm0, %v1022_v57, %v1026_v47  ;;  %v1001_v47 = vsel %vm143_vm0, %v996_v62, %v1000_v38 }
 0xa82   :  { %771 = vst.msk [vmem:[#allocation3 + $0x2] sm:$0xc] %vm438_vm10, %v2705_v41  ;;  %1082 = vmatpush.msra.mxu2 %v1027_v9  ;;  %vm610_vm10 = vcmask 523526  }
 0xa83   :  { %772 = vst.msk [vmem:[#allocation3 + $0x8] sm:$0xc] %vm440_vm11, %v2705_v41  ;;  %v850_v11 = vpop.permute.xlu1 %849  ;;  %v106_v41 = vld [vmem:[#allocation5 + $0x178] sm:$0xff]  ;;  %vm612_vm11 = vcmask 785926  }
 0xa84   :  { %852 = vst.msk [vmem:[#allocation3 + $0x8] sm:$0x30] %vm521_vm12, %v850_v11  ;;  %v1036_v56 = vrot.slane %v106_v41, 2 }
 0xa85   :  { %853 = vst.msk [vmem:[#allocation3 - $0x2] sm:$0x30] %vm523_vm13, %v850_v11  ;;  %v1014_v11 = vrot.slane %v95_v3, 2  ;;  %v997_v3 = vsel %vm143_vm0, %v992_v49, %v996_v62  ;;  %v116_v62 = vld [vmem:[#allocation5 + $0x1b8] sm:$0xff] }
 0xa86   :  { %854 = vst.msk [vmem:[#allocation3 - $0x2] sm:$0x30] %vm525_vm14, %v847_v6  ;;  %v1041_v53 = vsel %vm143_vm0, %v1036_v56, %v1040_v27  ;;  %v1037_v1 = vsel %vm143_vm0, %v1032_v60, %v1036_v56  ;;  %vm614_vm14 = vcmask 1048326  }
 0xa87   :  { %855 = vst.msk [vmem:[#allocation3 + $0x8] sm:$0x30] %vm527_vm15, %v847_v6  ;;  %1102 = vmatpush.msrb.mxu3 %v1041_v53  ;;  %v96_v6 = vld [vmem:[#allocation5 + $0x128] sm:$0xff]  ;;  %v79_v53 = vld [vmem:[#allocation5 + $0xa0] sm:$0xff] }
 0xa89   :  { %1103 = vmatpush.msrb.mxu3 %v1037_v1  ;;  %v77_v1 = vld [vmem:[#allocation5 + $0x90] sm:$0xfc] }
 0xa8b   :  { %1104 = vmatpush.msrb.mxu3 %v1033_v7 }
 0xaf1   :  { %v880_v12 = vpop.f32.mrf.mxu0  ;;  %v900_v13 = vpop.f32.mrf.mxu1 }
 0xaf2   :  { %v905_v40 = vrot.slane %v880_v12, 2  ;;  %v906_v14 = vrot.slane %v900_v13, 2  ;;  %v94_v12 = vld [vmem:[#allocation5 + $0x118] sm:$0xff]  ;;  %v1029_v13 = vsel %vm143_vm0, %v1024_v2, %v1028_v48 }
 0xaf3   :  { %1105 = vmatpush.msrb.mxu3 %v1029_v13 }
 0xaf4   :  { %v909_v17 = vadd.f32 %v905_v40, %v856_v15  ;;  %v910_v22 = vadd.f32 %v906_v14, %v857_v16  ;;  %v1016_v40 = vrot.slane %v96_v6, 2  ;;  %v91_v14 = vld [vmem:[#allocation5 + $0x100] sm:$0xff]  ;;  %v1023_v15 = vsel %vm143_vm0, %v1018_v5, %v1022_v57  ;;  %v78_v6 = vld [vmem:[#allocation5 + $0x98] sm:$0xfc] }
 0xaf5   :  { %v1010_v16 = vrot.slane %v93_v10, 2  ;;  %1083 = vmatpush.msra.mxu2 %v1023_v15  ;;  %v983_v10 = vrot.slane %v78_v6, 2  ;;  %v126_v15 = vld [vmem:[#allocation5 + $0x208] sm:$0xff] }
 0xaf6   :  { %2292 = vtanh.f32 %v909_v17  ;;  %v92_v17 = vld [vmem:[#allocation5 + $0x108] sm:$0xff] }
 0xaf7   :  { %2294 = vtanh.f32 %v910_v22  ;;  %v1025_v22 = vsel %vm143_vm0, %v1020_v8, %v1024_v2  ;;  %v1015_v37 = vsel %vm143_vm0, %v1010_v16, %v1014_v11  ;;  %v985_v13 = vsel %vm143_vm0, %v983_v10, %v984_v4  ;;  %v131_v6 = vld [vmem:[#allocation5 + $0x1] ss:$8 sm:$0x3] }
 0xaf8   :  { %1106 = vmatpush.msrb.mxu3 %v1025_v22  ;;  %v128_v22 = vld [vmem:[#allocation5 + $0x218] sm:$0x3] }
 0xafc   :  { %v2293_v23 = vpop.eup %2292 }
 0xafd   :  { %v2295_v24 = vpop.eup %2294  ;;  %v913_v25 = vmul.f32 0.5, %v2293_v23  ;;  %v1012_v23 = vrot.slane %v94_v12, 2 }
 0xafe   :  { %v914_v28 = vmul.f32 0.5, %v2295_v24 }
 0xaff   :  { %v915_v30 = vadd.f32 0.5, %v913_v25  ;;  %v1019_v25 = vsel %vm143_vm0, %v1014_v11, %v1018_v5  ;;  %v1017_v43 = vsel %vm143_vm0, %v1012_v23, %v1016_v40  ;;  %v980_v5 = vrot.slane %v77_v1, 2 }
 0xb00   :  { %v916_v31 = vadd.f32 0.5, %v914_v28  ;;  %v1006_v28 = vrot.slane %v91_v14, 2  ;;  %1084 = vmatpush.msra.mxu2 %v1019_v25  ;;  %v127_v14 = vld [vmem:[#allocation5 + $0x210] sm:$0x3]  ;;  %v1180_v25 = vrot.slane %v128_v22, 2 }
 0xb01   :  { %v2742_v34 = vmul.f32 %v920_v29, %v915_v30  ;;  %v90_v29 = vld [vmem:[#allocation5 + $0xf8] sm:$0xff] }
 0xb02   :  { %v2746_v35 = vsel %vm52_vm2, %v2295_v24, %v916_v31  ;;  %v89_v24 = vld [vmem:[#allocation5 + $0xf0] sm:$0xff]  ;;  %v1008_v31 = vrot.slane %v92_v17, 2  ;;  %v1004_v19 = vrot.slane %v90_v29, 2  ;;  %v1011_v26 = vsel %vm143_vm0, %v1006_v28, %v1010_v16  ;;  %1085 = vmatpush.msra.mxu2 %v1015_v37  ;;  %v124_v29 = vld [vmem:[#allocation5 + $0x1f8] sm:$0xff] }
 0xb03   :  { %v923_v36 = vmul.f32 %v2746_v35, %v915_v30  ;;  %v1021_v30 = vsel %vm143_vm0, %v1016_v40, %v1020_v8  ;;  %v1002_v39 = vrot.slane %v89_v24, 2  ;;  %v125_v40 = vld [vmem:[#allocation5 + $0x200] sm:$0xff]  ;;  %v1178_v17 = vrot.slane %v127_v14, 2  ;;  %v123_v24 = vld [vmem:[#allocation5 + $0x1f0] sm:$0xff] }
 0xb04   :  { %1107 = vmatpush.msrb.mxu3 %v1021_v30  ;;  %v1013_v33 = vsel %vm143_vm0, %v1008_v31, %v1012_v23  ;;  %1086 = vmatpush.msra.mxu2 %v1011_v26  ;;  %v1009_v50 = vsel %vm143_vm0, %v1004_v19, %v1008_v31  ;;  %v1005_v56 = vsel %vm143_vm0, %v1000_v38, %v1004_v19  ;;  %v1174_v16 = vrot.slane %v125_v40, 2  ;;  %v121_v30 = vld [vmem:[#allocation5 + $0x1e0] sm:$0xff]  ;;  %v122_v31 = vld [vmem:[#allocation5 + $0x1e8] sm:$0xff]  ;;  %v120_v19 = vld [vmem:[#allocation5 + $0x1d8] sm:$0xff] }
 0xb05   :  { %925 = vrot.lane.b32.xlu2 %v923_v36, %s2427_s28  ;;  %v87_v36 = vld [vmem:[#allocation5 + $0xe0] sm:$0xff]  ;;  %v1007_v46 = vsel %vm143_vm0, %v1002_v39, %v1006_v28  ;;  %v1176_v23 = vrot.slane %v126_v15, 2  ;;  %v1170_v28 = vrot.slane %v123_v24, 2  ;;  %v1172_v37 = vrot.slane %v124_v29, 2 }
 0xb06   :  { %v998_v27 = vrot.slane %v87_v36, 2  ;;  %1108 = vmatpush.msrb.mxu3 %v1017_v43  ;;  %1087 = vmatpush.msra.mxu2 %v1007_v46  ;;  %v2805_v36 = vsel %vm143_vm0, %v1174_v16, %v1178_v17  ;;  %v1168_v42 = vrot.slane %v122_v31, 2  ;;  %v119_v43 = vld [vmem:[#allocation5 + $0x1d0] sm:$0xff] }
 0xb07   :  { %1206 = vmatpush.msrb.mxu0 %v2805_v36  ;;  %v2809_v26 = vsel %vm143_vm0, %v1176_v23, %v1180_v25  ;;  %v2817_v38 = vsel %vm143_vm0, %v1172_v37, %v1176_v23 }
 0xb08   :  { %1109 = vmatpush.msrb.mxu3 %v1013_v33  ;;  %v1003_v54 = vsel %vm143_vm0, %v998_v27, %v1002_v39  ;;  %v1166_v39 = vrot.slane %v121_v30, 2  ;;  %v1164_v33 = vrot.slane %v120_v19, 2  ;;  %1226 = vmatpush.msra.mxu1 %v2809_v26  ;;  %v2825_v46 = vsel %vm143_vm0, %v1168_v42, %v1172_v37 }
 0xb09   :  { %1088 = vmatpush.msra.mxu2 %v1003_v54 }
 0xb0a   :  { %1110 = vmatpush.msrb.mxu3 %v1009_v50  ;;  %1227 = vmatpush.msra.mxu1 %v2817_v38  ;;  %v2835_v54 = vsel %vm143_vm0, %v1164_v33, %v1168_v42 }
 0xb0c   :  { %1111 = vmatpush.msrb.mxu3 %v1005_v56  ;;  %v117_v56 = vld [vmem:[#allocation5 + $0x1c0] sm:$0xff]  ;;  %1228 = vmatpush.msra.mxu1 %v2825_v46 }
 0xb0d   :  { %605 = vrot.lane.b32.xlu2 %v2683_v51, %s2427_s28 }
 0xb0e   :  { %1112 = vmatpush.msrb.mxu3 %v1001_v47  ;;  %1229 = vmatpush.msra.mxu1 %v2835_v54 }
 0xb10   :  { %1113 = vmatpush.msrb.mxu3 %v997_v3 }
 0xb5f   :  { %v926_v32 = vpop.permute.xlu2 %925 }
 0xb60   :  { %v928_v41 = vadd.f32 %v926_v32, %v2742_v34  ;;  %v1162_v32 = vrot.slane %v119_v43, 2 }
 0xb62   :  { %2296 = vtanh.f32 %v928_v41  ;;  %v2820_v41 = vsel %vm143_vm0, %v1166_v39, %v1170_v28  ;;  %v2830_v50 = vsel %vm143_vm0, %v1162_v32, %v1166_v39 }
 0xb67   :  { %v606_v34 = vpop.permute.xlu2 %605 }
 0xb68   :  { %v2297_v58 = vpop.eup %2296  ;;  %609 = vst.msk [vmem:[#allocation3] sm:$0xc0] %vm608_vm1, %v606_v34 }
 0xb69   :  { %611 = vst.msk [vmem:[#allocation3 + $0x2] sm:$0xc0] %vm610_vm10, %v606_v34  ;;  %v2778_v60 = vmul.f32 %v2297_v58, %v2746_v35  ;;  %v85_v35 = vld [vmem:[#allocation5 + $0xd0] sm:$0xff]  ;;  %v118_v34 = vld [vmem:[#allocation5 + $0x1c8] sm:$0xff] }
 0xb6a   :  { %613 = vst.msk [vmem:[#allocation3 + $0x2] sm:$0xc0] %vm612_vm11, %v2683_v51  ;;  %v994_v44 = vrot.slane %v85_v35, 2  ;;  %v115_v58 = vld [vmem:[#allocation5 + $0x1b0] sm:$0xff]  ;;  %v1158_v35 = vrot.slane %v117_v56, 2  ;;  %v1160_v61 = vrot.slane %v118_v34, 2 }
 0xb6b   :  { %615 = vst.msk [vmem:[#allocation3] sm:$0xc0] %vm614_vm14, %v2683_v51  ;;  %932 = vrot.lane.b32.xlu2 %v2778_v60, %s2427_s28  ;;  %v83_v51 = vld [vmem:[#allocation5 + $0xc0] sm:$0xff] }
 0xb6c   :  { %689 = vst.msk [vmem:[#allocation3 + $0x8] sm:$0x3] %vm350_vm3, %v2696_v21  ;;  %v999_v45 = vsel %vm143_vm0, %v994_v44, %v998_v27  ;;  %v990_v48 = vrot.slane %v83_v51, 2  ;;  %v2812_v27 = vsel %vm143_vm0, %v1170_v28, %v1174_v16  ;;  %v113_v51 = vld [vmem:[#allocation5 + $0x1a0] sm:$0xff]  ;;  %v2844_v52 = vsel %vm143_vm0, %v1158_v35, %v1162_v32 }
 0xb6d   :  { %690 = vst.msk [vmem:[#allocation3 + $0x6] sm:$0x3] %vm352_vm5, %v2696_v21  ;;  %v82_v21 = vld [vmem:[#allocation5 + $0xb8] sm:$0xff]  ;;  %1089 = vmatpush.msra.mxu2 %v999_v45  ;;  %1207 = vmatpush.msrb.mxu0 %v2812_v27  ;;  %v1156_v45 = vrot.slane %v116_v62, 2  ;;  %v1149_v47 = vrot.slane %v113_v51, 2 }
 0xb6e   :  { %691 = vst.msk [vmem:[#allocation3 + $0x6] sm:$0x3] %vm354_vm6, %v2692_v20  ;;  %v988_v57 = vrot.slane %v82_v21, 2  ;;  %v995_v2 = vsel %vm143_vm0, %v990_v48, %v994_v44  ;;  %v991_v7 = vsel %vm143_vm0, %v986_v55, %v990_v48  ;;  %v1154_v44 = vrot.slane %v115_v58, 2 }
 0xb6f   :  { %692 = vst.msk [vmem:[#allocation3 + $0x8] sm:$0x3] %vm356_vm7, %v2692_v20  ;;  %v981_v20 = vrot.slane %v79_v53, 2  ;;  %1090 = vmatpush.msra.mxu2 %v995_v2  ;;  %1208 = vmatpush.msrb.mxu0 %v2820_v41  ;;  %v1152_v48 = vrot.slane %v114_v63, 2  ;;  %v2847_v21 = vsel %vm143_vm0, %v1160_v61, %v1164_v33 }
 0xb70   :  { %v993_v8 = vsel %vm143_vm0, %v988_v57, %v992_v49  ;;  %v989_v11 = vsel %vm143_vm0, %v984_v4, %v988_v57  ;;  %v111_v49 = vld [vmem:[#allocation5 + $0x190] sm:$0xfc]  ;;  %v2850_v53 = vsel %vm143_vm0, %v1154_v44, %v1158_v35  ;;  %v112_v57 = vld [vmem:[#allocation5 + $0x198] sm:$0xfc]  ;;  %1230 = vmatpush.msra.mxu1 %v2847_v21  ;;  %v2860_v1 = vsel %vm143_vm0, %v1149_v47, %v1154_v44 }
 0xb71   :  { %v987_v9 = vsel %vm143_vm0, %v981_v20, %v986_v55  ;;  %1091 = vmatpush.msra.mxu2 %v991_v7  ;;  %1114 = vmatpush.msrb.mxu3 %v993_v8  ;;  %v982_v12 = vsel %vm143_vm0, %v980_v5, %v981_v20  ;;  %v1148_v55 = vrot.slane %v111_v49, 2  ;;  %v2855_v20 = vsel %vm143_vm0, %v1156_v45, %v1160_v61 }
 0xb72   :  { %1209 = vmatpush.msrb.mxu0 %v2830_v50  ;;  %v1151_v59 = vrot.slane %v112_v57, 2  ;;  %v2865_v2 = vsel %vm143_vm0, %v1152_v48, %v1156_v45  ;;  %1231 = vmatpush.msra.mxu1 %v2855_v20  ;;  %v942_v7 = vperm.slane %v131_v6, 0  ;;  %v943_v8 = vperm.slane %v131_v6, 1 }
 0xb73   :  { %1092 = vmatpush.msra.mxu2 %v987_v9  ;;  %1115 = vmatpush.msrb.mxu3 %v989_v11  ;;  %v2870_v3 = vsel %vm143_vm0, %v1148_v55, %v1149_v47 }
 0xb74   :  { %1210 = vmatpush.msrb.mxu0 %v2844_v52  ;;  %v2875_v4 = vsel %vm143_vm0, %v1151_v59, %v1152_v48  ;;  %1232 = vmatpush.msra.mxu1 %v2865_v2  ;;  %vm2106_vm0 = vcmask 1043456  }
 0xb75   :  { %1093 = vmatpush.msra.mxu2 %v982_v12  ;;  %1116 = vmatpush.msrb.mxu3 %v985_v13 }
 0xb76   :  { %1211 = vmatpush.msrb.mxu0 %v2850_v53  ;;  %1233 = vmatpush.msra.mxu1 %v2875_v4 }
 0xb77   :  { %1356 = vmatpush.msrb.mxu2 %v2805_v36  ;;  %1376 = vmatpush.msra.mxu3 %v2809_v26 }
 0xb78   :  { %1212 = vmatpush.msrb.mxu0 %v2860_v1  ;;  %1234 = vmatmul.f32.vlgmr.msra.gmra.mxu1 %v2426_v0 }
 0xb79   :  { %1357 = vmatpush.msrb.mxu2 %v2812_v27  ;;  %1377 = vmatpush.msra.mxu3 %v2817_v38 }
 0xb7a   :  { %1213 = vmatpush.msrb.mxu0 %v2870_v3  ;;  %1295 = vmatpush.msrb.mxu1 %v2809_v26 }
 0xb7b   :  { %1358 = vmatpush.msrb.mxu2 %v2820_v41  ;;  %1378 = vmatpush.msra.mxu3 %v2825_v46 }
 0xb7c   :  { %1214 = vmatmul.f32.vlgmr.msrb.gmra.mxu0 %v2426_v0  ;;  %1296 = vmatpush.msrb.mxu1 %v2817_v38 }
 0xb7d   :  { %1359 = vmatpush.msrb.mxu2 %v2830_v50  ;;  %1379 = vmatpush.msra.mxu3 %v2835_v54 }
 0xb7e   :  { %1275 = vmatpush.msra.mxu0 %v2805_v36  ;;  %1297 = vmatpush.msrb.mxu1 %v2825_v46 }
 0xb7f   :  { %1360 = vmatpush.msrb.mxu2 %v2844_v52  ;;  %1380 = vmatpush.msra.mxu3 %v2847_v21 }
 0xb80   :  { %1276 = vmatpush.msra.mxu0 %v2812_v27  ;;  %1298 = vmatpush.msrb.mxu1 %v2835_v54 }
 0xb81   :  { %1361 = vmatpush.msrb.mxu2 %v2850_v53  ;;  %1381 = vmatpush.msra.mxu3 %v2855_v20 }
 0xb82   :  { %1277 = vmatpush.msra.mxu0 %v2820_v41  ;;  %1299 = vmatpush.msrb.mxu1 %v2847_v21 }
 0xb83   :  { %1362 = vmatpush.msrb.mxu2 %v2860_v1  ;;  %1382 = vmatpush.msra.mxu3 %v2865_v2 }
 0xb84   :  { %1278 = vmatpush.msra.mxu0 %v2830_v50  ;;  %1300 = vmatpush.msrb.mxu1 %v2855_v20 }
 0xb85   :  { %1363 = vmatpush.msrb.mxu2 %v2870_v3  ;;  %1383 = vmatpush.msra.mxu3 %v2875_v4 }
 0xb86   :  { %1279 = vmatpush.msra.mxu0 %v2844_v52  ;;  %1301 = vmatpush.msrb.mxu1 %v2865_v2 }
 0xb88   :  { %1280 = vmatpush.msra.mxu0 %v2850_v53  ;;  %1302 = vmatpush.msrb.mxu1 %v2875_v4 }
 0xb8a   :  { %1281 = vmatpush.msra.mxu0 %v2860_v1  ;;  %1457 = vmatpush.msra.mxu1 %v2809_v26 }
 0xb8c   :  { %1282 = vmatpush.msra.mxu0 %v2870_v3  ;;  %1458 = vmatpush.msra.mxu1 %v2817_v38 }
 0xb8e   :  { %1437 = vmatpush.msrb.mxu0 %v2805_v36  ;;  %1459 = vmatpush.msra.mxu1 %v2825_v46 }
 0xb90   :  { %1438 = vmatpush.msrb.mxu0 %v2812_v27  ;;  %1460 = vmatpush.msra.mxu1 %v2835_v54 }
 0xb92   :  { %1439 = vmatpush.msrb.mxu0 %v2820_v41  ;;  %1461 = vmatpush.msra.mxu1 %v2847_v21 }
 0xb94   :  { %1440 = vmatpush.msrb.mxu0 %v2830_v50  ;;  %1462 = vmatpush.msra.mxu1 %v2855_v20 }
 0xb96   :  { %1441 = vmatpush.msrb.mxu0 %v2844_v52  ;;  %1463 = vmatpush.msra.mxu1 %v2865_v2 }
 0xb98   :  { %1442 = vmatpush.msrb.mxu0 %v2850_v53  ;;  %1464 = vmatpush.msra.mxu1 %v2875_v4 }
 0xb9a   :  { %1443 = vmatpush.msrb.mxu0 %v2860_v1 }
 0xb9c   :  { %1444 = vmatpush.msrb.mxu0 %v2870_v3 }
 0xbc5   :  { %v933_v5 = vpop.permute.xlu2 %932 }
 0xbc6   :  { %935 = vst.msk [vmem:[#allocation3 + $0x8] sm:$0xc0] %vm608_vm1, %v933_v5 }
 0xbc7   :  { %936 = vst.msk [vmem:[#allocation3 - $0x6] sm:$0xc0] %vm610_vm10, %v933_v5 }
 0xbc8   :  { %937 = vst.msk [vmem:[#allocation3 - $0x6] sm:$0xc0] %vm612_vm11, %v2778_v60 }
 0xbc9   :  { %938 = vst.msk [vmem:[#allocation3 + $0x8] sm:$0xc0] %vm614_vm14, %v2778_v60 }
 0xbcf   :  { %v939_v0 = vld [vmem:[#allocation3] sm:$0xff] }
 0xbd0   :  { %1094 = vmatmul.f32.vlgmr.msra.gmra.mxu2 %v939_v0  ;;  %1117 = vmatmul.f32.vlgmr.msrb.gmra.mxu3 %v939_v0  ;;  %v940_v60 = vld [vmem:[#allocation3 + $0x8] sm:$0xff] }
 0xbd1   :  { %1518 = vmatpush.msra.mxu2 %v2805_v36  ;;  %1538 = vmatpush.msrb.mxu3 %v2809_v26 }
 0xbd3   :  { %1519 = vmatpush.msra.mxu2 %v2812_v27  ;;  %1539 = vmatpush.msrb.mxu3 %v2817_v38 }
 0xbd5   :  { %1520 = vmatpush.msra.mxu2 %v2820_v41  ;;  %1540 = vmatpush.msrb.mxu3 %v2825_v46 }
 0xbd7   :  { %1521 = vmatpush.msra.mxu2 %v2830_v50  ;;  %1541 = vmatpush.msrb.mxu3 %v2835_v54 }
 0xbd8   :  { %1097 = vmatmul.f32.gmra.mxu2 %v940_v60  ;;  %1120 = vmatmul.f32.gmra.mxu3 %v940_v60 }
 0xbd9   :  { %1522 = vmatpush.msra.mxu2 %v2844_v52  ;;  %1542 = vmatpush.msrb.mxu3 %v2847_v21 }
 0xbdb   :  { %1523 = vmatpush.msra.mxu2 %v2850_v53  ;;  %1543 = vmatpush.msrb.mxu3 %v2855_v20 }
 0xbdd   :  { %1524 = vmatpush.msra.mxu2 %v2860_v1  ;;  %1544 = vmatpush.msrb.mxu3 %v2865_v2 }
 0xbdf   :  { %1525 = vmatpush.msra.mxu2 %v2870_v3  ;;  %1545 = vmatpush.msrb.mxu3 %v2875_v4 }
 0xbf5   :  { %v1235_v17 = vpop.f32.mrf.mxu1 }
 0xbf9   :  { %v1215_v13 = vpop.f32.mrf.mxu0 }
 0xc53   :  { %v1095_v10 = vpop.f32.mrf.mxu2  ;;  %v1118_v9 = vpop.f32.mrf.mxu3 }
 0xc54   :  { %v1096_v11 = vadd.f32 %v1095_v10, %v942_v7  ;;  %v1119_v12 = vadd.f32 %v1118_v9, %v943_v8 }
 0xc56   :  { %1124 = vst [vmem:[#allocation2 + $0x10] sm:$0xff] %v1096_v11 }
 0xc57   :  { %1125 = vst [vmem:[#allocation2] sm:$0xff] %v1119_v12 }
 0xc5b   :  { %v1098_v40 = vpop.f32.mrf.mxu2  ;;  %v1121_v14 = vpop.f32.mrf.mxu3 }
 0xc5c   :  { %v1099_v15 = vadd.f32 %v1098_v40, %v942_v7  ;;  %v1122_v16 = vadd.f32 %v1121_v14, %v943_v8 }
 0xc5d   :  { %v1128_v22 = vld [vmem:[#allocation2 + $0x10] sm:$0x3]  ;;  %v1263_v51 = vld [vmem:[#allocation2 + $0x10] sm:$0xc] }
 0xc5e   :  { %1126 = vst [vmem:[#allocation2 + $0x18] sm:$0xff] %v1099_v15  ;;  %v1238_v23 = vadd.f32 %v1215_v13, %v1128_v22  ;;  %v1129_v24 = vld [vmem:[#allocation2] sm:$0x3]  ;;  %v1264_v63 = vld [vmem:[#allocation2] sm:$0xc] }
 0xc5f   :  { %1127 = vst [vmem:[#allocation2 + $0x8] sm:$0xff] %v1122_v16  ;;  %v1239_v25 = vadd.f32 %v1235_v17, %v1129_v24  ;;  %v1341_v17 = vld [vmem:[#allocation2 + $0x10] sm:$0x30]  ;;  %v1342_v22 = vld [vmem:[#allocation2] sm:$0x30] }
 0xc60   :  { %2298 = vtanh.f32 %v1238_v23 }
 0xc61   :  { %2300 = vtanh.f32 %v1239_v25 }
 0xc66   :  { %v2299_v28 = vpop.eup %2298 }
 0xc67   :  { %v2301_v29 = vpop.eup %2300  ;;  %v1242_v30 = vmul.f32 0.5, %v2299_v28 }
 0xc68   :  { %v1243_v31 = vmul.f32 0.5, %v2301_v29 }
 0xc69   :  { %v1244_v37 = vadd.f32 0.5, %v1242_v30 }
 0xc6a   :  { %v1245_v39 = vadd.f32 0.5, %v1243_v31 }
 0xc6b   :  { %v1248_v19 = vmul.f32 0.0, %v1244_v37 }
 0xc6c   :  { %v1247_v42 = vsel %vm52_vm2, %v2301_v29, %v1245_v39 }
 0xc6d   :  { %v1249_v43 = vmul.f32 %v1247_v42, %v1244_v37 }
 0xc6f   :  { %1251 = vrot.lane.b32.xlu0 %v1249_v43, %s2427_s28 }
 0xce1   :  { %v1252_v32 = vpop.permute.xlu0 %1251 }
 0xce2   :  { %v1254_v33 = vadd.f32 %v1252_v32, %v1248_v19 }
 0xce4   :  { %2302 = vtanh.f32 %v1254_v33  ;;  %v1324_v59 = vrot.slane %v1254_v33, 6 }
 0xcea   :  { %v2303_v56 = vpop.eup %2302 }
 0xceb   :  { %v1256_v34 = vmul.f32 %v2303_v56, %v1247_v42 }
 0xced   :  { %1258 = vrot.lane.b32.xlu1 %v1256_v34, %s2427_s28 }
 0xd5f   :  { %v1259_v58 = vpop.permute.xlu1 %1258 }
 0xd60   :  { %1261 = vst.msk [vmem:[#allocation4] sm:$0x3] %vm350_vm3, %v1259_v58  ;;  %2214 = vmatmul.msk.f32.vlgmr.msra.gmra.mxu0 %vm279_vm4, %v1259_v58  ;;  %2215 = vmatmul.msk.f32.vlgmr.msrb.gmra.mxu1 %vm279_vm4, %v1259_v58 }
 0xd61   :  { %1262 = vst.msk [vmem:[#allocation4 + $0xe] sm:$0x3] %vm352_vm5, %v1259_v58  ;;  %1590 = vmatpush.msra.mxu0 %v2805_v36  ;;  %1610 = vmatpush.msrb.mxu1 %v2809_v26 }
 0xd63   :  { %1591 = vmatpush.msra.mxu0 %v2812_v27  ;;  %1611 = vmatpush.msrb.mxu1 %v2817_v38 }
 0xd65   :  { %1592 = vmatpush.msra.mxu0 %v2820_v41  ;;  %1612 = vmatpush.msrb.mxu1 %v2825_v46 }
 0xd67   :  { %1593 = vmatpush.msra.mxu0 %v2830_v50  ;;  %1613 = vmatpush.msrb.mxu1 %v2835_v54 }
 0xd69   :  { %1594 = vmatpush.msra.mxu0 %v2844_v52  ;;  %1614 = vmatpush.msrb.mxu1 %v2847_v21 }
 0xd6b   :  { %1595 = vmatpush.msra.mxu0 %v2850_v53  ;;  %1615 = vmatpush.msrb.mxu1 %v2855_v20 }
 0xd6d   :  { %1596 = vmatpush.msra.mxu0 %v2860_v1  ;;  %1616 = vmatpush.msrb.mxu1 %v2865_v2 }
 0xd6f   :  { %1597 = vmatpush.msra.mxu0 %v2870_v3  ;;  %1617 = vmatpush.msrb.mxu1 %v2875_v4 }
 0xddd   :  { %v1284_v35 = vpop.f32.mrf.mxu0  ;;  %v1304_v61 = vpop.f32.mrf.mxu1 }
 0xdde   :  { %v1309_v44 = vrot.slane %v1284_v35, 6  ;;  %v1310_v62 = vrot.slane %v1304_v61, 6 }
 0xde0   :  { %v1313_v45 = vadd.f32 %v1309_v44, %v1263_v51  ;;  %v1314_v47 = vadd.f32 %v1310_v62, %v1264_v63 }
 0xde2   :  { %2304 = vtanh.f32 %v1313_v45 }
 0xde3   :  { %2306 = vtanh.f32 %v1314_v47 }
 0xde8   :  { %v2305_v48 = vpop.eup %2304 }
 0xde9   :  { %v2307_v49 = vpop.eup %2306  ;;  %v1317_v55 = vmul.f32 0.5, %v2305_v48 }
 0xdea   :  { %v1318_v57 = vmul.f32 0.5, %v2307_v49 }
 0xdeb   :  { %v1319_v5 = vadd.f32 0.5, %v1317_v55 }
 0xdec   :  { %v1320_v0 = vadd.f32 0.5, %v1318_v57  ;;  %v1504_v57 = vld [vmem:[#allocation2 + $0x8] sm:$0x3] }
 0xded   :  { %v1326_v60 = vmul.f32 %v1324_v59, %v1319_v5 }
 0xdee   :  { %v1322_v6 = vsel %vm52_vm2, %v2307_v49, %v1320_v0  ;;  %v1503_v49 = vld [vmem:[#allocation2 + $0x18] sm:$0x3] }
 0xdef   :  { %v1327_v7 = vmul.f32 %v1322_v6, %v1319_v5 }
 0xdf1   :  { %1329 = vrot.lane.b32.xlu2 %v1327_v7, %s2427_s28 }
 0xe4b   :  { %v1330_v8 = vpop.permute.xlu2 %1329 }
 0xe4c   :  { %v1332_v10 = vadd.f32 %v1330_v8, %v1326_v60 }
 0xe4e   :  { %2308 = vtanh.f32 %v1332_v10  ;;  %v1405_v31 = vrot.slane %v1332_v10, 6 }
 0xe54   :  { %v2309_v9 = vpop.eup %2308 }
 0xe55   :  { %v2967_v11 = vmul.f32 %v2309_v9, %v1322_v6 }
 0xe57   :  { %v1343_v12 = vrot.slane %v2967_v11, 2 }
 0xe59   :  { %1344 = vrot.lane.b32.xlu0 %v1343_v12, %s2427_s28 }
 0xecb   :  { %v1345_v13 = vpop.permute.xlu0 %1344 }
 0xecc   :  { %2216 = vmatmul.msk.f32.vlgmr.msrb.gmra.mxu2 %vm279_vm4, %v1345_v13  ;;  %2217 = vmatmul.msk.f32.vlgmr.msra.gmra.mxu3 %vm279_vm4, %v1345_v13 }
 0xecd   :  { %1671 = vmatpush.msrb.mxu2 %v2805_v36  ;;  %1691 = vmatpush.msra.mxu3 %v2809_v26 }
 0xecf   :  { %1672 = vmatpush.msrb.mxu2 %v2812_v27  ;;  %1692 = vmatpush.msra.mxu3 %v2817_v38 }
 0xed1   :  { %1673 = vmatpush.msrb.mxu2 %v2820_v41  ;;  %1693 = vmatpush.msra.mxu3 %v2825_v46 }
 0xed3   :  { %1674 = vmatpush.msrb.mxu2 %v2830_v50  ;;  %1694 = vmatpush.msra.mxu3 %v2835_v54 }
 0xed5   :  { %1675 = vmatpush.msrb.mxu2 %v2844_v52  ;;  %1695 = vmatpush.msra.mxu3 %v2847_v21 }
 0xed7   :  { %1676 = vmatpush.msrb.mxu2 %v2850_v53  ;;  %1696 = vmatpush.msra.mxu3 %v2855_v20 }
 0xed9   :  { %1677 = vmatpush.msrb.mxu2 %v2860_v1  ;;  %1697 = vmatpush.msra.mxu3 %v2865_v2 }
 0xedb   :  { %1678 = vmatpush.msrb.mxu2 %v2870_v3  ;;  %1698 = vmatpush.msra.mxu3 %v2875_v4 }
 0xf4f   :  { %v1365_v40 = vpop.f32.mrf.mxu2  ;;  %v1385_v14 = vpop.f32.mrf.mxu3 }
 0xf50   :  { %v1390_v15 = vrot.slane %v1365_v40, 4  ;;  %v1391_v16 = vrot.slane %v1385_v14, 4 }
 0xf52   :  { %v1394_v23 = vadd.f32 %v1390_v15, %v1341_v17  ;;  %v1395_v24 = vadd.f32 %v1391_v16, %v1342_v22 }
 0xf54   :  { %2310 = vtanh.f32 %v1394_v23 }
 0xf55   :  { %2312 = vtanh.f32 %v1395_v24 }
 0xf5a   :  { %v2311_v25 = vpop.eup %2310 }
 0xf5b   :  { %v2313_v28 = vpop.eup %2312  ;;  %v1398_v29 = vmul.f32 0.5, %v2311_v25 }
 0xf5c   :  { %v1399_v30 = vmul.f32 0.5, %v2313_v28 }
 0xf5d   :  { %v1400_v37 = vadd.f32 0.5, %v1398_v29 }
 0xf5e   :  { %v1401_v39 = vadd.f32 0.5, %v1399_v30  ;;  %v1578_v30 = vld [vmem:[#allocation2 + $0x18] sm:$0xc] }
 0xf5f   :  { %v1407_v42 = vmul.f32 %v1405_v31, %v1400_v37  ;;  %v1579_v31 = vld [vmem:[#allocation2 + $0x8] sm:$0xc] }
 0xf60   :  { %v1403_v43 = vsel %vm52_vm2, %v2313_v28, %v1401_v39 }
 0xf61   :  { %v1408_v19 = vmul.f32 %v1403_v43, %v1400_v37 }
 0xf63   :  { %1410 = vrot.lane.b32.xlu1 %v1408_v19, %s2427_s28 }
 0xfd5   :  { %v1411_v32 = vpop.permute.xlu1 %1410 }
 0xfd6   :  { %v1413_v33 = vadd.f32 %v1411_v32, %v1407_v42 }
 0xfd8   :  { %2314 = vtanh.f32 %v1413_v33 }
 0xfde   :  { %v2315_v56 = vpop.eup %2314 }
 0xfdf   :  { %v2992_v34 = vmul.f32 %v2315_v56, %v1403_v43 }
 0xfe1   :  { %v1424_v58 = vrot.slane %v2992_v34, 4 }
 0xfe3   :  { %1425 = vrot.lane.b32.xlu2 %v1424_v58, %s2427_s28 }
0x103d   :  { %v1426_v35 = vpop.permute.xlu2 %1425 }
0x103e   :  { %2218 = vmatmul.msk.f32.vlgmr.msrb.gmra.mxu0 %vm279_vm4, %v1426_v35  ;;  %2219 = vmatmul.msk.f32.vlgmr.msra.gmra.mxu1 %vm279_vm4, %v1426_v35 }
0x103f   :  { %1752 = vmatpush.msrb.mxu0 %v2805_v36  ;;  %1772 = vmatpush.msra.mxu1 %v2809_v26 }
0x1041   :  { %1753 = vmatpush.msrb.mxu0 %v2812_v27  ;;  %1773 = vmatpush.msra.mxu1 %v2817_v38 }
0x1043   :  { %1754 = vmatpush.msrb.mxu0 %v2820_v41  ;;  %1774 = vmatpush.msra.mxu1 %v2825_v46  ;;  %v1422_v41 = vld [vmem:[#allocation2 + $0x10] sm:$0xc0]  ;;  %v1423_v46 = vld [vmem:[#allocation2] sm:$0xc0] }
0x1045   :  { %1755 = vmatpush.msrb.mxu0 %v2830_v50  ;;  %1775 = vmatpush.msra.mxu1 %v2835_v54 }
0x1047   :  { %1756 = vmatpush.msrb.mxu0 %v2844_v52  ;;  %1776 = vmatpush.msra.mxu1 %v2847_v21 }
0x1049   :  { %1757 = vmatpush.msrb.mxu0 %v2850_v53  ;;  %1777 = vmatpush.msra.mxu1 %v2855_v20 }
0x104b   :  { %1758 = vmatpush.msrb.mxu0 %v2860_v1  ;;  %1778 = vmatpush.msra.mxu1 %v2865_v2  ;;  %v1486_v1 = vrot.slane %v1413_v33, 6 }
0x104d   :  { %1759 = vmatpush.msrb.mxu0 %v2870_v3  ;;  %1779 = vmatpush.msra.mxu1 %v2875_v4 }
0x10bb   :  { %v1446_v36 = vpop.f32.mrf.mxu0  ;;  %v1466_v26 = vpop.f32.mrf.mxu1 }
0x10bc   :  { %v1471_v27 = vrot.slane %v1446_v36, 2  ;;  %v1472_v38 = vrot.slane %v1466_v26, 2 }
0x10be   :  { %v1475_v50 = vadd.f32 %v1471_v27, %v1422_v41  ;;  %v1476_v54 = vadd.f32 %v1472_v38, %v1423_v46 }
0x10c0   :  { %2316 = vtanh.f32 %v1475_v50 }
0x10c1   :  { %2318 = vtanh.f32 %v1476_v54 }
0x10c6   :  { %v2317_v52 = vpop.eup %2316 }
0x10c7   :  { %v2319_v21 = vpop.eup %2318  ;;  %v1479_v53 = vmul.f32 0.5, %v2317_v52 }
0x10c8   :  { %v1480_v20 = vmul.f32 0.5, %v2319_v21 }
0x10c9   :  { %v1481_v2 = vadd.f32 0.5, %v1479_v53 }
0x10ca   :  { %v1482_v61 = vadd.f32 0.5, %v1480_v20 }
0x10cb   :  { %v1488_v3 = vmul.f32 %v1486_v1, %v1481_v2  ;;  %v1656_v1 = vld [vmem:[#allocation2 + $0x18] sm:$0x30] }
0x10cc   :  { %v1484_v4 = vsel %vm52_vm2, %v2319_v21, %v1482_v61 }
0x10cd   :  { %v1489_v44 = vmul.f32 %v1484_v4, %v1481_v2  ;;  %v1657_v2 = vld [vmem:[#allocation2 + $0x8] sm:$0x30] }
0x10cf   :  { %1491 = vrot.lane.b32.xlu0 %v1489_v44, %s2427_s28 }
0x1141   :  { %v1492_v62 = vpop.permute.xlu0 %1491 }
0x1142   :  { %v1494_v51 = vadd.f32 %v1492_v62, %v1488_v3 }
0x1144   :  { %2320 = vtanh.f32 %v1494_v51  ;;  %v1561_v10 = vrot.slane %v1494_v51, 6 }
0x114a   :  { %v2321_v63 = vpop.eup %2320 }
0x114b   :  { %v3017_v45 = vmul.f32 %v2321_v63, %v1484_v4 }
0x114d   :  { %v1505_v47 = vrot.slane %v3017_v45, 6 }
0x114f   :  { %1506 = vrot.lane.b32.xlu1 %v1505_v47, %s2427_s28 }
0x11c1   :  { %v1507_v48 = vpop.permute.xlu1 %1506 }
0x11c2   :  { %2220 = vmatmul.msk.f32.vlgmr.msra.gmra.mxu2 %vm279_vm4, %v1507_v48  ;;  %2221 = vmatmul.msk.f32.vlgmr.msrb.gmra.mxu3 %vm279_vm4, %v1507_v48 }
0x1245   :  { %v1527_v55 = vpop.f32.mrf.mxu2  ;;  %v1547_v59 = vpop.f32.mrf.mxu3 }
0x1246   :  { %v1550_v5 = vadd.f32 %v1527_v55, %v1503_v49  ;;  %v1551_v0 = vadd.f32 %v1547_v59, %v1504_v57 }
0x1248   :  { %2322 = vtanh.f32 %v1550_v5 }
0x1249   :  { %2324 = vtanh.f32 %v1551_v0 }
0x124e   :  { %v2323_v60 = vpop.eup %2322 }
0x124f   :  { %v2325_v6 = vpop.eup %2324  ;;  %v1554_v7 = vmul.f32 0.5, %v2323_v60 }
0x1250   :  { %v1555_v8 = vmul.f32 0.5, %v2325_v6 }
0x1251   :  { %v1556_v9 = vadd.f32 0.5, %v1554_v7 }
0x1252   :  { %v1557_v12 = vadd.f32 0.5, %v1555_v8 }
0x1253   :  { %v1563_v13 = vmul.f32 %v1561_v10, %v1556_v9 }
0x1254   :  { %v1559_v40 = vsel %vm52_vm2, %v2325_v6, %v1557_v12 }
0x1255   :  { %v1564_v14 = vmul.f32 %v1559_v40, %v1556_v9 }
0x1257   :  { %1566 = vrot.lane.b32.xlu2 %v1564_v14, %s2427_s28  ;;  %v1737_v14 = vld [vmem:[#allocation2 + $0x18] sm:$0xc0] }
0x12b1   :  { %v1567_v15 = vpop.permute.xlu2 %1566 }
0x12b2   :  { %v1569_v16 = vadd.f32 %v1567_v15, %v1563_v13  ;;  %v1738_v15 = vld [vmem:[#allocation2 + $0x8] sm:$0xc0] }
0x12b4   :  { %2326 = vtanh.f32 %v1569_v16  ;;  %v1639_v33 = vrot.slane %v1569_v16, 6 }
0x12ba   :  { %v2327_v17 = vpop.eup %2326 }
0x12bb   :  { %v1571_v22 = vmul.f32 %v2327_v17, %v1559_v40 }
0x12bd   :  { %1573 = vrot.lane.b32.xlu0 %v1571_v22, %s2427_s28 }
0x132f   :  { %v3027_v23 = vpop.permute.xlu0 %1573 }
0x1330   :  { %2222 = vmatmul.msk.f32.vlgmr.msra.gmra.mxu0 %vm279_vm4, %v3027_v23  ;;  %2223 = vmatmul.msk.f32.vlgmr.msrb.gmra.mxu1 %vm279_vm4, %v3027_v23 }
0x13ad   :  { %v1599_v24 = vpop.f32.mrf.mxu0  ;;  %v1619_v25 = vpop.f32.mrf.mxu1 }
0x13ae   :  { %v1624_v28 = vrot.slane %v1599_v24, 6  ;;  %v1625_v29 = vrot.slane %v1619_v25, 6 }
0x13b0   :  { %v1628_v37 = vadd.f32 %v1624_v28, %v1578_v30  ;;  %v1629_v39 = vadd.f32 %v1625_v29, %v1579_v31 }
0x13b2   :  { %2328 = vtanh.f32 %v1628_v37 }
0x13b3   :  { %2330 = vtanh.f32 %v1629_v39 }
0x13b8   :  { %v2329_v42 = vpop.eup %2328 }
0x13b9   :  { %v2331_v43 = vpop.eup %2330  ;;  %v1632_v19 = vmul.f32 0.5, %v2329_v42 }
0x13ba   :  { %v1633_v32 = vmul.f32 0.5, %v2331_v43 }
0x13bb   :  { %v1634_v56 = vadd.f32 0.5, %v1632_v19  ;;  %v1826_v19 = vld [vmem:[#allocation7 + $0xf4] sm:$0xff] }
0x13bc   :  { %v1635_v58 = vadd.f32 0.5, %v1633_v32  ;;  %v1825_v32 = vld [vmem:[#allocation7 + $0xec] sm:$0xff] }
0x13bd   :  { %v1641_v35 = vmul.f32 %v1639_v33, %v1634_v56  ;;  %v1824_v33 = vld [vmem:[#allocation7 + $0xe4] sm:$0xff] }
0x13be   :  { %v1637_v36 = vsel %vm52_vm2, %v2331_v43, %v1635_v58  ;;  %v1827_v43 = vld [vmem:[#allocation7 + $0xfc] sm:$0xff] }
0x13bf   :  { %v1642_v26 = vmul.f32 %v1637_v36, %v1634_v56  ;;  %1844 = vmatpush.msra.mxu2 %v1827_v43 }
0x13c1   :  { %1644 = vrot.lane.b32.xlu1 %v1642_v26, %s2427_s28  ;;  %1845 = vmatpush.msra.mxu2 %v1826_v19  ;;  %v1822_v26 = vld [vmem:[#allocation7 + $0xd4] sm:$0xff] }
0x13c3   :  { %1846 = vmatpush.msra.mxu2 %v1825_v32 }
0x13c5   :  { %1847 = vmatpush.msra.mxu2 %v1824_v33 }
0x1433   :  { %v1645_v27 = vpop.permute.xlu1 %1644 }
0x1434   :  { %v1647_v38 = vadd.f32 %v1645_v27, %v1641_v35  ;;  %v1821_v27 = vld [vmem:[#allocation7 + $0xcc] sm:$0xff] }
0x1436   :  { %2332 = vtanh.f32 %v1647_v38  ;;  %v1720_v63 = vrot.slane %v1647_v38, 6  ;;  %v1820_v38 = vld [vmem:[#allocation7 + $0xc4] sm:$0xff] }
0x143c   :  { %v2333_v41 = vpop.eup %2332 }
0x143d   :  { %v1649_v46 = vmul.f32 %v2333_v41, %v1637_v36  ;;  %v2246_v41 = vld [vmem:[#allocation7 + $0x1] ss:$0 sm:$0xff] }
0x143f   :  { %v1658_v50 = vrot.slane %v1649_v46, 2 }
0x1441   :  { %1659 = vrot.lane.b32.xlu2 %v1658_v50, %s2427_s28 }
0x149b   :  { %v1660_v54 = vpop.permute.xlu2 %1659 }
0x149c   :  { %2224 = vmatmul.msk.f32.vlgmr.msrb.gmra.mxu2 %vm279_vm4, %v1660_v54  ;;  %2225 = vmatmul.msk.f32.vlgmr.msra.gmra.mxu3 %vm279_vm4, %v1660_v54 }
0x151f   :  { %v1680_v52 = vpop.f32.mrf.mxu2  ;;  %v1700_v21 = vpop.f32.mrf.mxu3 }
0x1520   :  { %v1705_v53 = vrot.slane %v1680_v52, 4  ;;  %v1706_v20 = vrot.slane %v1700_v21, 4 }
0x1522   :  { %v1709_v61 = vadd.f32 %v1705_v53, %v1656_v1  ;;  %v1710_v3 = vadd.f32 %v1706_v20, %v1657_v2 }
0x1524   :  { %2334 = vtanh.f32 %v1709_v61 }
0x1525   :  { %2336 = vtanh.f32 %v1710_v3 }
0x152a   :  { %v2335_v4 = vpop.eup %2334 }
0x152b   :  { %v2337_v44 = vpop.eup %2336  ;;  %v1713_v62 = vmul.f32 0.5, %v2335_v4 }
0x152c   :  { %v1714_v51 = vmul.f32 0.5, %v2337_v44 }
0x152d   :  { %v1715_v47 = vadd.f32 0.5, %v1713_v62  ;;  %v2428_v62 = vmov 0  }
0x152e   :  { %v1716_v48 = vadd.f32 0.5, %v1714_v51  ;;  %2245 = vset.pattern.permute.xlu1 %v2428_v62  ;;  %2243 = vset.pattern.permute.xlu0 %v2428_v62 }
0x152f   :  { %v1722_v49 = vmul.f32 %v1720_v63, %v1715_v47  ;;  %2244 = vset.pattern.permute.xlu2 %v2428_v62  ;;  %v2044_v62 = vld [vmem:[#allocation7 + $0x24] sm:$0xff] }
0x1530   :  { %v1718_v55 = vsel %vm52_vm2, %v2337_v44, %v1716_v48 }
0x1531   :  { %v1723_v57 = vmul.f32 %v1718_v55, %v1715_v47 }
0x1533   :  { %1725 = vrot.lane.b32.xlu0 %v1723_v57, %s2427_s28 }
0x153b   :  { %1336 = vrot.lane.b32.xlu0 %v2967_v11, %s2427_s28 }
0x1543   :  { %1651 = vrot.lane.b32.xlu0 %v1649_v46, %s2427_s28 }
0x154b   :  { %1862 = vrot.lane.b32.xlu0 %v2246_v41, %s2427_s28 }
0x15a5   :  { %v1726_v59 = vpop.permute.xlu0 %1725 }
0x15a6   :  { %v1728_v5 = vadd.f32 %v1726_v59, %v1722_v49 }
0x15a8   :  { %2338 = vtanh.f32 %v1728_v5  ;;  %v1801_v29 = vrot.slane %v1728_v5, 6 }
0x15ad   :  { %v1337_v0 = vpop.permute.xlu0 %1336 }
0x15ae   :  { %v2339_v60 = vpop.eup %2338  ;;  %1339 = vst.msk [vmem:[#allocation4] sm:$0xc] %vm434_vm8, %v1337_v0 }
0x15af   :  { %1340 = vst.msk [vmem:[#allocation4 + $0xa] sm:$0xc] %vm436_vm9, %v1337_v0  ;;  %v1730_v6 = vmul.f32 %v2339_v60, %v1718_v55 }
0x15b1   :  { %v1739_v7 = vrot.slane %v1730_v6, 4 }
0x15b3   :  { %1740 = vrot.lane.b32.xlu1 %v1739_v7, %s2427_s28 }
0x15b5   :  { %v1652_v10 = vpop.permute.xlu0 %1651 }
0x15bb   :  { %1417 = vrot.lane.b32.xlu1 %v2992_v34, %s2427_s28 }
0x15bd   :  { %v1863_v21 = vpop.permute.xlu0 %1862 }
0x15c3   :  { %1732 = vrot.lane.b32.xlu1 %v1730_v6, %s2427_s28 }
0x1625   :  { %v1741_v11 = vpop.permute.xlu1 %1740 }
0x1626   :  { %2226 = vmatmul.msk.f32.vlgmr.msrb.gmra.mxu0 %vm279_vm4, %v1741_v11  ;;  %2227 = vmatmul.msk.f32.vlgmr.msra.gmra.mxu1 %vm279_vm4, %v1741_v11 }
0x162d   :  { %v1418_v8 = vpop.permute.xlu1 %1417 }
0x162e   :  { %1420 = vst.msk [vmem:[#allocation4] sm:$0x30] %vm521_vm12, %v1418_v8 }
0x162f   :  { %1421 = vst.msk [vmem:[#allocation4 + $0x6] sm:$0x30] %vm523_vm13, %v1418_v8 }
0x1630   :  { %1654 = vst.msk [vmem:[#allocation4 + $0x8] sm:$0xc] %vm434_vm8, %v1652_v10  ;;  %vm2131_vm8 = vcmask 261120  }
0x1631   :  { %1655 = vst.msk [vmem:[#allocation4 + $0x2] sm:$0xc] %vm436_vm9, %v1652_v10  ;;  %vm2188_vm9 = vcmask 1024  }
0x1635   :  { %v1733_v9 = vpop.permute.xlu1 %1732 }
0x1636   :  { %1735 = vst.msk [vmem:[#allocation4 + $0x8] sm:$0x30] %vm521_vm12, %v1733_v9 }
0x1637   :  { %1736 = vst.msk [vmem:[#allocation4 - $0x2] sm:$0x30] %vm523_vm13, %v1733_v9 }
0x16a3   :  { %v1761_v34 = vpop.f32.mrf.mxu0  ;;  %v1781_v12 = vpop.f32.mrf.mxu1 }
0x16a4   :  { %v1786_v13 = vrot.slane %v1761_v34, 2  ;;  %v1787_v40 = vrot.slane %v1781_v12, 2 }
0x16a6   :  { %v1790_v16 = vadd.f32 %v1786_v13, %v1737_v14  ;;  %v1791_v17 = vadd.f32 %v1787_v40, %v1738_v15 }
0x16a8   :  { %2340 = vtanh.f32 %v1790_v16 }
0x16a9   :  { %2342 = vtanh.f32 %v1791_v17 }
0x16ae   :  { %v2341_v22 = vpop.eup %2340 }
0x16af   :  { %v2343_v24 = vpop.eup %2342  ;;  %v1794_v25 = vmul.f32 0.5, %v2341_v22 }
0x16b0   :  { %v1795_v28 = vmul.f32 0.5, %v2343_v24 }
0x16b1   :  { %v1796_v30 = vadd.f32 0.5, %v1794_v25 }
0x16b2   :  { %v1797_v31 = vadd.f32 0.5, %v1795_v28 }
0x16b3   :  { %v1803_v37 = vmul.f32 %v1801_v29, %v1796_v30 }
0x16b4   :  { %v1799_v39 = vsel %vm52_vm2, %v2343_v24, %v1797_v31  ;;  %vm2102_vm2 = vcmask 31744  }
0x16b5   :  { %v1804_v42 = vmul.f32 %v1799_v39, %v1796_v30 }
0x16b7   :  { %1806 = vrot.lane.b32.xlu2 %v1804_v42, %s2427_s28 }
0x16bf   :  { %1498 = vrot.lane.b32.xlu2 %v3017_v45, %s2427_s28  ;;  %v1823_v45 = vld [vmem:[#allocation7 + $0xdc] sm:$0xff] }
0x16c0   :  { %1848 = vmatpush.msra.mxu2 %v1823_v45 }
0x16c2   :  { %1849 = vmatpush.msra.mxu2 %v1822_v26 }
0x16c4   :  { %1850 = vmatpush.msra.mxu2 %v1821_v27 }
0x16c6   :  { %1851 = vmatpush.msra.mxu2 %v1820_v38 }
0x1711   :  { %v1807_v56 = vpop.permute.xlu2 %1806 }
0x1712   :  { %v1809_v58 = vadd.f32 %v1807_v56, %v1803_v37 }
0x1714   :  { %2344 = vtanh.f32 %v1809_v58 }
0x1719   :  { %v1499_v35 = vpop.permute.xlu2 %1498 }
0x171a   :  { %v2345_v18 = vpop.eup %2344  ;;  %1501 = vst.msk [vmem:[#allocation4] sm:$0xc0] %vm608_vm1, %v1499_v35 }
0x171b   :  { %1502 = vst.msk [vmem:[#allocation4 + $0x2] sm:$0xc0] %vm610_vm10, %v1499_v35  ;;  %v1811_v36 = vmul.f32 %v2345_v18, %v1799_v39 }
0x171c   :  { %1576 = vst.msk [vmem:[#allocation4 + $0x8] sm:$0x3] %vm350_vm3, %v3027_v23 }
0x171d   :  { %1577 = vst.msk [vmem:[#allocation4 + $0x6] sm:$0x3] %vm352_vm5, %v3027_v23  ;;  %1813 = vrot.lane.b32.xlu2 %v1811_v36, %s2427_s28 }
0x1777   :  { %v1814_v46 = vpop.permute.xlu2 %1813 }
0x1778   :  { %1816 = vst.msk [vmem:[#allocation4 + $0x8] sm:$0xc0] %vm608_vm1, %v1814_v46 }
0x1779   :  { %1817 = vst.msk [vmem:[#allocation4 - $0x6] sm:$0xc0] %vm610_vm10, %v1814_v46 }
0x177f   :  { %v3078_v23 = vld [vmem:[#allocation4 + $0x8] sm:$0xff] }
0x1780   :  { %v3074_v50 = vld [vmem:[#allocation4] sm:$0xff] }
0x1781   :  { %2228 = vmatmul.msk.f32.vlgmr.msra.gmra.mxu2 %vm279_vm4, %v3074_v50 }
0x1789   :  { %2229 = vmatmul.msk.f32.gmra.mxu2 %vm279_vm4, %v3078_v23 }
0x1804   :  { %v1853_v54 = vpop.f32.mrf.mxu2 }
0x1805   :  { %v1854_v52 = vadd.f32 %v2246_v41, %v1853_v54 }
0x1807   :  { %2346 = vtanh.f32 %v1854_v52 }
0x180c   :  { %v1856_v53 = vpop.f32.mrf.mxu2 }
0x180d   :  { %v2347_v20 = vpop.eup %2346  ;;  %v1857_v1 = vadd.f32 %v2246_v41, %v1856_v53 }
0x180e   :  { %v1865_v2 = vmul.f32 %v2347_v20, %v1863_v21 }
0x180f   :  { %2348 = vtanh.f32 %v1857_v1 }
0x1810   :  { %v1867_v61 = vsel %vm279_vm4, %v1865_v2, 0.0 }
0x1811   :  { %1868 = vadd.xlane.f32.xlu1 %v1867_v61  ;;  %v2047_v61 = vld [vmem:[#allocation7 + $0x3c] sm:$0xff] }
0x1812   :  { %2084 = vmatpush.msrb.mxu3 %v2047_v61 }
0x1815   :  { %v2349_v3 = vpop.eup %2348 }
0x1816   :  { %v1866_v4 = vmul.f32 %v2349_v3, %v1863_v21  ;;  %v2046_v3 = vld [vmem:[#allocation7 + $0x34] sm:$0xff] }
0x1817   :  { %2085 = vmatpush.msrb.mxu3 %v2046_v3 }
0x1818   :  { %v1870_v44 = vsel %vm279_vm4, %v1866_v4, 0.0  ;;  %v2045_v4 = vld [vmem:[#allocation7 + $0x2c] sm:$0xff] }
0x1819   :  { %1871 = vadd.xlane.f32.xlu2 %v1870_v44  ;;  %2086 = vmatpush.msrb.mxu3 %v2045_v4  ;;  %v2053_v4 = vld [vmem:[#allocation7 + $0x54] sm:$0xff] }
0x181b   :  { %2087 = vmatpush.msrb.mxu3 %v2044_v62 }
0x1884   :  { %v1869_v51 = vpop.xlane.xlu1 %1868 }
0x1885   :  { %v1874_v63 = vrot.slane %v1869_v51, 2  ;;  %v1877_v48 = vrot.slane %v1869_v51, 4  ;;  %v1880_v55 = vrot.slane %v1869_v51, 6 }
0x1887   :  { %v1876_v47 = vmax.f32 %v1869_v51, %v1874_v63  ;;  %v2042_v63 = vld [vmem:[#allocation7 + $0x14] sm:$0xff] }
0x1889   :  { %v1879_v49 = vmax.f32 %v1876_v47, %v1877_v48  ;;  %v2041_v47 = vld [vmem:[#allocation7 + $0xc] sm:$0xff]  ;;  %v2049_v48 = vld [vmem:[#allocation7 + $0x124] sm:$0xf] }
0x188a   :  { %2231 = vmatpush.msk.msra.mxu0 %vm2106_vm0, %v2049_v48  ;;  %v2067_v48 = vld [vmem:[#allocation7 + $0x104] sm:$0xff] }
0x188b   :  { %v1882_v57 = vmax.f32 %v1879_v49, %v1880_v55  ;;  %v2040_v55 = vld [vmem:[#allocation7 + $0x4] sm:$0xff] }
0x188c   :  { %v1872_v59 = vpop.xlane.xlu2 %1871 }
0x188d   :  { %v1883_v5 = vmax.f32 %v1882_v57, %v1872_v59  ;;  %v1885_v0 = vrot.slane %v1872_v59, 2  ;;  %v1888_v6 = vrot.slane %v1872_v59, 4  ;;  %v1891_v11 = vrot.slane %v1872_v59, 6  ;;  %v2039_v57 = vld [vmem:[%s3105_s0 + $0xe] sm:$0x3] }
0x188e   :  { %2232 = vmatmul.msk.f32.vlgmr.msra.gmra.mxu0 %vm2102_vm2, %v2039_v57 }
0x188f   :  { %v1887_v60 = vmax.f32 %v1883_v5, %v1885_v0  ;;  %v2066_v5 = vld [vmem:[#allocation7 + $0xbc] sm:$0xff]  ;;  %v2065_v0 = vld [vmem:[#allocation7 + $0xb4] sm:$0xff] }
0x1890   :  { %2155 = vmatpush.msrb.mxu0 %v2066_v5 }
0x1891   :  { %v1890_v7 = vmax.f32 %v1887_v60, %v1888_v6  ;;  %v2064_v60 = vld [vmem:[#allocation7 + $0xac] sm:$0xff] }
0x1892   :  { %2156 = vmatpush.msrb.mxu0 %v2065_v0 }
0x1893   :  { %v1893_v8 = vmax.f32 %v1890_v7, %v1891_v11  ;;  %v2070_v7 = vld [vmem:[#allocation7 + $0x11c] sm:$0xff]  ;;  %v2063_v11 = vld [vmem:[#allocation7 + $0xa4] sm:$0xff] }
0x1894   :  { %2147 = vmatpush.msrb.mxu1 %v2070_v7  ;;  %2157 = vmatpush.msrb.mxu0 %v2064_v60 }
0x1895   :  { %v1960_v10 = vsub.f32 %v1872_v59, %v1893_v8  ;;  %v1894_v9 = vsub.f32 %v1869_v51, %v1893_v8  ;;  %v1942_v34 = vrot.slane %v1893_v8, 2  ;;  %v1906_v12 = vrot.slane %v1893_v8, 6 }
0x1896   :  { %v1924_v13 = vrot.slane %v1893_v8, 4  ;;  %v2069_v8 = vld [vmem:[#allocation7 + $0x114] sm:$0xff]  ;;  %2158 = vmatpush.msrb.mxu0 %v2063_v11 }
0x1897   :  { %v1961_v40 = vmul.f32 1.442695, %v1960_v10  ;;  %v1895_v14 = vmul.f32 1.442695, %v1894_v9  ;;  %v1944_v15 = vsub.f32 %v1869_v51, %v1942_v34  ;;  %v1908_v16 = vsub.f32 %v1869_v51, %v1906_v12  ;;  %2148 = vmatpush.msrb.mxu1 %v2069_v8  ;;  %v2249_v8 = vld [vmem:[#allocation7 + $0x3] ss:$0 sm:$0xff] }
0x1898   :  { %v1926_v17 = vsub.f32 %v1869_v51, %v1924_v13  ;;  %v1971_v39 = vsub.f32 %v1872_v59, %v1906_v12  ;;  %v1987_v32 = vsub.f32 %v1872_v59, %v1924_v13  ;;  %v2003_v35 = vsub.f32 %v1872_v59, %v1942_v34  ;;  %v2043_v51 = vld [vmem:[#allocation7 + $0x1c] sm:$0xff] }
0x1899   :  { %2350 = vpow2.f32 %v1961_v40  ;;  %v1945_v22 = vmul.f32 1.442695, %v1944_v15  ;;  %v1909_v24 = vmul.f32 1.442695, %v1908_v16  ;;  %2088 = vmatpush.msrb.mxu3 %v2043_v51  ;;  %v3087_v59 = vld [vmem:[#allocation7 + $0x2] ss:$0 sm:$0xff] }
0x189a   :  { %2352 = vpow2.f32 %v1895_v14  ;;  %v1927_v25 = vmul.f32 1.442695, %v1926_v17  ;;  %v1972_v19 = vmul.f32 1.442695, %v1971_v39  ;;  %v1988_v58 = vmul.f32 1.442695, %v1987_v32 }
0x189b   :  { %2354 = vpow2.f32 %v1945_v22  ;;  %v2004_v45 = vmul.f32 1.442695, %v2003_v35  ;;  %2089 = vmatpush.msrb.mxu3 %v2042_v63  ;;  %v2062_v34 = vld [vmem:[#allocation7 + $0x9c] sm:$0xff]  ;;  %v2061_v40 = vld [vmem:[#allocation7 + $0x94] sm:$0xff]  ;;  %v2060_v16 = vld [vmem:[#allocation7 + $0x8c] sm:$0xff] }
0x189c   :  { %2356 = vpow2.f32 %v1909_v24  ;;  %2159 = vmatpush.msrb.mxu0 %v2062_v34  ;;  %v2059_v24 = vld [vmem:[#allocation7 + $0x84] sm:$0xff] }
0x189d   :  { %2358 = vpow2.f32 %v1927_v25  ;;  %2090 = vmatpush.msrb.mxu3 %v2041_v47  ;;  %v2052_v47 = vld [vmem:[#allocation7 + $0x4c] sm:$0xff] }
0x189e   :  { %2360 = vpow2.f32 %v1972_v19  ;;  %2160 = vmatpush.msrb.mxu0 %v2061_v40  ;;  %v2057_v19 = vld [vmem:[#allocation7 + $0x74] sm:$0xff] }
0x189f   :  { %v2351_v28 = vpop.eup %2350  ;;  %2362 = vpow2.f32 %v1988_v58  ;;  %2091 = vmatpush.msrb.mxu3 %v2040_v55  ;;  %v2248_v55 = vld [vmem:[#allocation7] ss:$0 sm:$0xff] }
0x18a0   :  { %v2353_v29 = vpop.eup %2352  ;;  %1966 = vperm.xlu1 %2245, %v2351_v28   ;;  %2364 = vpow2.f32 %v2004_v45  ;;  %2161 = vmatpush.msrb.mxu0 %v2060_v16 }
0x18a1   :  { %v2355_v30 = vpop.eup %2354  ;;  %1900 = vperm.xlu0 %2243, %v2353_v29  }
0x18a2   :  { %v2357_v31 = vpop.eup %2356  ;;  %1952 = vperm.xlu2 %2244, %v2355_v30   ;;  %v1948_v18 = vrot.slane %v2355_v30, 6  ;;  %2162 = vmatpush.msrb.mxu0 %v2059_v24 }
0x18a3   :  { %v1912_v37 = vrot.slane %v2357_v31, 2  ;;  %v2359_v42 = vpop.eup %2358 }
0x18a4   :  { %v1930_v33 = vrot.slane %v2359_v42, 4  ;;  %v2361_v26 = vpop.eup %2360 }
0x18a5   :  { %v1914_v43 = vadd.f32 %v2353_v29, %v1912_v37  ;;  %v1975_v38 = vrot.slane %v2361_v26, 2  ;;  %v2363_v41 = vpop.eup %2362 }
0x18a6   :  { %v1991_v54 = vrot.slane %v2363_v41, 4  ;;  %v2365_v52 = vpop.eup %2364 }
0x18a7   :  { %v1932_v56 = vadd.f32 %v1930_v33, %v1914_v43  ;;  %v2007_v53 = vrot.slane %v2365_v52, 6 }
0x18a9   :  { %1916 = vperm.xlu0 %2243, %v2357_v31   ;;  %v1950_v36 = vadd.f32 %v1948_v18, %v1932_v56  ;;  %v2058_v31 = vld [vmem:[#allocation7 + $0x7c] sm:$0xff]  ;;  %v2056_v56 = vld [vmem:[#allocation7 + $0x6c] sm:$0xff]  ;;  %v2055_v18 = vld [vmem:[#allocation7 + $0x64] sm:$0xff] }
0x18aa   :  { %2099 = vrot.lane.b32.xlu2 %v3087_v59, %s2427_s28  ;;  %2163 = vmatpush.msrb.mxu0 %v2058_v31 }
0x18ab   :  { %v1963_v27 = vadd.f32 %v2351_v28, %v1950_v36 }
0x18ac   :  { %2164 = vmatpush.msrb.mxu0 %v2057_v19 }
0x18ad   :  { %v1977_v46 = vadd.f32 %v1975_v38, %v1963_v27 }
0x18ae   :  { %2165 = vmatpush.msrb.mxu0 %v2056_v56 }
0x18af   :  { %v1993_v21 = vadd.f32 %v1991_v54, %v1977_v46 }
0x18b0   :  { %2166 = vmatpush.msrb.mxu0 %v2055_v18 }
0x18b1   :  { %1934 = vperm.xlu0 %2243, %v2359_v42   ;;  %v2009_v20 = vadd.f32 %v2007_v53, %v1993_v21 }
0x18b9   :  { %1979 = vperm.xlu0 %2243, %v2361_v26  }
0x18c1   :  { %2021 = vperm.xlu0 %2243, %v2009_v20  }
0x18c9   :  { %1995 = vperm.xlu0 %2243, %v2363_v41   ;;  %v2054_v41 = vld [vmem:[#allocation7 + $0x5c] sm:$0xff] }
0x18ca   :  { %2167 = vmatpush.msrb.mxu0 %v2054_v41 }
0x18cc   :  { %2168 = vmatpush.msrb.mxu0 %v2053_v4 }
0x18ce   :  { %2169 = vmatpush.msrb.mxu0 %v2052_v47 }
0x18d1   :  { %2011 = vperm.xlu0 %2243, %v2365_v52  }
0x18fc   :  { %v1953_v13 = vpop.permute.xlu2 %1952 }
0x18fd   :  { %v1955_v17 = vmul.f32 %v1953_v13, %v3074_v50 }
0x18ff   :  { %v1957_v37 = vrot.slane %v1955_v17, 6 }
0x1904   :  { %v2100_v62 = vpop.permute.xlu2 %2099 }
0x1912   :  { %v1967_v42 = vpop.permute.xlu1 %1966 }
0x1913   :  { %v1901_v1 = vpop.permute.xlu0 %1900  ;;  %v1969_v58 = vmul.f32 %v1967_v42, %v3078_v23 }
0x1914   :  { %v1903_v14 = vmul.f32 %v1901_v1, %v3074_v50 }
0x191b   :  { %v1917_v2 = vpop.permute.xlu0 %1916 }
0x191c   :  { %v1919_v6 = vmul.f32 %v1917_v2, %v3074_v50 }
0x191e   :  { %v1921_v12 = vrot.slane %v1919_v6, 2 }
0x1920   :  { %v1923_v22 = vadd.f32 %v1921_v12, %v1903_v14 }
0x1923   :  { %v1935_v44 = vpop.permute.xlu0 %1934 }
0x1924   :  { %v1937_v10 = vmul.f32 %v1935_v44, %v3074_v50  ;;  %v2127_v44 = vpop.f32.mrf.mxu0 }
0x1925   :  { %v2128_v51 = vadd.f32 %v2127_v44, %v2100_v62 }
0x1926   :  { %v1939_v15 = vrot.slane %v1937_v10, 4 }
0x1927   :  { %v2130_v63 = vmax.f32 %v2128_v51, 0.0 }
0x1928   :  { %v1941_v28 = vadd.f32 %v1939_v15, %v1923_v22 }
0x192a   :  { %v1959_v32 = vadd.f32 %v1957_v37, %v1941_v28 }
0x192b   :  { %v1980_v49 = vpop.permute.xlu0 %1979 }
0x192c   :  { %v1982_v39 = vmul.f32 %v1980_v49, %v3078_v23  ;;  %v1970_v36 = vadd.f32 %v1969_v58, %v1959_v32  ;;  %v2051_v49 = vld [vmem:[#allocation7 + $0x44] sm:$0xff] }
0x192d   :  { %2170 = vmatpush.msrb.mxu0 %v2051_v49 }
0x192e   :  { %v1984_v35 = vrot.slane %v1982_v39, 2 }
0x1930   :  { %v1986_v46 = vadd.f32 %v1984_v35, %v1970_v36 }
0x1933   :  { %v2022_v9 = vpop.permute.xlu0 %2021 }
0x1934   :  { %2366 = vrcp.f32 %v2022_v9  ;;  %v2035_v27 = vand.u32 2147483648, %v2022_v9  ;;  %vm2029_vm5 = vweird.f32 %v2022_v9  ;;  %v2033_v54 = vand.u32 2147483647, %v2022_v9 }
0x1936   :  { %v2036_v1 = vor.u32 1.1754944e-38, %v2035_v27  ;;  %vm2034_vm7 = vcmp.eq.f32.partialorder %v2033_v54, 8.507059e+37 }
0x193a   :  { %v2367_v25 = vpop.eup %2366 }
0x193b   :  { %v2025_v29 = vmul.f32 %v2367_v25, %v2022_v9  ;;  %v1996_v30 = vpop.permute.xlu0 %1995  ;;  %vm2030_vm3 = vweird.f32 %v2367_v25 }
0x193c   :  { %v1998_v33 = vmul.f32 %v1996_v30, %v3078_v23  ;;  %vm2031_vm6 = vmor %vm2029_vm5, %vm2030_vm3 }
0x193d   :  { %v2026_v43 = vsub.f32 1.0, %v2025_v29 }
0x193e   :  { %v2000_v45 = vrot.slane %v1998_v33, 4 }
0x193f   :  { %v2027_v50 = vmul.f32 %v2367_v25, %v2026_v43 }
0x1940   :  { %v2002_v21 = vadd.f32 %v2000_v45, %v1986_v46 }
0x1941   :  { %v2028_v26 = vadd.f32 %v2367_v25, %v2027_v50 }
0x1943   :  { %v2012_v38 = vpop.permute.xlu0 %2011  ;;  %v2032_v53 = vsel %vm2031_vm6, %v2367_v25, %v2028_v26 }
0x1944   :  { %v2014_v52 = vmul.f32 %v2012_v38, %v3078_v23  ;;  %v2037_v61 = vsel %vm2034_vm7, %v2036_v1, %v2032_v53  ;;  %v2068_v23 = vld [vmem:[#allocation7 + $0x10c] sm:$0xff] }
0x1945   :  { %2149 = vmatpush.msrb.mxu1 %v2068_v23 }
0x1946   :  { %v2016_v20 = vrot.slane %v2014_v52, 6 }
0x1947   :  { %2150 = vmatpush.msrb.mxu1 %v2067_v48 }
0x1948   :  { %v2018_v2 = vadd.f32 %v2016_v20, %v2002_v21  ;;  %2233 = vmatmul.msk.f32.vlgmr.msrb.gmra.mxu1 %vm2131_vm8, %v2130_v63 }
0x194a   :  { %v2038_v3 = vmul.f32 %v2037_v61, %v2018_v2 }
0x194c   :  { %2230 = vmatmul.msk.f32.vlgmr.msrb.gmra.mxu3 %vm279_vm4, %v2038_v3  ;;  %vm2179_vm4 = vcmask 517120  }
0x19c5   :  { %v2152_v60 = vpop.f32.mrf.mxu1 }
0x19cf   :  { %v2093_v57 = vpop.f32.mrf.mxu3 }
0x19d0   :  { %v2094_v5 = vadd.f32 %v2248_v55, %v2093_v57 }
0x19d2   :  { %v2096_v0 = vmax.f32 %v2094_v5, 0.0 }
0x19d4   :  { %2171 = vmatmul.f32.vlgmr.msrb.gmra.mxu0 %v2096_v0 }
0x1a51   :  { %v2172_v6 = vpop.f32.mrf.mxu0 }
0x1a52   :  { %v2173_v7 = vadd.f32 %v2172_v6, %v2152_v60 }
0x1a54   :  { %v2175_v11 = vadd.f32 %v3087_v59, %v2173_v7 }
0x1a56   :  { %v2176_v10 = vmax.f32 %v2175_v11, 0.0 }
0x1a58   :  { %v2178_v9 = vmul.f32 %v2249_v8, %v2176_v10 }
0x1a5a   :  { %v2180_v34 = vsel %vm2179_vm4, %v2178_v9, 0.0 }
0x1a5b   :  { %2181 = vadd.xlane.f32.xlu1 %v2180_v34 }
0x1ace   :  { %v2182_v12 = vpop.xlane.xlu1 %2181 }
0x1acf   :  { %v2183_v13 = vadd.f32 %v2249_v8, %v2182_v12 }
0x1ad1   :  { %2185 = vrot.lane.b32.xlu0 %v2183_v13, %s2427_s28 }
0x1b43   :  { %v2186_v40 = vpop.permute.xlu0 %2185 }
0x1b44   :  { %2189 = vst.msk [vmem:[%s3108_s3] sm:$0x3] %vm2188_vm9, %v2186_v40 }
0x1b45   :  { %2194 = vsyncpa [#allocation6], 1 }
0x1b46   :  { %2195 = vsyncpa [#allocation8], 1 }

</bundles_post_ra>
